<compile_context>
chip_gen: v7x
topology: tpu7x:2x2x1
jax: 0.10.0
libtpu: 0.0.40
codegen_flags: <defaults>
</compile_context>

<pallas_src>
import math

import jax
import jax.numpy as jnp
from jax.experimental import pallas as pl
from jax.experimental.pallas import tpu as pltpu

C_PAD = 128                       # conv outputs stored lane-dense (128 lanes)
_VMEM_LIMIT = 32 * 1024 * 1024    # explicit scoped-VMEM budget (fits v5e/v6e/v7x)


# ----------------------------------------------------------------------------
# Pallas kernels
# ----------------------------------------------------------------------------

def _conv_relu_pool_kernel(p_ref, w_ref, b_ref, o_ref):
    """Fused conv GEMM + bias + ReLU + 2x2 maxpool for one (batch, m-tile) grid cell.

    p_ref: (4*tm, K) bf16  im2col patches; rows ordered (pool-quadrant q, pooled position m)
    w_ref: (K, 128)  bf16  conv weight, rows ordered (ky, kx, cin), cout zero-padded to 128
    b_ref: (1, 128)  f32
    o_ref: (tm, 128) bf16  pooled activations (rows = pooled (hp, wp) row-major)
    """
    tm = o_ref.shape[0]
    # single MXU push with all 4 quadrants stacked into M
    z = jnp.dot(p_ref[...], w_ref[...], preferred_element_type=jnp.float32)   # (4*tm, 128)
    # 2x2 maxpool == max over the 4 quadrant row-blocks (tm is a multiple of 8 -> aligned slices)
    acc = jnp.maximum(jnp.maximum(z[:tm], z[tm:2 * tm]),
                      jnp.maximum(z[2 * tm:3 * tm], z[3 * tm:]))
    # per-channel bias + ReLU commute with the max -> apply once at the end
    o_ref[...] = jnp.maximum(acc + b_ref[...], 0.0).astype(o_ref.dtype)


def _conv3_fc_head_kernel(p_ref, w3_ref, b3_ref, fw1_ref, fb1_ref, fw2_ref, fb2_ref, o_ref):
    """conv3 + bias + ReLU + 2x2 pool + fc1 + ReLU + fc2 + softmax for a block of 8 samples.

    p_ref:  (128, K)   bf16  rows ordered (quadrant q[4], pooled position p[4], sample n[8])
    w3_ref: (K, 128)   bf16
    b3_ref: (1, 128)   f32
    fw1_ref:(512, 512) bf16  rows ordered (p, c): folds PyTorch's (C,H,W) flatten + layout change
    fb1_ref:(1, 512) f32,  fw2_ref:(512, 2) bf16,  fb2_ref:(1, 2) f32
    o_ref:  (8, 2)     f32   softmax probabilities
    """
    nloc = o_ref.shape[0]                                                      # 8 samples
    # one GEMM for all 16 (quadrant, position) combinations instead of 16 tiny M=2 dots
    z = jnp.dot(p_ref[...], w3_ref[...], preferred_element_type=jnp.float32)  # (128, 128)
    b3 = b3_ref[...]
    cols = []
    for p in range(4):                                       # pooled position p = h*2 + w
        m = z[p * nloc:(p + 1) * nloc]
        for q in range(1, 4):                                # 2x2 maxpool over quadrants
            off = (q * 4 + p) * nloc
            m = jnp.maximum(m, z[off:off + nloc])
        cols.append(jnp.maximum(m + b3, 0.0))                # bias + ReLU after the max
    # fc1 input: four pooled (8,128) blocks laid out along lanes -> (8, 512), single fc1 GEMM
    h = jnp.concatenate(cols, axis=-1).astype(jnp.bfloat16)
    h1 = jnp.maximum(jnp.dot(h, fw1_ref[...], preferred_element_type=jnp.float32)
                     + fb1_ref[...], 0.0).astype(jnp.bfloat16)                 # (8, 512)
    logits = jnp.dot(h1, fw2_ref[...], preferred_element_type=jnp.float32) + fb2_ref[...]
    mx = jnp.max(logits, axis=-1, keepdims=True)                               # stable softmax
    e = jnp.exp(logits - mx)
    s = jnp.sum(e, axis=-1, keepdims=True)
    o_ref[...] = (e * pl.reciprocal(s, approx=True)).astype(o_ref.dtype)


# ----------------------------------------------------------------------------
# pallas_call wrappers
# ----------------------------------------------------------------------------

def _pick_tiling(mp, max_tile=160):
    """Smallest tile count whose 8-aligned tile is <= max_tile. Returns (tile_m, padded_mp)."""
    t = 1
    while True:
        tile = -(-mp // t)
        tile = -(-tile // 8) * 8
        if tile <= max_tile or tile <= 8:
            return tile, t * tile
        t += 1


def conv_relu_pool(patches, wmat, bias):
    """patches: (N, 4, Mp, K) bf16 -> pooled (N, Mp_pad, 128) bf16 (caller trims rows/lanes)."""
    N, Q, Mp, K = patches.shape
    C = wmat.shape[1]
    tile_m, mp_pad = _pick_tiling(Mp)
    n_tiles = mp_pad // tile_m
    if mp_pad != Mp:
        patches = jnp.pad(patches, ((0, 0), (0, 0), (0, mp_pad - Mp), (0, 0)))
    # stack the 4 pool-quadrants into the GEMM M dimension per m-tile (XLA-side relayout)
    patches = patches.reshape(N, Q, n_tiles, tile_m, K).transpose(0, 2, 1, 3, 4)
    patches = patches.reshape(N, n_tiles, Q * tile_m, K)
    return pl.pallas_call(
        _conv_relu_pool_kernel,
        out_shape=jax.ShapeDtypeStruct((N, mp_pad, C), jnp.bfloat16),
        grid=(N, n_tiles),
        in_specs=[pl.BlockSpec((None, None, Q * tile_m, K), lambda n, t: (n, t, 0, 0)),
                  pl.BlockSpec((K, C), lambda n, t: (0, 0)),
                  pl.BlockSpec((1, C), lambda n, t: (0, 0))],
        out_specs=pl.BlockSpec((None, tile_m, C), lambda n, t: (n, t, 0)),
        compiler_params=pltpu.CompilerParams(
            dimension_semantics=("parallel", "parallel"),   # v7x: split over both TensorCores
            vmem_limit_bytes=_VMEM_LIMIT),
    )(patches, wmat, bias)


def conv3_fc_head(p3, w3, b3, fw1, fb1, fw2, fb2):
    """p3: (nb, 128, K) bf16, one block of 8 samples per grid step -> (8*nb, 2) f32 probs."""
    nb, M, K = p3.shape
    n_pad = nb * 8

    def full(a):
        return pl.BlockSpec(a.shape, lambda b, _nd=a.ndim: (0,) * _nd)

    return pl.pallas_call(
        _conv3_fc_head_kernel,
        out_shape=jax.ShapeDtypeStruct((n_pad, 2), jnp.float32),
        grid=(nb,),
        in_specs=[pl.BlockSpec((None, M, K), lambda b: (b, 0, 0)),
                  full(w3), full(b3), full(fw1), full(fb1), full(fw2), full(fb2)],
        out_specs=pl.BlockSpec((8, 2), lambda b: (b, 0)),
        compiler_params=pltpu.CompilerParams(
            dimension_semantics=("parallel",),
            vmem_limit_bytes=_VMEM_LIMIT),
    )(p3, w3, b3, fw1, fb1, fw2, fb2)


# ----------------------------------------------------------------------------
# JAX glue (small XLA fusions between the three pallas_calls)
# ----------------------------------------------------------------------------

def _quadrant_patches(x, k=5):
    """x: (N, H, W, C) -> (N, 4, Hp*Wp, k*k*C).

    Axis 1 indexes the position (dy, dx) inside each 2x2 pool window; axis 2 rows are pooled
    output positions (hp, wp) row-major; K order is (ky, kx, cin), matching the weight matrices.
    Only conv outputs that survive the floor-div 2x2 pool are materialized.
    """
    N, H, W, C = x.shape
    Hp, Wp = (H - k + 1) // 2, (W - k + 1) // 2
    cols = [x[:, ky:ky + 2 * Hp, kx:kx + 2 * Wp, :] for ky in range(k) for kx in range(k)]
    patches = jnp.stack(cols, axis=3).reshape(N, 2 * Hp, 2 * Wp, k * k * C)
    quads = [patches[:, dy::2, dx::2, :].reshape(N, Hp * Wp, k * k * C)
             for dy in range(2) for dx in range(2)]
    return jnp.stack(quads, axis=1)


def net_forward(x_nchw, prep):
    N, _, H, _ = x_nchw.shape
    x = jnp.transpose(x_nchw, (0, 2, 3, 1)).astype(jnp.bfloat16)      # NCHW -> NHWC, bf16 for MXU

    # conv1 (cin=1, K lane-padded 25->32) -> relu -> 2x2 pool
    q = _quadrant_patches(x)                                           # (N, 4, 529, 25)
    q = jnp.pad(q, ((0, 0), (0, 0), (0, 0), (0, prep["w1"].shape[0] - q.shape[-1])))
    s1 = (H - 4) // 2
    y = conv_relu_pool(q, prep["w1"], prep["b1"])                      # (N, 544, 128)
    x = y[:, :s1 * s1, :32].reshape(N, s1, s1, 32)                     # trim pad rows + cout lanes

    # conv2 (real cin=32 -> K=800) -> relu -> 2x2 pool
    s2 = (s1 - 4) // 2
    y = conv_relu_pool(_quadrant_patches(x), prep["w2"], prep["b2"])   # (N, 88, 128)
    x = y[:, :s2 * s2, :64].reshape(N, s2, s2, 64)

    # conv3 (real cin=64 -> K=1600) + pool + fc1 + relu + fc2 + softmax (fused head)
    q = _quadrant_patches(x)                                           # (N, 4, 4, 1600)
    n_pad = -(-N // 8) * 8                                             # sublane-aligned batch pad
    q = jnp.pad(q, ((0, n_pad - N), (0, 0), (0, 0), (0, 0)))
    nb = n_pad // 8
    qn, pn, K = q.shape[1], q.shape[2], q.shape[3]
    p3 = q.reshape(nb, 8, qn, pn, K).transpose(0, 2, 3, 1, 4).reshape(nb, qn * pn * 8, K)
    out = conv3_fc_head(p3, prep["w3"], prep["b3"],
                        prep["fw1"], prep["fb1"], prep["fw2"], prep["fb2"])
    return out[:N]


# ----------------------------------------------------------------------------
# Parameters
# ----------------------------------------------------------------------------

def init_params(key):
    """Deterministic synthetic parameters in PyTorch's native layouts (conv OIHW, linear (out,in))."""
    ks = jax.random.split(key, 10)

    def wn(k, shape, fan_in):
        return (jax.random.normal(k, shape, jnp.float32) / math.sqrt(fan_in)).astype(jnp.float32)

    return {
        "conv1_w": wn(ks[0], (32, 1, 5, 5), 25),        "conv1_b": 0.01 * jax.random.normal(ks[1], (32,)),
        "conv2_w": wn(ks[2], (64, 32, 5, 5), 25 * 32),  "conv2_b": 0.01 * jax.random.normal(ks[3], (64,)),
        "conv3_w": wn(ks[4], (128, 64, 5, 5), 25 * 64), "conv3_b": 0.01 * jax.random.normal(ks[5], (128,)),
        "fc1_w": wn(ks[6], (512, 512), 512),            "fc1_b": 0.01 * jax.random.normal(ks[7], (512,)),
        "fc2_w": wn(ks[8], (2, 512), 512),              "fc2_b": 0.01 * jax.random.normal(ks[9], (2,)),
    }


def prepare_params(p):
    """PyTorch-layout params -> kernel-ready matrices.

    Conv weights: OIHW -> (ky,kx,cin,cout)-ordered GEMM matrices; cout zero-padded to 128
    (lane-dense stores), cin kept at its REAL size (no K-dim zero padding).  fc1's rows are
    permuted so the head kernel's (p, c) lane layout is consumed directly (folds the PyTorch
    (C,H,W) flatten).  MXU operands bf16, biases f32.
    """
    def conv_wmat(w_oihw, rows_pad=None):
        w = jnp.transpose(w_oihw, (2, 3, 1, 0))                          # OIHW -> HWIO
        k, _, cin, cout = w.shape
        w = jnp.pad(w, ((0, 0), (0, 0), (0, 0), (0, C_PAD - cout)))
        w = w.reshape(k * k * cin, C_PAD)
        if rows_pad is not None and rows_pad > w.shape[0]:
            w = jnp.pad(w, ((0, rows_pad - w.shape[0]), (0, 0)))
        return w.astype(jnp.bfloat16)

    def conv_bias(b):
        return jnp.pad(b, (0, C_PAD - b.shape[0])).reshape(1, C_PAD).astype(jnp.float32)

    # fc1 weight: (out, in) with in-index (c, h, w) -> rows reordered to (p=h*2+w, c)
    fw1 = p["fc1_w"].reshape(512, C_PAD, 2, 2)                           # (out, c, h, w)
    fw1 = jnp.transpose(fw1, (2, 3, 1, 0)).reshape(512, 512).astype(jnp.bfloat16)
    return {
        "w1": conv_wmat(p["conv1_w"], rows_pad=32), "b1": conv_bias(p["conv1_b"]),
        "w2": conv_wmat(p["conv2_w"]),              "b2": conv_bias(p["conv2_b"]),
        "w3": conv_wmat(p["conv3_w"]),              "b3": conv_bias(p["conv3_b"]),
        "fw1": fw1,
        "fb1": p["fc1_b"].reshape(1, 512).astype(jnp.float32),
        "fw2": jnp.transpose(p["fc2_w"]).astype(jnp.bfloat16),
        "fb2": p["fc2_b"].reshape(1, 2).astype(jnp.float32),
    }


# ----------------------------------------------------------------------------
# Pure-JAX reference (f32) for correctness checking
# ----------------------------------------------------------------------------

def net_forward_ref(x, p):
    def conv(x, w, b):
        y = jax.lax.conv_general_dilated(x, w, (1, 1), "VALID",
                                         dimension_numbers=("NCHW", "OIHW", "NCHW"))
        return y + b.reshape(1, -1, 1, 1)

    def pool(x):
        return jax.lax.reduce_window(x, -jnp.inf, jax.lax.max,
                                     (1, 1, 2, 2), (1, 1, 2, 2), "VALID")

    x = pool(jax.nn.relu(conv(x, p["conv1_w"], p["conv1_b"])))
    x = pool(jax.nn.relu(conv(x, p["conv2_w"], p["conv2_b"])))
    x = pool(jax.nn.relu(conv(x, p["conv3_w"], p["conv3_b"])))
    x = x.reshape(x.shape[0], -1)                                        # (C, H, W) flatten
    x = jax.nn.relu(x @ p["fc1_w"].T + p["fc1_b"])
    x = x @ p["fc2_w"].T + p["fc2_b"]
    return jax.nn.softmax(x, axis=1)


if __name__ == "__main__":
    key = jax.random.PRNGKey(0)
    pkey, xkey = jax.random.split(key)
    params = init_params(pkey)
    prep = prepare_params(params)

    # Spatial must be 50x50: fc1's input dim (128*2*2=512) fixes it. Batch kept small (2).
    x = jax.random.normal(xkey, (2, 1, 50, 50), jnp.float32)

    out = jax.block_until_ready(jax.jit(net_forward)(x, prep))
    ref = jax.block_until_ready(jax.jit(net_forward_ref)(x, params))

    assert out.shape == (2, 2), out.shape
    assert bool(jnp.all(jnp.isfinite(out)))
    # softmax rows sum to 1 (bf16 MXU operands + approx reciprocal -> loose tolerance)
    assert bool(jnp.allclose(jnp.sum(out, axis=1), 1.0, atol=2e-3))
    # matches the f32 reference up to bf16 activation/weight rounding
    assert bool(jnp.allclose(out, ref, atol=0.1)), (out, ref)
    print("KERNEL_OK")
</pallas_src>

<mosaic_0001>
module attributes {stable_mosaic.version = 11 : i64} {
  func.func @_conv_relu_pool_kernel(%arg0: i32, %arg1: i32, %arg2: memref<1x1x544x32xbf16, #tpu.memory_space<vmem>>, %arg3: memref<32x128xbf16, #tpu.memory_space<vmem>>, %arg4: memref<1x128xf32, #tpu.memory_space<vmem>>, %arg5: memref<1x136x128xbf16, #tpu.memory_space<vmem>>) attributes {dimension_semantics = [#tpu.dimension_semantics<parallel>, #tpu.dimension_semantics<parallel>], iteration_bounds = array<i64: 2, 4>, scalar_prefetch = 0 : i64, scratch_operands = 0 : i64, tpu.core_type = #tpu.core_type<tc>, window_params = [{transform_indices = @transform_0, window_bounds = array<i64: 1, 1, 544, 32>}, {pipeline_mode = #tpu.pipeline_mode<synchronous>, transform_indices = @transform_1, window_bounds = array<i64: 32, 128>}, {pipeline_mode = #tpu.pipeline_mode<synchronous>, transform_indices = @transform_2, window_bounds = array<i64: 1, 128>}, {transform_indices = @transform_3, window_bounds = array<i64: 1, 136, 128>}]} {
    %c0 = arith.constant 0 : index
    %c0_0 = arith.constant 0 : index
    %c0_1 = arith.constant 0 : index
    %c0_2 = arith.constant 0 : index
    %0 = vector.load %arg2[%c0, %c0_0, %c0_1, %c0_2] : memref<1x1x544x32xbf16, #tpu.memory_space<vmem>>, vector<1x1x544x32xbf16>
    %1 = vector.shape_cast %0 : vector<1x1x544x32xbf16> to vector<544x32xbf16>
    %c0_3 = arith.constant 0 : index
    %c0_4 = arith.constant 0 : index
    %2 = vector.load %arg3[%c0_3, %c0_4] : memref<32x128xbf16, #tpu.memory_space<vmem>>, vector<32x128xbf16>
    %cst = arith.constant dense<0.000000e+00> : vector<544x128xf32>
    %3 = tpu.matmul %1, %2, %cst {dimension_numbers = #tpu.dot_dimension_numbers<[1], [0], [0], [1], [0, 0, 1, 1], [], []>} : vector<544x32xbf16>, vector<32x128xbf16>, vector<544x128xf32> -> vector<544x128xf32>
    %4 = vector.extract_strided_slice %3 {offsets = [0, 0], sizes = [136, 128], strides = [1, 1]} : vector<544x128xf32> to vector<136x128xf32>
    %5 = vector.extract_strided_slice %3 {offsets = [136, 0], sizes = [136, 128], strides = [1, 1]} : vector<544x128xf32> to vector<136x128xf32>
    %6 = arith.maximumf %4, %5 : vector<136x128xf32>
    %7 = vector.extract_strided_slice %3 {offsets = [272, 0], sizes = [136, 128], strides = [1, 1]} : vector<544x128xf32> to vector<136x128xf32>
    %8 = vector.extract_strided_slice %3 {offsets = [408, 0], sizes = [136, 128], strides = [1, 1]} : vector<544x128xf32> to vector<136x128xf32>
    %9 = arith.maximumf %7, %8 : vector<136x128xf32>
    %10 = arith.maximumf %6, %9 : vector<136x128xf32>
    %c0_5 = arith.constant 0 : index
    %c0_6 = arith.constant 0 : index
    %11 = vector.load %arg4[%c0_5, %c0_6] : memref<1x128xf32, #tpu.memory_space<vmem>>, vector<1x128xf32>
    %12 = vector.broadcast %11 : vector<1x128xf32> to vector<136x128xf32>
    %13 = arith.addf %10, %12 : vector<136x128xf32>
    %cst_7 = arith.constant 0.000000e+00 : f32
    %14 = vector.broadcast %cst_7 : f32 to vector<136x128xf32>
    %15 = arith.maximumf %13, %14 : vector<136x128xf32>
    %16 = arith.truncf %15 : vector<136x128xf32> to vector<136x128xbf16>
    %c0_8 = arith.constant 0 : index
    %c0_9 = arith.constant 0 : index
    %c0_10 = arith.constant 0 : index
    %17 = vector.load %arg5[%c0_8, %c0_9, %c0_10] : memref<1x136x128xbf16, #tpu.memory_space<vmem>>, vector<1x136x128xbf16>
    %18 = vector.shape_cast %17 : vector<1x136x128xbf16> to vector<136x128xbf16>
    %19 = vector.shape_cast %16 : vector<136x128xbf16> to vector<1x136x128xbf16>
    tpu.vector_store %arg5[%c0_8, %c0_9, %c0_10], %19 {strides = array<i32>} : memref<1x136x128xbf16, #tpu.memory_space<vmem>>, vector<1x136x128xbf16>,
    return
  }
  func.func @transform_0(%arg0: i32, %arg1: i32) -> (i32, i32, i32, i32) {
    %c0_i32 = arith.constant 0 : i32
    %c0_i32_0 = arith.constant 0 : i32
    %c0_i32_1 = arith.constant 0 : i32
    return %arg0, %arg1, %c0_i32, %c0_i32_0 : i32, i32, i32, i32
  }
  func.func @transform_1(%arg0: i32, %arg1: i32) -> (i32, i32) {
    %c0_i32 = arith.constant 0 : i32
    %c0_i32_0 = arith.constant 0 : i32
    %c0_i32_1 = arith.constant 0 : i32
    return %c0_i32, %c0_i32_0 : i32, i32
  }
  func.func @transform_2(%arg0: i32, %arg1: i32) -> (i32, i32) {
    %c0_i32 = arith.constant 0 : i32
    %c0_i32_0 = arith.constant 0 : i32
    %c0_i32_1 = arith.constant 0 : i32
    return %c0_i32, %c0_i32_0 : i32, i32
  }
  func.func @transform_3(%arg0: i32, %arg1: i32) -> (i32, i32, i32) {
    %c0_i32 = arith.constant 0 : i32
    %c0_i32_0 = arith.constant 0 : i32
    return %arg0, %arg1, %c0_i32 : i32, i32, i32
  }
}

module attributes {stable_mosaic.version = 11 : i64} {
  func.func @_conv_relu_pool_kernel(%arg0: i32, %arg1: i32, %arg2: memref<1x1x352x800xbf16, #tpu.memory_space<vmem>>, %arg3: memref<800x128xbf16, #tpu.memory_space<vmem>>, %arg4: memref<1x128xf32, #tpu.memory_space<vmem>>, %arg5: memref<1x88x128xbf16, #tpu.memory_space<vmem>>) attributes {dimension_semantics = [#tpu.dimension_semantics<parallel>, #tpu.dimension_semantics<parallel>], iteration_bounds = array<i64: 2, 1>, scalar_prefetch = 0 : i64, scratch_operands = 0 : i64, tpu.core_type = #tpu.core_type<tc>, window_params = [{transform_indices = @transform_0, window_bounds = array<i64: 1, 1, 352, 800>}, {pipeline_mode = #tpu.pipeline_mode<synchronous>, transform_indices = @transform_1, window_bounds = array<i64: 800, 128>}, {pipeline_mode = #tpu.pipeline_mode<synchronous>, transform_indices = @transform_2, window_bounds = array<i64: 1, 128>}, {transform_indices = @transform_3, window_bounds = array<i64: 1, 88, 128>}]} {
    %c0 = arith.constant 0 : index
    %c0_0 = arith.constant 0 : index
    %c0_1 = arith.constant 0 : index
    %c0_2 = arith.constant 0 : index
    %0 = vector.load %arg2[%c0, %c0_0, %c0_1, %c0_2] : memref<1x1x352x800xbf16, #tpu.memory_space<vmem>>, vector<1x1x352x800xbf16>
    %1 = vector.shape_cast %0 : vector<1x1x352x800xbf16> to vector<352x800xbf16>
    %c0_3 = arith.constant 0 : index
    %c0_4 = arith.constant 0 : index
    %2 = vector.load %arg3[%c0_3, %c0_4] : memref<800x128xbf16, #tpu.memory_space<vmem>>, vector<800x128xbf16>
    %cst = arith.constant dense<0.000000e+00> : vector<352x128xf32>
    %3 = tpu.matmul %1, %2, %cst {dimension_numbers = #tpu.dot_dimension_numbers<[1], [0], [0], [1], [0, 0, 1, 1], [], []>} : vector<352x800xbf16>, vector<800x128xbf16>, vector<352x128xf32> -> vector<352x128xf32>
    %4 = vector.extract_strided_slice %3 {offsets = [0, 0], sizes = [88, 128], strides = [1, 1]} : vector<352x128xf32> to vector<88x128xf32>
    %5 = vector.extract_strided_slice %3 {offsets = [88, 0], sizes = [88, 128], strides = [1, 1]} : vector<352x128xf32> to vector<88x128xf32>
    %6 = arith.maximumf %4, %5 : vector<88x128xf32>
    %7 = vector.extract_strided_slice %3 {offsets = [176, 0], sizes = [88, 128], strides = [1, 1]} : vector<352x128xf32> to vector<88x128xf32>
    %8 = vector.extract_strided_slice %3 {offsets = [264, 0], sizes = [88, 128], strides = [1, 1]} : vector<352x128xf32> to vector<88x128xf32>
    %9 = arith.maximumf %7, %8 : vector<88x128xf32>
    %10 = arith.maximumf %6, %9 : vector<88x128xf32>
    %c0_5 = arith.constant 0 : index
    %c0_6 = arith.constant 0 : index
    %11 = vector.load %arg4[%c0_5, %c0_6] : memref<1x128xf32, #tpu.memory_space<vmem>>, vector<1x128xf32>
    %12 = vector.broadcast %11 : vector<1x128xf32> to vector<88x128xf32>
    %13 = arith.addf %10, %12 : vector<88x128xf32>
    %cst_7 = arith.constant 0.000000e+00 : f32
    %14 = vector.broadcast %cst_7 : f32 to vector<88x128xf32>
    %15 = arith.maximumf %13, %14 : vector<88x128xf32>
    %16 = arith.truncf %15 : vector<88x128xf32> to vector<88x128xbf16>
    %c0_8 = arith.constant 0 : index
    %c0_9 = arith.constant 0 : index
    %c0_10 = arith.constant 0 : index
    %17 = vector.load %arg5[%c0_8, %c0_9, %c0_10] : memref<1x88x128xbf16, #tpu.memory_space<vmem>>, vector<1x88x128xbf16>
    %18 = vector.shape_cast %17 : vector<1x88x128xbf16> to vector<88x128xbf16>
    %19 = vector.shape_cast %16 : vector<88x128xbf16> to vector<1x88x128xbf16>
    tpu.vector_store %arg5[%c0_8, %c0_9, %c0_10], %19 {strides = array<i32>} : memref<1x88x128xbf16, #tpu.memory_space<vmem>>, vector<1x88x128xbf16>,
    return
  }
  func.func @transform_0(%arg0: i32, %arg1: i32) -> (i32, i32, i32, i32) {
    %c0_i32 = arith.constant 0 : i32
    %c0_i32_0 = arith.constant 0 : i32
    %c0_i32_1 = arith.constant 0 : i32
    return %arg0, %arg1, %c0_i32, %c0_i32_0 : i32, i32, i32, i32
  }
  func.func @transform_1(%arg0: i32, %arg1: i32) -> (i32, i32) {
    %c0_i32 = arith.constant 0 : i32
    %c0_i32_0 = arith.constant 0 : i32
    %c0_i32_1 = arith.constant 0 : i32
    return %c0_i32, %c0_i32_0 : i32, i32
  }
  func.func @transform_2(%arg0: i32, %arg1: i32) -> (i32, i32) {
    %c0_i32 = arith.constant 0 : i32
    %c0_i32_0 = arith.constant 0 : i32
    %c0_i32_1 = arith.constant 0 : i32
    return %c0_i32, %c0_i32_0 : i32, i32
  }
  func.func @transform_3(%arg0: i32, %arg1: i32) -> (i32, i32, i32) {
    %c0_i32 = arith.constant 0 : i32
    %c0_i32_0 = arith.constant 0 : i32
    return %arg0, %arg1, %c0_i32 : i32, i32, i32
  }
}

module attributes {stable_mosaic.version = 11 : i64} {
  func.func @_conv3_fc_head_kernel(%arg0: i32, %arg1: memref<1x128x1600xbf16, #tpu.memory_space<vmem>>, %arg2: memref<1600x128xbf16, #tpu.memory_space<vmem>>, %arg3: memref<1x128xf32, #tpu.memory_space<vmem>>, %arg4: memref<512x512xbf16, #tpu.memory_space<vmem>>, %arg5: memref<1x512xf32, #tpu.memory_space<vmem>>, %arg6: memref<512x2xbf16, #tpu.memory_space<vmem>>, %arg7: memref<1x2xf32, #tpu.memory_space<vmem>>, %arg8: memref<8x2xf32, #tpu.memory_space<vmem>>) attributes {dimension_semantics = [#tpu.dimension_semantics<parallel>], iteration_bounds = array<i64: 1>, scalar_prefetch = 0 : i64, scratch_operands = 0 : i64, tpu.core_type = #tpu.core_type<tc>, window_params = [{transform_indices = @transform_0, window_bounds = array<i64: 1, 128, 1600>}, {pipeline_mode = #tpu.pipeline_mode<synchronous>, transform_indices = @transform_1, window_bounds = array<i64: 1600, 128>}, {pipeline_mode = #tpu.pipeline_mode<synchronous>, transform_indices = @transform_2, window_bounds = array<i64: 1, 128>}, {pipeline_mode = #tpu.pipeline_mode<synchronous>, transform_indices = @transform_3, window_bounds = array<i64: 512, 512>}, {pipeline_mode = #tpu.pipeline_mode<synchronous>, transform_indices = @transform_4, window_bounds = array<i64: 1, 512>}, {pipeline_mode = #tpu.pipeline_mode<synchronous>, transform_indices = @transform_5, window_bounds = array<i64: 512, 2>}, {pipeline_mode = #tpu.pipeline_mode<synchronous>, transform_indices = @transform_6, window_bounds = array<i64: 1, 2>}, {transform_indices = @transform_7, window_bounds = array<i64: 8, 2>}]} {
    %c0 = arith.constant 0 : index
    %c0_0 = arith.constant 0 : index
    %c0_1 = arith.constant 0 : index
    %0 = vector.load %arg1[%c0, %c0_0, %c0_1] : memref<1x128x1600xbf16, #tpu.memory_space<vmem>>, vector<1x128x1600xbf16>
    %1 = vector.shape_cast %0 : vector<1x128x1600xbf16> to vector<128x1600xbf16>
    %c0_2 = arith.constant 0 : index
    %c0_3 = arith.constant 0 : index
    %2 = vector.load %arg2[%c0_2, %c0_3] : memref<1600x128xbf16, #tpu.memory_space<vmem>>, vector<1600x128xbf16>
    %cst = arith.constant dense<0.000000e+00> : vector<128x128xf32>
    %3 = tpu.matmul %1, %2, %cst {dimension_numbers = #tpu.dot_dimension_numbers<[1], [0], [0], [1], [0, 0, 1, 1], [], []>} : vector<128x1600xbf16>, vector<1600x128xbf16>, vector<128x128xf32> -> vector<128x128xf32>
    %c0_4 = arith.constant 0 : index
    %c0_5 = arith.constant 0 : index
    %4 = vector.load %arg3[%c0_4, %c0_5] : memref<1x128xf32, #tpu.memory_space<vmem>>, vector<1x128xf32>
    %5 = vector.extract_strided_slice %3 {offsets = [0, 0], sizes = [8, 128], strides = [1, 1]} : vector<128x128xf32> to vector<8x128xf32>
    %6 = vector.extract_strided_slice %3 {offsets = [32, 0], sizes = [8, 128], strides = [1, 1]} : vector<128x128xf32> to vector<8x128xf32>
    %7 = arith.maximumf %5, %6 : vector<8x128xf32>
    %8 = vector.extract_strided_slice %3 {offsets = [64, 0], sizes = [8, 128], strides = [1, 1]} : vector<128x128xf32> to vector<8x128xf32>
    %9 = arith.maximumf %7, %8 : vector<8x128xf32>
    %10 = vector.extract_strided_slice %3 {offsets = [96, 0], sizes = [8, 128], strides = [1, 1]} : vector<128x128xf32> to vector<8x128xf32>
    %11 = arith.maximumf %9, %10 : vector<8x128xf32>
    %12 = vector.broadcast %4 : vector<1x128xf32> to vector<8x128xf32>
    %13 = arith.addf %11, %12 : vector<8x128xf32>
    %cst_6 = arith.constant 0.000000e+00 : f32
    %14 = vector.broadcast %cst_6 : f32 to vector<8x128xf32>
    %15 = arith.maximumf %13, %14 : vector<8x128xf32>
    %16 = vector.extract_strided_slice %3 {offsets = [8, 0], sizes = [8, 128], strides = [1, 1]} : vector<128x128xf32> to vector<8x128xf32>
    %17 = vector.extract_strided_slice %3 {offsets = [40, 0], sizes = [8, 128], strides = [1, 1]} : vector<128x128xf32> to vector<8x128xf32>
    %18 = arith.maximumf %16, %17 : vector<8x128xf32>
    %19 = vector.extract_strided_slice %3 {offsets = [72, 0], sizes = [8, 128], strides = [1, 1]} : vector<128x128xf32> to vector<8x128xf32>
    %20 = arith.maximumf %18, %19 : vector<8x128xf32>
    %21 = vector.extract_strided_slice %3 {offsets = [104, 0], sizes = [8, 128], strides = [1, 1]} : vector<128x128xf32> to vector<8x128xf32>
    %22 = arith.maximumf %20, %21 : vector<8x128xf32>
    %23 = vector.broadcast %4 : vector<1x128xf32> to vector<8x128xf32>
    %24 = arith.addf %22, %23 : vector<8x128xf32>
    %cst_7 = arith.constant 0.000000e+00 : f32
    %25 = vector.broadcast %cst_7 : f32 to vector<8x128xf32>
    %26 = arith.maximumf %24, %25 : vector<8x128xf32>
    %27 = vector.extract_strided_slice %3 {offsets = [16, 0], sizes = [8, 128], strides = [1, 1]} : vector<128x128xf32> to vector<8x128xf32>
    %28 = vector.extract_strided_slice %3 {offsets = [48, 0], sizes = [8, 128], strides = [1, 1]} : vector<128x128xf32> to vector<8x128xf32>
    %29 = arith.maximumf %27, %28 : vector<8x128xf32>
    %30 = vector.extract_strided_slice %3 {offsets = [80, 0], sizes = [8, 128], strides = [1, 1]} : vector<128x128xf32> to vector<8x128xf32>
    %31 = arith.maximumf %29, %30 : vector<8x128xf32>
    %32 = vector.extract_strided_slice %3 {offsets = [112, 0], sizes = [8, 128], strides = [1, 1]} : vector<128x128xf32> to vector<8x128xf32>
    %33 = arith.maximumf %31, %32 : vector<8x128xf32>
    %34 = vector.broadcast %4 : vector<1x128xf32> to vector<8x128xf32>
    %35 = arith.addf %33, %34 : vector<8x128xf32>
    %cst_8 = arith.constant 0.000000e+00 : f32
    %36 = vector.broadcast %cst_8 : f32 to vector<8x128xf32>
    %37 = arith.maximumf %35, %36 : vector<8x128xf32>
    %38 = vector.extract_strided_slice %3 {offsets = [24, 0], sizes = [8, 128], strides = [1, 1]} : vector<128x128xf32> to vector<8x128xf32>
    %39 = vector.extract_strided_slice %3 {offsets = [56, 0], sizes = [8, 128], strides = [1, 1]} : vector<128x128xf32> to vector<8x128xf32>
    %40 = arith.maximumf %38, %39 : vector<8x128xf32>
    %41 = vector.extract_strided_slice %3 {offsets = [88, 0], sizes = [8, 128], strides = [1, 1]} : vector<128x128xf32> to vector<8x128xf32>
    %42 = arith.maximumf %40, %41 : vector<8x128xf32>
    %43 = vector.extract_strided_slice %3 {offsets = [120, 0], sizes = [8, 128], strides = [1, 1]} : vector<128x128xf32> to vector<8x128xf32>
    %44 = arith.maximumf %42, %43 : vector<8x128xf32>
    %45 = vector.broadcast %4 : vector<1x128xf32> to vector<8x128xf32>
    %46 = arith.addf %44, %45 : vector<8x128xf32>
    %cst_9 = arith.constant 0.000000e+00 : f32
    %47 = vector.broadcast %cst_9 : f32 to vector<8x128xf32>
    %48 = arith.maximumf %46, %47 : vector<8x128xf32>
    %49 = tpu.concatenate %15, %26, %37, %48 in 1 : vector<8x128xf32>, vector<8x128xf32>, vector<8x128xf32>, vector<8x128xf32> -> vector<8x512xf32>
    %50 = arith.truncf %49 : vector<8x512xf32> to vector<8x512xbf16>
    %c0_10 = arith.constant 0 : index
    %c0_11 = arith.constant 0 : index
    %51 = vector.load %arg4[%c0_10, %c0_11] : memref<512x512xbf16, #tpu.memory_space<vmem>>, vector<512x512xbf16>
    %cst_12 = arith.constant dense<0.000000e+00> : vector<8x512xf32>
    %52 = tpu.matmul %50, %51, %cst_12 {dimension_numbers = #tpu.dot_dimension_numbers<[1], [0], [0], [1], [0, 0, 1, 1], [], []>} : vector<8x512xbf16>, vector<512x512xbf16>, vector<8x512xf32> -> vector<8x512xf32>
    %c0_13 = arith.constant 0 : index
    %c0_14 = arith.constant 0 : index
    %53 = vector.load %arg5[%c0_13, %c0_14] : memref<1x512xf32, #tpu.memory_space<vmem>>, vector<1x512xf32>
    %54 = vector.broadcast %53 : vector<1x512xf32> to vector<8x512xf32>
    %55 = arith.addf %52, %54 : vector<8x512xf32>
    %cst_15 = arith.constant 0.000000e+00 : f32
    %56 = vector.broadcast %cst_15 : f32 to vector<8x512xf32>
    %57 = arith.maximumf %55, %56 : vector<8x512xf32>
    %58 = arith.truncf %57 : vector<8x512xf32> to vector<8x512xbf16>
    %c0_16 = arith.constant 0 : index
    %c0_17 = arith.constant 0 : index
    %59 = vector.load %arg6[%c0_16, %c0_17] : memref<512x2xbf16, #tpu.memory_space<vmem>>, vector<512x2xbf16>
    %cst_18 = arith.constant dense<0.000000e+00> : vector<8x2xf32>
    %60 = tpu.matmul %58, %59, %cst_18 {dimension_numbers = #tpu.dot_dimension_numbers<[1], [0], [0], [1], [0, 0, 1, 1], [], []>} : vector<8x512xbf16>, vector<512x2xbf16>, vector<8x2xf32> -> vector<8x2xf32>
    %c0_19 = arith.constant 0 : index
    %c0_20 = arith.constant 0 : index
    %61 = vector.load %arg7[%c0_19, %c0_20] : memref<1x2xf32, #tpu.memory_space<vmem>>, vector<1x2xf32>
    %62 = vector.broadcast %61 : vector<1x2xf32> to vector<8x2xf32>
    %63 = arith.addf %60, %62 : vector<8x2xf32>
    %cst_21 = arith.constant dense<0xFF800000> : vector<8xf32>
    %64 = vector.multi_reduction <maximumf>, %63, %cst_21 [1] : vector<8x2xf32> to vector<8xf32>
    %65 = vector.shape_cast %64 : vector<8xf32> to vector<8x1xf32>
    %66 = vector.broadcast %65 : vector<8x1xf32> to vector<8x2xf32>
    %67 = arith.subf %63, %66 : vector<8x2xf32>
    %68 = math.exp %67 : vector<8x2xf32>
    %cst_22 = arith.constant dense<0.000000e+00> : vector<8xf32>
    %69 = vector.multi_reduction <add>, %68, %cst_22 [1] : vector<8x2xf32> to vector<8xf32>
    %70 = vector.shape_cast %69 : vector<8xf32> to vector<8x1xf32>
    %71 = tpu.reciprocal %70 {approx = true} : vector<8x1xf32> -> vector<8x1xf32>
    %72 = vector.broadcast %71 : vector<8x1xf32> to vector<8x2xf32>
    %73 = arith.mulf %68, %72 : vector<8x2xf32>
    %c0_23 = arith.constant 0 : index
    %c0_24 = arith.constant 0 : index
    %74 = vector.load %arg8[%c0_23, %c0_24] : memref<8x2xf32, #tpu.memory_space<vmem>>, vector<8x2xf32>
    tpu.vector_store %arg8[%c0_23, %c0_24], %73 {strides = array<i32>} : memref<8x2xf32, #tpu.memory_space<vmem>>, vector<8x2xf32>,
    return
  }
  func.func @transform_0(%arg0: i32) -> (i32, i32, i32) {
    %c0_i32 = arith.constant 0 : i32
    %c0_i32_0 = arith.constant 0 : i32
    %c0_i32_1 = arith.constant 0 : i32
    return %arg0, %c0_i32, %c0_i32_0 : i32, i32, i32
  }
  func.func @transform_1(%arg0: i32) -> (i32, i32) {
    %c0_i32 = arith.constant 0 : i32
    %c0_i32_0 = arith.constant 0 : i32
    %c0_i32_1 = arith.constant 0 : i32
    return %c0_i32, %c0_i32_0 : i32, i32
  }
  func.func @transform_2(%arg0: i32) -> (i32, i32) {
    %c0_i32 = arith.constant 0 : i32
    %c0_i32_0 = arith.constant 0 : i32
    %c0_i32_1 = arith.constant 0 : i32
    return %c0_i32, %c0_i32_0 : i32, i32
  }
  func.func @transform_3(%arg0: i32) -> (i32, i32) {
    %c0_i32 = arith.constant 0 : i32
    %c0_i32_0 = arith.constant 0 : i32
    %c0_i32_1 = arith.constant 0 : i32
    return %c0_i32, %c0_i32_0 : i32, i32
  }
  func.func @transform_4(%arg0: i32) -> (i32, i32) {
    %c0_i32 = arith.constant 0 : i32
    %c0_i32_0 = arith.constant 0 : i32
    %c0_i32_1 = arith.constant 0 : i32
    return %c0_i32, %c0_i32_0 : i32, i32
  }
  func.func @transform_5(%arg0: i32) -> (i32, i32) {
    %c0_i32 = arith.constant 0 : i32
    %c0_i32_0 = arith.constant 0 : i32
    %c0_i32_1 = arith.constant 0 : i32
    return %c0_i32, %c0_i32_0 : i32, i32
  }
  func.func @transform_6(%arg0: i32) -> (i32, i32) {
    %c0_i32 = arith.constant 0 : i32
    %c0_i32_0 = arith.constant 0 : i32
    %c0_i32_1 = arith.constant 0 : i32
    return %c0_i32, %c0_i32_0 : i32, i32
  }
  func.func @transform_7(%arg0: i32) -> (i32, i32) {
    %c0_i32 = arith.constant 0 : i32
    %c0_i32_0 = arith.constant 0 : i32
    return %arg0, %c0_i32 : i32, i32
  }
}

</mosaic_0001>

<bundles_post_ra>
// kernel: net_forward.3
= control target key start
LH: loop header
LB: loop body
LE: loop exit
PB: predicated region body
PF: predicated region fallthrough
CT: control target
= control target key end

     0   :  { %s1554_s12 = smov 0   ;;  %s1556_s13 = smov 0   ;;  %s1825_s0 = inlined_call_operand.vmem [shape: bf16[2,4,544,32], index: 0, kind: input, shape index: {}]   ;;  %s1826_s1 = inlined_call_operand.vmem [shape: bf16[32,128], index: 1, kind: input, shape index: {}]   ;;  %s1827_s2 = inlined_call_operand.vmem [shape: f32[1,128], index: 2, kind: input, shape index: {}]   ;;  %s1828_s3 = inlined_call_operand.vmem [shape: bf16[2,544,128], index: 3, kind: output, shape index: {}]  }
   0x1   :  { %s1558_s14 = smov 0   ;;  %s1560_s15 = smov 0  }
   0x2   :  { %s1562_s16 = smov 0  }
   0x3 LB: > { %s22_s17 = sadd.s32 1, %s1524_s14  ;;  %s25_s18 = sadd.s32 1, %s1528_s15  ;;  %s1532_s16 = sphi %s1562_s16, %s13_s16   ;;  %s1528_s15 = sphi %s1560_s15, %s1832_s15   ;;  %s1524_s14 = sphi %s1558_s14, %s1831_s14   ;;  %s1520_s13 = sphi %s1556_s13, %s1830_s13   ;;  %s1516_s12 = sphi %s1554_s12, %s1829_s12  }
   0x4   : > { %p23_p0 = scmp.ge.s32.totalorder %s22_s17, 4  ;;  %p1146_p1 = scmp.ge.s32.totalorder %s1532_s16, 1 }
   0x5   : > { %p157_p2 = scmp.lt.s32.totalorder %s1532_s16, 9 }
   0x6   : > { %s1834_s17 = smov (%p23_p0, %s22_s17), 0  ;;  %s1836_s18 = smov (!%p23_p0, %s25_s18), %s1528_s15 }
   0x7   : > { %p158_p3 = pnand %p1146_p1, %p157_p2  ;;  %p27_p4 = scmp.ge.s32.totalorder %s1836_s18, 2 }
   0x8   : > { %v1458_v0 = vld [vmem:[%s1826_s1] sm:$0xff] (!%p158_p3)   ;;  %p189_p5 = scmp.lt.s32.totalorder (!%p158_p3), %s1520_s13, 1  ;;  %v1459_v1 = vld [vmem:[%s1826_s1 + $0x8] sm:$0xff] (!%p158_p3)   ;;  %p191_p6 = scmp.lt.s32.totalorder (!%p158_p3), %s1516_s12, 3  ;;  %vm463_vm0 = vcmask (!%p158_p3), 261120  }
   0x9   : > { %s1838_s18 = smov (%p27_p4, %s1836_s18), 0  ;;  %161 = sbr.rel (%p158_p3) target bundleno = 316 (0x13c), region = 32 }
   0xa   : > { %1339 = vmatprep.subr.bf16.mxu0 (!%p158_p3), %v1458_v0  ;;  %1411 = vmatprep.subr.bf16.mxu1 (!%p158_p3), %v1458_v0  ;;  %s198_s4 = smul.u32 (!%p158_p3), 17, %s1516_s12 }
   0xb   : > { %1340 = vmatpush3.bf16.msra.mxu0 (!%p158_p3), %v1458_v0  ;;  %1413 = vmatpush3.bf16.msra.mxu1 (!%p158_p3), %v1458_v0 }
   0xc   : > { %1341 = vmatprep.subr.bf16.mxu0 (!%p158_p3), %v1459_v1  ;;  %1412 = vmatprep.subr.bf16.mxu1 (!%p158_p3), %v1459_v1  ;;  %p201_p7 = scmp.lt.s32.totalorder (!%p158_p3), %s198_s4, 67 }
   0xf   : > { %1342 = vmatpush3.bf16.msra.mxu0 (!%p158_p3), %v1459_v1  ;;  %1414 = vmatpush3.bf16.msra.mxu1 (!%p158_p3), %v1459_v1 }
  0x10   : > { %s1840_s13 = smov (!%p189_p5, %s1520_s13), 1  ;;  %s1842_s4 = smov (!%p201_p7, %s198_s4), 67 }
  0x11   : > { %s192_s23 = scalar_select %p191_p6, %s1516_s12, 3 }
  0x12   : > { %s1416_s24 = smul.u32 272, %s1840_s13 }
  0x13   : > { %s1415_s25 = smul.u32 68, %s192_s23 }
  0x14   : > { %s1417_s5 = smul.u32 68, %s1840_s13 }
  0x15   : > { %s195_s26 = sadd.s32 %s1416_s24, %s1415_s25 }
  0x16   : > { %s1147_s27 = sshll.u32 %s195_s26, 2  ;;  %s204_s8 = sadd.s32 %s1417_s5, %s1842_s4 }
  0x17   : > { %s1600_s30 = scalar_lea.vmem %s1825_s0, %s1147_s27  ;;  %s1148_s9 = sshll.u32 %s204_s8, 2 }
  0x18   : > { %v1460_v2 = vld [vmem:[%s1600_s30] sm:$0xff]   ;;  %v1461_v3 = vld [vmem:[%s1600_s30 + $0x90] sm:$0xff]   ;;  %v1462_v4 = vld [vmem:[%s1600_s30 + $0x8] sm:$0xff]   ;;  %s1760_s12 = scalar_lea.vmem %s1828_s3, %s1148_s9 }
  0x19   : > { %1343 = vmatprep.mubr.msk.bf16.mxu0 %vm463_vm0, %v1460_v2  ;;  %1379 = vmatprep.mubr.msk.bf16.mxu1 %vm463_vm0, %v1461_v3  ;;  %v1463_v5 = vld [vmem:[%s1600_s30 + $0x98] sm:$0xff]   ;;  %v1464_v6 = vld [vmem:[%s1600_s30 + $0x10] sm:$0xff]   ;;  %v1465_v7 = vld [vmem:[%s1600_s30 + $0xa0] sm:$0xff]  }
  0x1a   : > { %1344 = vmatmul.mubr.msk.bf16.vlgmr.msra.gmra.mrb[0].mxu0 %vm463_vm0, %v1462_v4  ;;  %1380 = vmatmul.mubr.msk.bf16.vlgmr.msra.gmra.mrb[0].mxu1 %vm463_vm0, %v1463_v5  ;;  %v1466_v8 = vld [vmem:[%s1600_s30 + $0x18] sm:$0xff]   ;;  %v1467_v9 = vld [vmem:[%s1600_s30 + $0xa8] sm:$0xff]   ;;  %v1468_v10 = vld [vmem:[%s1600_s30 + $0x20] sm:$0xff]  }
  0x1b   : > { %1347 = vmatprep.mubr.msk.bf16.mxu0 %vm463_vm0, %v1464_v6  ;;  %1383 = vmatprep.mubr.msk.bf16.mxu1 %vm463_vm0, %v1465_v7  ;;  %v1469_v11 = vld [vmem:[%s1600_s30 + $0xb0] sm:$0xff]   ;;  %v1470_v12 = vld [vmem:[%s1600_s30 + $0x28] sm:$0xff]   ;;  %v1471_v13 = vld [vmem:[%s1600_s30 + $0xb8] sm:$0xff]  }
  0x1c   : > { %v1472_v14 = vld [vmem:[%s1600_s30 + $0x30] sm:$0xff]   ;;  %v1473_v15 = vld [vmem:[%s1600_s30 + $0xc0] sm:$0xff]   ;;  %v1474_v16 = vld [vmem:[%s1600_s30 + $0x38] sm:$0xff]  }
  0x1d   : > { %v1475_v17 = vld [vmem:[%s1600_s30 + $0xc8] sm:$0xff]   ;;  %v1476_v18 = vld [vmem:[%s1600_s30 + $0x40] sm:$0xff]   ;;  %v1477_v19 = vld [vmem:[%s1600_s30 + $0xd0] sm:$0xff]  }
  0x1e   : > { %v1478_v20 = vld [vmem:[%s1600_s30 + $0x48] sm:$0xff]   ;;  %v1479_v21 = vld [vmem:[%s1600_s30 + $0xd8] sm:$0xff]   ;;  %v1480_v22 = vld [vmem:[%s1600_s30 + $0x50] sm:$0xff]  }
  0x1f   : > { %v1481_v23 = vld [vmem:[%s1600_s30 + $0xe0] sm:$0xff]   ;;  %v1482_v24 = vld [vmem:[%s1600_s30 + $0x58] sm:$0xff]   ;;  %v1483_v25 = vld [vmem:[%s1600_s30 + $0xe8] sm:$0xff]  }
  0x20   : > { %v1484_v26 = vld [vmem:[%s1600_s30 + $0x60] sm:$0xff]   ;;  %v1485_v27 = vld [vmem:[%s1600_s30 + $0xf0] sm:$0xff]   ;;  %v1486_v28 = vld [vmem:[%s1600_s30 + $0x68] sm:$0xff]  }
  0x21   : > { %v1487_v29 = vld [vmem:[%s1600_s30 + $0xf8] sm:$0xff]   ;;  %v1488_v30 = vld [vmem:[%s1600_s30 + $0x70] sm:$0xff]   ;;  %v1489_v31 = vld [vmem:[%s1600_s30 + $0x100] sm:$0xff]  }
  0x22   : > { %1348 = vmatmul.mubr.msk.bf16.gmra.mrb[4].mxu0 %vm463_vm0, %v1466_v8  ;;  %1384 = vmatmul.mubr.msk.bf16.gmra.mrb[4].mxu1 %vm463_vm0, %v1467_v9  ;;  %v1490_v32 = vld [vmem:[%s1600_s30 + $0x78] sm:$0xff]   ;;  %v1491_v33 = vld [vmem:[%s1600_s30 + $0x108] sm:$0xff]   ;;  %v1492_v34 = vld [vmem:[%s1600_s30 + $0x80] sm:$0xff]  }
  0x23   : > { %1351 = vmatprep.mubr.msk.bf16.mxu0 %vm463_vm0, %v1468_v10  ;;  %1387 = vmatprep.mubr.msk.bf16.mxu1 %vm463_vm0, %v1469_v11  ;;  %v1493_v35 = vld [vmem:[%s1600_s30 + $0x88] sm:$0xff]  }
  0x2a   : > { %1352 = vmatmul.mubr.msk.bf16.gmra.mrb[8].mxu0 %vm463_vm0, %v1470_v12  ;;  %1388 = vmatmul.mubr.msk.bf16.gmra.mrb[8].mxu1 %vm463_vm0, %v1471_v13 }
  0x2b   : > { %1355 = vmatprep.mubr.msk.bf16.mxu0 %vm463_vm0, %v1472_v14  ;;  %1391 = vmatprep.mubr.msk.bf16.mxu1 %vm463_vm0, %v1473_v15 }
  0x32   : > { %1356 = vmatmul.mubr.msk.bf16.gmra.mrb[12].mxu0 %vm463_vm0, %v1474_v16  ;;  %1392 = vmatmul.mubr.msk.bf16.gmra.mrb[12].mxu1 %vm463_vm0, %v1475_v17 }
  0x33   : > { %1359 = vmatprep.mubr.msk.bf16.mxu0 %vm463_vm0, %v1476_v18  ;;  %1395 = vmatprep.mubr.msk.bf16.mxu1 %vm463_vm0, %v1477_v19 }
  0x3a   : > { %1360 = vmatmul.mubr.msk.bf16.gmra.mrb[16].mxu0 %vm463_vm0, %v1478_v20  ;;  %1396 = vmatmul.mubr.msk.bf16.gmra.mrb[16].mxu1 %vm463_vm0, %v1479_v21  ;;  %v1744_v20 = vld [vmem:[%s1827_s2] ss:$0 sm:$0xff] }
  0x3b   : > { %1363 = vmatprep.mubr.msk.bf16.mxu0 %vm463_vm0, %v1480_v22  ;;  %1399 = vmatprep.mubr.msk.bf16.mxu1 %vm463_vm0, %v1481_v23 }
  0x42   : > { %1364 = vmatmul.mubr.msk.bf16.gmra.mrb[20].mxu0 %vm463_vm0, %v1482_v24  ;;  %1400 = vmatmul.mubr.msk.bf16.gmra.mrb[20].mxu1 %vm463_vm0, %v1483_v25 }
  0x43   : > { %1367 = vmatprep.mubr.msk.bf16.mxu0 %vm463_vm0, %v1484_v26  ;;  %1403 = vmatprep.mubr.msk.bf16.mxu1 %vm463_vm0, %v1485_v27 }
  0x4a   : > { %1368 = vmatmul.mubr.msk.bf16.gmra.mrb[24].mxu0 %vm463_vm0, %v1486_v28  ;;  %1404 = vmatmul.mubr.msk.bf16.gmra.mrb[24].mxu1 %vm463_vm0, %v1487_v29 }
  0x4b   : > { %1371 = vmatprep.mubr.msk.bf16.mxu0 %vm463_vm0, %v1488_v30  ;;  %1407 = vmatprep.mubr.msk.bf16.mxu1 %vm463_vm0, %v1489_v31 }
  0x52   : > { %1372 = vmatmul.mubr.msk.bf16.gmra.mrb[28].mxu0 %vm463_vm0, %v1490_v32  ;;  %1408 = vmatmul.mubr.msk.bf16.gmra.mrb[28].mxu1 %vm463_vm0, %v1491_v33 }
  0x53   : > { %1375 = vmatprep.mubr.msk.bf16.mxu0 %vm463_vm0, %v1492_v34 }
  0x5a   : > { %1376 = vmatmul.mubr.msk.bf16.gmra.mrb[32].mxu0 %vm463_vm0, %v1493_v35 }
  0xed   : > { %v1345_v36 = vpop.f32.mrb[0].mxu0  ;;  %v1672_v38 = vpop.f32.mrb[0].mxu1 }
  0xee   : > { %v1670_v37 = vpop.f32.mrb[1].mxu0  ;;  %v744_v40 = vpop.f32.mrb[1].mxu1 }
  0xef   : > { %v1674_v39 = vpop.f32.mrb[2].mxu0  ;;  %v1678_v42 = vpop.f32.mrb[2].mxu1 }
  0xf0   : > { %v1676_v41 = vpop.f32.mrb[3].mxu0  ;;  %v747_v43 = vpop.f32.mrb[3].mxu1 }
  0xf5   : > { %v1680_v44 = vpop.f32.mrb[4].mxu0  ;;  %v1684_v46 = vpop.f32.mrb[4].mxu1 }
  0xf6   : > { %v1682_v45 = vpop.f32.mrb[5].mxu0  ;;  %v1688_v48 = vpop.f32.mrb[5].mxu1 }
  0xf7   : > { %v1686_v47 = vpop.f32.mrb[6].mxu0  ;;  %v1690_v50 = vpop.f32.mrb[6].mxu1 }
  0xf8   : > { %v619_v49 = vpop.f32.mrb[7].mxu0  ;;  %v1692_v51 = vpop.f32.mrb[7].mxu1 }
  0xfd   : > { %v1694_v52 = vpop.f32.mrb[8].mxu0  ;;  %v1698_v54 = vpop.f32.mrb[8].mxu1 }
  0xfe   : > { %v1696_v53 = vpop.f32.mrb[9].mxu0  ;;  %v1702_v56 = vpop.f32.mrb[9].mxu1 }
  0xff   : > { %v1700_v55 = vpop.f32.mrb[10].mxu0  ;;  %v1706_v58 = vpop.f32.mrb[10].mxu1 }
 0x100   : > { %v1704_v57 = vpop.f32.mrb[11].mxu0  ;;  %v1708_v59 = vpop.f32.mrb[11].mxu1 }
 0x105   : > { %v1710_v60 = vpop.f32.mrb[12].mxu0  ;;  %v1714_v62 = vpop.f32.mrb[12].mxu1 }
 0x106   : > { %v1712_v61 = vpop.f32.mrb[13].mxu0  ;;  %v1718_v0 = vpop.f32.mrb[13].mxu1 }
 0x107   : > { %v1716_v63 = vpop.f32.mrb[14].mxu0  ;;  %v1722_v2 = vpop.f32.mrb[14].mxu1 }
 0x108   : > { %v1720_v1 = vpop.f32.mrb[15].mxu0  ;;  %v1724_v3 = vpop.f32.mrb[15].mxu1 }
 0x10d   : > { %v1727_v4 = vpop.f32.mrb[16].mxu0  ;;  %v1397_v6 = vpop.f32.mrb[16].mxu1 }
 0x10e   : > { %v872_v5 = vmax.f32 %v1676_v41, %v1727_v4  ;;  %v1731_v7 = vpop.f32.mrb[17].mxu0  ;;  %v891_v8 = vmax.f32 %v747_v43, %v1397_v6  ;;  %v1733_v9 = vpop.f32.mrb[17].mxu1 }
 0x10f   : > { %v1362_v10 = vpop.f32.mrb[18].mxu0  ;;  %v1398_v12 = vpop.f32.mrb[18].mxu1 }
 0x110   : > { %v873_v11 = vmax.f32 %v1345_v36, %v1362_v10  ;;  %v1735_v13 = vpop.f32.mrb[19].mxu0  ;;  %v892_v14 = vmax.f32 %v1672_v38, %v1398_v12  ;;  %v811_v16 = vpop.f32.mrb[19].mxu1 }
 0x111   : > { %v871_v15 = vmax.f32 %v1670_v37, %v1735_v13  ;;  %v890_v17 = vmax.f32 %v744_v40, %v811_v16 }
 0x113   : > { %v907_v18 = vmax.f32 %v873_v11, %v890_v17 }
 0x115   : > { %v1365_v19 = vpop.f32.mrb[20].mxu0  ;;  %v1401_v22 = vpop.f32.mrb[20].mxu1  ;;  %v931_v32 = vadd.f32 %v1744_v20, %v907_v18 }
 0x116   : > { %v876_v21 = vmax.f32 %v619_v49, %v1365_v19  ;;  %v680_v23 = vpop.f32.mrb[21].mxu0  ;;  %v895_v24 = vmax.f32 %v1692_v51, %v1401_v22  ;;  %v824_v26 = vpop.f32.mrb[21].mxu1 }
 0x117   : > { %v874_v25 = vmax.f32 %v1674_v39, %v680_v23  ;;  %v1366_v27 = vpop.f32.mrb[22].mxu0  ;;  %v893_v28 = vmax.f32 %v1678_v42, %v824_v26  ;;  %v1402_v30 = vpop.f32.mrb[22].mxu1  ;;  %v948_v49 = vmax.f32 %v931_v32, 0.0 }
 0x118   : > { %v877_v29 = vmax.f32 %v1680_v44, %v1366_v27  ;;  %v683_v31 = vpop.f32.mrb[23].mxu0  ;;  %v896_v34 = vmax.f32 %v1684_v46, %v1402_v30  ;;  %v827_v36 = vpop.f32.mrb[23].mxu1 }
 0x119   : > { %v908_v33 = vmax.f32 %v874_v25, %v891_v8  ;;  %v875_v35 = vmax.f32 %v1682_v45, %v683_v31  ;;  %v910_v38 = vmax.f32 %v876_v21, %v893_v28  ;;  %v894_v39 = vmax.f32 %v1688_v48, %v827_v36 }
 0x11b   : > { %v932_v40 = vadd.f32 %v1744_v20, %v908_v33  ;;  %v909_v43 = vmax.f32 %v875_v35, %v892_v14  ;;  %v934_v42 = vadd.f32 %v1744_v20, %v910_v38  ;;  %v911_v44 = vmax.f32 %v877_v29, %v894_v39 }
 0x11d   : > { %v949_v51 = vmax.f32 %v932_v40, 0.0  ;;  %v933_v6 = vadd.f32 %v1744_v20, %v909_v43  ;;  %v1369_v8 = vpop.f32.mrb[24].mxu0  ;;  %v951_v45 = vmax.f32 %v934_v42, 0.0  ;;  %v1405_v48 = vpop.f32.mrb[24].mxu1  ;;  %v935_v19 = vadd.f32 %v1744_v20, %v911_v44 }
 0x11e   : > { %v880_v46 = vmax.f32 %v1704_v57, %v1369_v8  ;;  %v696_v10 = vpop.f32.mrb[25].mxu0  ;;  %v899_v14 = vmax.f32 %v1708_v59, %v1405_v48  ;;  %v840_v17 = vpop.f32.mrb[25].mxu1 }
 0x11f   : > { %v1264_v11 = vpack.c.bf16 %v949_v51, %v948_v49  ;;  %v950_v12 = vmax.f32 %v933_v6, 0.0  ;;  %v878_v16 = vmax.f32 %v1686_v47, %v696_v10  ;;  %v1370_v18 = vpop.f32.mrb[26].mxu0  ;;  %v897_v21 = vmax.f32 %v1690_v50, %v840_v17  ;;  %v1406_v23 = vpop.f32.mrb[26].mxu1 }
 0x120   : > { %v881_v22 = vmax.f32 %v1694_v52, %v1370_v18  ;;  %v699_v25 = vpop.f32.mrb[27].mxu0  ;;  %v900_v27 = vmax.f32 %v1698_v54, %v1406_v23  ;;  %v843_v28 = vpop.f32.mrb[27].mxu1  ;;  %v952_v32 = vmax.f32 %v935_v19, 0.0 }
 0x121   : > { %1296 = vst [vmem:[%s1760_s12 + $0x8] sm:$0xff] %v1264_v11   ;;  %v1269_v57 = vpack.c.bf16 %v951_v45, %v950_v12  ;;  %v912_v26 = vmax.f32 %v878_v16, %v895_v24  ;;  %v879_v59 = vmax.f32 %v1696_v53, %v699_v25  ;;  %v914_v47 = vmax.f32 %v880_v46, %v897_v21 }
 0x122   : > { %v898_v29 = vmax.f32 %v1702_v56, %v843_v28 }
 0x123   : > { %1297 = vst [vmem:[%s1760_s12 + $0x10] sm:$0xff] %v1269_v57   ;;  %v936_v30 = vadd.f32 %v1744_v20, %v912_v26  ;;  %v913_v31 = vmax.f32 %v879_v59, %v896_v34  ;;  %v938_v50 = vadd.f32 %v1744_v20, %v914_v47 }
 0x124   : > { %v915_v52 = vmax.f32 %v881_v22, %v898_v29 }
 0x125   : > { %v953_v33 = vmax.f32 %v936_v30, 0.0  ;;  %v937_v35 = vadd.f32 %v1744_v20, %v913_v31  ;;  %v1373_v24 = vpop.f32.mrb[28].mxu0  ;;  %v955_v54 = vmax.f32 %v938_v50, 0.0  ;;  %v1409_v36 = vpop.f32.mrb[28].mxu1 }
 0x126   : > { %v884_v53 = vmax.f32 %v1720_v1, %v1373_v24  ;;  %v712_v38 = vpop.f32.mrb[29].mxu0  ;;  %v903_v40 = vmax.f32 %v1724_v3, %v1409_v36  ;;  %v856_v43 = vpop.f32.mrb[29].mxu1  ;;  %v939_v44 = vadd.f32 %v1744_v20, %v915_v52 }
 0x127   : > { %v1274_v39 = vpack.c.bf16 %v953_v33, %v952_v32  ;;  %v954_v56 = vmax.f32 %v937_v35, 0.0  ;;  %v882_v34 = vmax.f32 %v1700_v55, %v712_v38  ;;  %v1374_v42 = vpop.f32.mrb[30].mxu0  ;;  %v901_v49 = vmax.f32 %v1706_v58, %v856_v43  ;;  %v1410_v6 = vpop.f32.mrb[30].mxu1 }
 0x128   : > { %v885_v51 = vmax.f32 %v1710_v60, %v1374_v42  ;;  %v715_v8 = vpop.f32.mrb[31].mxu0  ;;  %v904_v46 = vmax.f32 %v1714_v62, %v1410_v6  ;;  %v859_v48 = vpop.f32.mrb[31].mxu1  ;;  %v956_v16 = vmax.f32 %v939_v44, 0.0 }
 0x129   : > { %1298 = vst [vmem:[%s1760_s12 + $0x18] sm:$0xff] %v1274_v39   ;;  %v1279_v1 = vpack.c.bf16 %v955_v54, %v954_v56  ;;  %v916_v45 = vmax.f32 %v882_v34, %v899_v14  ;;  %v883_v3 = vmax.f32 %v1712_v61, %v715_v8  ;;  %v918_v55 = vmax.f32 %v884_v53, %v901_v49 }
 0x12a   : > { %v902_v10 = vmax.f32 %v1718_v0, %v859_v48 }
 0x12b   : > { %1299 = vst [vmem:[%s1760_s12 + $0x20] sm:$0xff] %v1279_v1   ;;  %v940_v11 = vadd.f32 %v1744_v20, %v916_v45  ;;  %v917_v12 = vmax.f32 %v883_v3, %v900_v27  ;;  %v942_v58 = vadd.f32 %v1744_v20, %v918_v55 }
 0x12c   : > { %v919_v60 = vmax.f32 %v885_v51, %v902_v10 }
 0x12d   : > { %v957_v17 = vmax.f32 %v940_v11, 0.0  ;;  %v941_v14 = vadd.f32 %v1744_v20, %v917_v12  ;;  %v1377_v18 = vpop.f32.mrb[32].mxu0  ;;  %v959_v21 = vmax.f32 %v942_v58, 0.0 }
 0x12e   : > { %v888_v62 = vmax.f32 %v1377_v18, %v1722_v2  ;;  %v728_v61 = vpop.f32.mrb[33].mxu0  ;;  %v943_v59 = vadd.f32 %v1744_v20, %v919_v60 }
 0x12f   : > { %v1284_v19 = vpack.c.bf16 %v957_v17, %v956_v16  ;;  %v958_v0 = vmax.f32 %v941_v14, 0.0  ;;  %v886_v22 = vmax.f32 %v1716_v63, %v728_v61  ;;  %v1378_v23 = vpop.f32.mrb[34].mxu0 }
 0x130   : > { %v905_v25 = vmax.f32 %v871_v15, %v888_v62  ;;  %v889_v57 = vmax.f32 %v1378_v23, %v1733_v9  ;;  %v731_v26 = vpop.f32.mrb[35].mxu0  ;;  %v960_v15 = vmax.f32 %v943_v59, 0.0 }
 0x131   : > { %1300 = vst [vmem:[%s1760_s12 + $0x28] sm:$0xff] %v1284_v19   ;;  %v1289_v27 = vpack.c.bf16 %v959_v21, %v958_v0  ;;  %v920_v2 = vmax.f32 %v886_v22, %v903_v40  ;;  %v887_v28 = vmax.f32 %v1731_v7, %v731_v26 }
 0x132   : > { %v929_v47 = vadd.f32 %v1744_v20, %v905_v25  ;;  %v906_v63 = vmax.f32 %v872_v5, %v889_v57 }
 0x133   : > { %1301 = vst [vmem:[%s1760_s12 + $0x30] sm:$0xff] %v1289_v27   ;;  %v944_v37 = vadd.f32 %v1744_v20, %v920_v2  ;;  %v921_v9 = vmax.f32 %v887_v28, %v904_v46 }
 0x134   : > { %v930_v13 = vadd.f32 %v1744_v20, %v906_v63  ;;  %v946_v31 = vmax.f32 %v929_v47, 0.0 }
 0x135   : > { %v961_v29 = vmax.f32 %v944_v37, 0.0  ;;  %v945_v30 = vadd.f32 %v1744_v20, %v921_v9 }
 0x136   : > { %v947_v7 = vmax.f32 %v930_v13, 0.0 }
 0x137   : > { %v1294_v50 = vpack.c.bf16 %v961_v29, %v960_v15  ;;  %v962_v52 = vmax.f32 %v945_v30, 0.0 }
 0x138   : > { %v1259_v32 = vpack.c.bf16 %v947_v7, %v946_v31 }
 0x139   : > { %1302 = vst [vmem:[%s1760_s12 + $0x38] sm:$0xff] %v1294_v50   ;;  %v1255_v41 = vpack.c.bf16 %v962_v52, %v962_v52 }
 0x13a   : > { %1260 = vst [vmem:[%s1760_s12] sm:$0xff] %v1259_v32  }
 0x13b   : > { %1048 = vst [vmem:[%s1760_s12 + $0x40] sm:$0xf] %v1255_v41 }
 0x13c PF: > { %s13_s16 = sadd.s32 1, %s1532_s16   ;;  %s1829_s12 = smov %s1524_s14 }
 0x13d   : > { %p10_p8 = scmp.ge.s32.totalorder %s13_s16, 10   ;;  %s1830_s13 = smov %s1528_s15 }
 0x13e   : > { %s1831_s14 = smov %s1834_s17  ;;  %s1832_s15 = smov %s1838_s18 }
 0x13f   :  { %12 = sbr.rel (!%p10_p8) target bundleno = 3 (0x3), region = 62 }

// kernel: net_forward.4
= control target key start
LH: loop header
LB: loop body
LE: loop exit
PB: predicated region body
PF: predicated region fallthrough
CT: control target
= control target key end

     0   :  { %s3531_s12 = smov 0   ;;  %s3533_s13 = smov 0   ;;  %s4389_s0 = inlined_call_operand.vmem [shape: bf16[2,1,352,800], index: 0, kind: input, shape index: {}]   ;;  %s4390_s1 = inlined_call_operand.vmem [shape: bf16[800,128], index: 1, kind: input, shape index: {}]   ;;  %s4391_s2 = inlined_call_operand.vmem [shape: f32[1,128], index: 2, kind: input, shape index: {}]   ;;  %s4392_s3 = inlined_call_operand.vmem [shape: bf16[2,88,128], index: 3, kind: output, shape index: {}]  }
   0x1   :  { %s3535_s14 = smov 0  }
   0x2 LB: > { %s25_s15 = sadd.s32 1, %s3504_s13  ;;  %p2670_p0 = scmp.ge.s32.totalorder %s3508_s14, 1  ;;  %s3508_s14 = sphi %s3535_s14, %s13_s14   ;;  %s3504_s13 = sphi %s3533_s13, %s4402_s13   ;;  %s3500_s12 = sphi %s3531_s12, %s4401_s12  }
   0x3   : > { %p27_p1 = scmp.ge.s32.totalorder %s25_s15, 2  ;;  %p157_p2 = scmp.lt.s32.totalorder %s3508_s14, 3 }
   0x5   : > { %s4404_s15 = smov (%p27_p1, %s25_s15), 0  ;;  %p158_p3 = pnand %p2670_p0, %p157_p2 }
   0x6   : > { %v3216_v0 = vld [vmem:[%s4390_s1] sm:$0xff] (!%p158_p3)   ;;  %v3510_v1 = vmov (!%p158_p3), 0   ;;  %v3218_v3 = vld [vmem:[%s4390_s1 + $0x8] sm:$0xff] (!%p158_p3)   ;;  %v3220_v5 = vld [vmem:[%s4390_s1 + $0x10] sm:$0xff] (!%p158_p3)   ;;  %p189_p4 = scmp.lt.s32.totalorder (!%p158_p3), %s3500_s12, 1  ;;  %vm1555_vm0 = vcmask (!%p158_p3), 261120  }
   0x7   : > { %161 = sbr.rel (%p158_p3) target bundleno = 605 (0x25d), region = 32  ;;  %1622 = vmatprep.subr.bf16.mxu1 (!%p158_p3), %v3510_v1  ;;  %1831 = vmatprep.subr.bf16.mxu0 (!%p158_p3), %v3510_v1  ;;  %v3559_v2 = vld [vmem:[%s4390_s1 + $0x80] sm:$0xff] (!%p158_p3)   ;;  %v3569_v4 = vld [vmem:[%s4390_s1 + $0x88] sm:$0xff] (!%p158_p3)   ;;  %v3580_v6 = vld [vmem:[%s4390_s1 + $0x90] sm:$0xff] (!%p158_p3)  }
   0x8   : > { %1623 = vmatpush1.bf16.msra.mxu1 (!%p158_p3), %v3216_v0  ;;  %1832 = vmatpush1.bf16.msra.mxu0 (!%p158_p3), %v3559_v2  ;;  %v3222_v7 = vld [vmem:[%s4390_s1 + $0x18] sm:$0xff] (!%p158_p3)   ;;  %v3224_v9 = vld [vmem:[%s4390_s1 + $0x20] sm:$0xff] (!%p158_p3)   ;;  %v3226_v11 = vld [vmem:[%s4390_s1 + $0x28] sm:$0xff] (!%p158_p3)  }
   0x9   : > { %1624 = vmatprep.subr.bf16.mxu1 (!%p158_p3), %v3510_v1  ;;  %1833 = vmatprep.subr.bf16.mxu0 (!%p158_p3), %v3510_v1  ;;  %v3591_v8 = vld [vmem:[%s4390_s1 + $0x98] sm:$0xff] (!%p158_p3)   ;;  %v3602_v10 = vld [vmem:[%s4390_s1 + $0xa0] sm:$0xff] (!%p158_p3)   ;;  %v3614_v12 = vld [vmem:[%s4390_s1 + $0xa8] sm:$0xff] (!%p158_p3)  }
   0xa   : > { %v3228_v13 = vld [vmem:[%s4390_s1 + $0x30] sm:$0xff] (!%p158_p3)   ;;  %v3230_v15 = vld [vmem:[%s4390_s1 + $0x38] sm:$0xff] (!%p158_p3)   ;;  %v3232_v17 = vld [vmem:[%s4390_s1 + $0x40] sm:$0xff] (!%p158_p3)  }
   0xb   : > { %v3628_v14 = vld [vmem:[%s4390_s1 + $0xb0] sm:$0xff] (!%p158_p3)   ;;  %v3640_v16 = vld [vmem:[%s4390_s1 + $0xb8] sm:$0xff] (!%p158_p3)   ;;  %v3656_v18 = vld [vmem:[%s4390_s1 + $0xc0] sm:$0xff] (!%p158_p3)  }
   0xc   : > { %1625 = vmatpush1.bf16.msra.mxu1 (!%p158_p3), %v3218_v3  ;;  %1834 = vmatpush1.bf16.msra.mxu0 (!%p158_p3), %v3569_v4  ;;  %v3234_v20 = vld [vmem:[%s4390_s1 + $0x48] sm:$0xff] (!%p158_p3)   ;;  %v3236_v23 = vld [vmem:[%s4390_s1 + $0x50] sm:$0xff] (!%p158_p3)   ;;  %v3238_v25 = vld [vmem:[%s4390_s1 + $0x58] sm:$0xff] (!%p158_p3)  }
   0xd   : > { %1626 = vmatprep.subr.bf16.mxu1 (!%p158_p3), %v3510_v1  ;;  %1835 = vmatprep.subr.bf16.mxu0 (!%p158_p3), %v3510_v1  ;;  %v3669_v22 = vld [vmem:[%s4390_s1 + $0xc8] sm:$0xff] (!%p158_p3)   ;;  %v3680_v24 = vld [vmem:[%s4390_s1 + $0xd0] sm:$0xff] (!%p158_p3)   ;;  %v3691_v26 = vld [vmem:[%s4390_s1 + $0xd8] sm:$0xff] (!%p158_p3)  }
   0xe   : > { %s4406_s12 = smov (!%p189_p4, %s3500_s12), 1  ;;  %v3240_v27 = vld [vmem:[%s4390_s1 + $0x60] sm:$0xff]   ;;  %v3242_v29 = vld [vmem:[%s4390_s1 + $0x68] sm:$0xff]   ;;  %v3244_v31 = vld [vmem:[%s4390_s1 + $0x70] sm:$0xff]  }
   0xf   : > { %s3189_s23 = smul.u32 1232, %s4406_s12  ;;  %v3702_v28 = vld [vmem:[%s4390_s1 + $0xe0] sm:$0xff]   ;;  %v3713_v30 = vld [vmem:[%s4390_s1 + $0xe8] sm:$0xff]   ;;  %v3724_v32 = vld [vmem:[%s4390_s1 + $0xf0] sm:$0xff]  }
  0x10   : > { %1627 = vmatpush1.bf16.msra.mxu1 %v3220_v5  ;;  %1836 = vmatpush1.bf16.msra.mxu0 %v3580_v6  ;;  %v3246_v33 = vld [vmem:[%s4390_s1 + $0x78] sm:$0xff]   ;;  %v3254_v38 = vld [vmem:[%s4390_s1 + $0x100] sm:$0xff]   ;;  %v3261_v40 = vld [vmem:[%s4390_s1 + $0x108] sm:$0xff]   ;;  %s3190_s5 = smul.u32 44, %s4406_s12 }
  0x11   : > { %1628 = vmatprep.subr.bf16.mxu1 %v3510_v1  ;;  %1837 = vmatprep.subr.bf16.mxu0 %v3510_v1  ;;  %s3649_s30 = scalar_lea.vmem %s4389_s0, %s3189_s23  ;;  %v3735_v34 = vld [vmem:[%s4390_s1 + $0xf8] sm:$0xff]   ;;  %v3268_v45 = vld [vmem:[%s4390_s1 + $0x110] sm:$0xff]   ;;  %v3282_v51 = vld [vmem:[%s4390_s1 + $0x120] sm:$0xff]  }
  0x12   : > { %v3250_v19 = vld [vmem:[%s3649_s30 + $0x4] ss:$28 sps:$4 sm:$0xff]   ;;  %v3253_v21 = vld [vmem:[%s3649_s30 + $0xc] ss:$28 sps:$4 sm:$0xff]   ;;  %v3255_v37 = vld [vmem:[%s3649_s30 + $0x3c] ss:$28 sps:$4 sm:$0xff]   ;;  %s4329_s7 = scalar_lea.vmem %s4392_s3, %s3190_s5 }
  0x13   : > { %1654 = vmatprep.mubr.bf16.mxu1 %v3250_v19  ;;  %1863 = vmatprep.mubr.bf16.mxu0 %v3253_v21  ;;  %v3248_v35 = vld [vmem:[%s3649_s30] ss:$28 sps:$4 sm:$0xff]   ;;  %v3251_v36 = vld [vmem:[%s3649_s30 + $0x8] ss:$28 sps:$4 sm:$0xff]   ;;  %v3259_v41 = vld [vmem:[%s3649_s30 + $0x38] ss:$28 sps:$4 sm:$0xff]  }
  0x14   : > { %1629 = vmatpush1.bf16.msra.mxu1 %v3222_v7  ;;  %1838 = vmatpush1.bf16.msra.mxu0 %v3591_v8  ;;  %v3257_v39 = vld [vmem:[%s3649_s30 + $0x44] ss:$28 sps:$4 sm:$0xff]   ;;  %v3262_v43 = vld [vmem:[%s3649_s30 + $0x74] ss:$28 sps:$4 sm:$0xff]   ;;  %v3264_v44 = vld [vmem:[%s3649_s30 + $0x7c] ss:$28 sps:$4 sm:$0xff]  }
  0x15   : > { %1630 = vmatprep.subr.bf16.mxu1 %v3510_v1  ;;  %1839 = vmatprep.subr.bf16.mxu0 %v3510_v1  ;;  %v3260_v42 = vld [vmem:[%s3649_s30 + $0x40] ss:$28 sps:$4 sm:$0xff]   ;;  %v3266_v47 = vld [vmem:[%s3649_s30 + $0x70] ss:$28 sps:$4 sm:$0xff]   ;;  %v3267_v48 = vld [vmem:[%s3649_s30 + $0x78] ss:$28 sps:$4 sm:$0xff]  }
  0x16   : > { %v3275_v46 = vld [vmem:[%s4390_s1 + $0x118] sm:$0xff]   ;;  %v3269_v49 = vld [vmem:[%s3649_s30 + $0xac] ss:$28 sps:$4 sm:$0xff]   ;;  %v3271_v50 = vld [vmem:[%s3649_s30 + $0xb4] ss:$28 sps:$4 sm:$0xff]  }
  0x17   : > { %v3289_v52 = vld [vmem:[%s4390_s1 + $0x128] sm:$0xff]   ;;  %v3276_v55 = vld [vmem:[%s3649_s30 + $0xe4] ss:$28 sps:$4 sm:$0xff]   ;;  %v3296_v57 = vld [vmem:[%s4390_s1 + $0x130] sm:$0xff]  }
  0x18   : > { %1631 = vmatpush1.bf16.msra.mxu1 %v3224_v9  ;;  %1840 = vmatpush1.bf16.msra.mxu0 %v3602_v10  ;;  %v3273_v53 = vld [vmem:[%s3649_s30 + $0xa8] ss:$28 sps:$4 sm:$0xff]   ;;  %v3274_v54 = vld [vmem:[%s3649_s30 + $0xb0] ss:$28 sps:$4 sm:$0xff]   ;;  %v3303_v58 = vld [vmem:[%s4390_s1 + $0x138] sm:$0xff]  }
  0x19   : > { %1632 = vmatprep.subr.bf16.mxu1 %v3510_v1  ;;  %1841 = vmatprep.subr.bf16.mxu0 %v3510_v1  ;;  %v3278_v56 = vld [vmem:[%s3649_s30 + $0xec] ss:$28 sps:$4 sm:$0xff]   ;;  %v3280_v59 = vld [vmem:[%s3649_s30 + $0xe0] ss:$28 sps:$4 sm:$0xff]   ;;  %v3295_v9 = vld [vmem:[%s3649_s30 + $0x158] ss:$28 sps:$4 sm:$0xff]  }
  0x1a   : > { %v3281_v60 = vld [vmem:[%s3649_s30 + $0xe8] ss:$28 sps:$4 sm:$0xff]   ;;  %v3283_v61 = vld [vmem:[%s3649_s30 + $0x11c] ss:$28 sps:$4 sm:$0xff]   ;;  %v3294_v7 = vld [vmem:[%s3649_s30 + $0x150] ss:$28 sps:$4 sm:$0xff]  }
  0x1b   : > { %v3285_v62 = vld [vmem:[%s3649_s30 + $0x124] ss:$28 sps:$4 sm:$0xff]   ;;  %v3317_v0 = vld [vmem:[%s4390_s1 + $0x148] sm:$0xff]   ;;  %v3292_v5 = vld [vmem:[%s3649_s30 + $0x15c] ss:$28 sps:$4 sm:$0xff]  }
  0x1c   : > { %1633 = vmatpush1.bf16.msra.mxu1 %v3226_v11  ;;  %1842 = vmatpush1.bf16.msra.mxu0 %v3614_v12  ;;  %v3310_v63 = vld [vmem:[%s4390_s1 + $0x140] sm:$0xff]   ;;  %v3299_v11 = vld [vmem:[%s3649_s30 + $0x194] ss:$28 sps:$4 sm:$0xff]   ;;  %v3365_v19 = vld [vmem:[%s4390_s1 + $0x178] sm:$0xff]  }
  0x1d   : > { %1634 = vmatprep.subr.bf16.mxu1 %v3510_v1  ;;  %1843 = vmatprep.subr.bf16.mxu0 %v3510_v1  ;;  %v3288_v3 = vld [vmem:[%s3649_s30 + $0x120] ss:$28 sps:$4 sm:$0xff]  }
  0x1e   : > { %v3867_v21 = vld [vmem:[%s4390_s1 + $0x180] sm:$0xff]  }
  0x20   : > { %1635 = vmatpush1.bf16.msra.mxu1 %v3228_v13  ;;  %1844 = vmatpush1.bf16.msra.mxu0 %v3628_v14  ;;  %v3301_v13 = vld [vmem:[%s3649_s30 + $0x188] ss:$28 sps:$4 sm:$0xff]  }
  0x21   : > { %1636 = vmatprep.subr.bf16.mxu1 %v3510_v1  ;;  %1845 = vmatprep.subr.bf16.mxu0 %v3510_v1 }
  0x24   : > { %1637 = vmatpush1.bf16.msra.mxu1 %v3230_v15  ;;  %1846 = vmatpush1.bf16.msra.mxu0 %v3640_v16  ;;  %v3302_v15 = vld [vmem:[%s3649_s30 + $0x190] ss:$28 sps:$4 sm:$0xff]  }
  0x25   : > { %1638 = vmatprep.subr.bf16.mxu1 %v3510_v1  ;;  %1847 = vmatprep.subr.bf16.mxu0 %v3510_v1 }
  0x28   : > { %1639 = vmatpush1.bf16.msra.mxu1 %v3232_v17  ;;  %1848 = vmatpush1.bf16.msra.mxu0 %v3656_v18  ;;  %v3306_v17 = vld [vmem:[%s3649_s30 + $0x1cc] ss:$28 sps:$4 sm:$0xff]  }
  0x29   : > { %1640 = vmatprep.subr.bf16.mxu1 %v3510_v1  ;;  %1849 = vmatprep.subr.bf16.mxu0 %v3510_v1 }
  0x2c   : > { %1641 = vmatpush1.bf16.msra.mxu1 %v3234_v20  ;;  %1850 = vmatpush1.bf16.msra.mxu0 %v3669_v22  ;;  %v3308_v20 = vld [vmem:[%s3649_s30 + $0x1c0] ss:$28 sps:$4 sm:$0xff]  }
  0x2d   : > { %1642 = vmatprep.subr.bf16.mxu1 %v3510_v1  ;;  %1851 = vmatprep.subr.bf16.mxu0 %v3510_v1 }
  0x30   : > { %1643 = vmatpush1.bf16.msra.mxu1 %v3236_v23  ;;  %1852 = vmatpush1.bf16.msra.mxu0 %v3680_v24  ;;  %v3311_v23 = vld [vmem:[%s3649_s30 + $0x1fc] ss:$28 sps:$4 sm:$0xff]  }
  0x31   : > { %1644 = vmatprep.subr.bf16.mxu1 %v3510_v1  ;;  %1853 = vmatprep.subr.bf16.mxu0 %v3510_v1 }
  0x34   : > { %1645 = vmatpush1.bf16.msra.mxu1 %v3238_v25  ;;  %1854 = vmatpush1.bf16.msra.mxu0 %v3691_v26  ;;  %v3315_v25 = vld [vmem:[%s3649_s30 + $0x1f8] ss:$28 sps:$4 sm:$0xff]  }
  0x35   : > { %1646 = vmatprep.subr.bf16.mxu1 %v3510_v1  ;;  %1855 = vmatprep.subr.bf16.mxu0 %v3510_v1 }
  0x38   : > { %1647 = vmatpush1.bf16.msra.mxu1 %v3240_v27  ;;  %1856 = vmatpush1.bf16.msra.mxu0 %v3702_v28  ;;  %v3318_v27 = vld [vmem:[%s3649_s30 + $0x234] ss:$28 sps:$4 sm:$0xff]  }
  0x39   : > { %1648 = vmatprep.subr.bf16.mxu1 %v3510_v1  ;;  %1857 = vmatprep.subr.bf16.mxu0 %v3510_v1 }
  0x3c   : > { %1649 = vmatpush1.bf16.msra.mxu1 %v3242_v29  ;;  %1858 = vmatpush1.bf16.msra.mxu0 %v3713_v30  ;;  %v3323_v29 = vld [vmem:[%s3649_s30 + $0x238] ss:$28 sps:$4 sm:$0xff]  }
  0x3d   : > { %1650 = vmatprep.subr.bf16.mxu1 %v3510_v1  ;;  %1859 = vmatprep.subr.bf16.mxu0 %v3510_v1 }
  0x40   : > { %1651 = vmatpush1.bf16.msra.mxu1 %v3244_v31  ;;  %1860 = vmatpush1.bf16.msra.mxu0 %v3724_v32  ;;  %v3327_v31 = vld [vmem:[%s3649_s30 + $0x274] ss:$28 sps:$4 sm:$0xff]  }
  0x41   : > { %1652 = vmatprep.subr.bf16.mxu1 %v3510_v1  ;;  %1861 = vmatprep.subr.bf16.mxu0 %v3510_v1 }
  0x44   : > { %1653 = vmatpush1.bf16.msra.mxu1 %v3246_v33  ;;  %1862 = vmatpush1.bf16.msra.mxu0 %v3735_v34  ;;  %v3330_v33 = vld [vmem:[%s3649_s30 + $0x270] ss:$28 sps:$4 sm:$0xff]  }
  0x45   : > { %3025 = vmatprep.subr.bf16.mxu1 %v3510_v1  ;;  %2040 = vmatprep.subr.bf16.mxu0 %v3510_v1 }
  0x47   : > { %1655 = vmatmul.mubr.bf16.vlgmr.msra.gmra.mrb[0].mxu1 %v3248_v35  ;;  %1864 = vmatmul.mubr.bf16.vlgmr.msra.gmra.mrb[0].mxu0 %v3251_v36  ;;  %v3333_v35 = vld [vmem:[%s3649_s30 + $0x2ac] ss:$28 sps:$4 sm:$0xff]   ;;  %v3336_v36 = vld [vmem:[%s3649_s30 + $0x2a0] ss:$28 sps:$4 sm:$0xff]  }
  0x48   : > { %1662 = vmatprep.mubr.bf16.mxu1 %v3255_v37  ;;  %2041 = vmatpush1.bf16.msra.mxu0 %v3254_v38  ;;  %v3337_v37 = vld [vmem:[%s3649_s30 + $0x2a8] ss:$28 sps:$4 sm:$0xff]   ;;  %v3338_v38 = vld [vmem:[%s3649_s30 + $0x2dc] ss:$28 sps:$4 sm:$0xff]  }
  0x49   : > { %1871 = vmatprep.mubr.bf16.mxu0 %v3257_v39  ;;  %2042 = vmatprep.subr.bf16.mxu0 %v3510_v1  ;;  %v3340_v39 = vld [vmem:[%s3649_s30 + $0x2e4] ss:$28 sps:$4 sm:$0xff]  }
  0x4a   : > { %3041 = vmatpush1.bf16.msra.mxu1 %v3559_v2  ;;  %v3287_v2 = vld [vmem:[%s3649_s30 + $0x118] ss:$28 sps:$4 sm:$0xff]  }
  0x4b   : > { %3026 = vmatprep.subr.bf16.mxu1 %v3510_v1 }
  0x4c   : > { %2043 = vmatpush1.bf16.msra.mxu0 %v3261_v40  ;;  %v3343_v40 = vld [vmem:[%s3649_s30 + $0x2d8] ss:$28 sps:$4 sm:$0xff]  }
  0x4d   : > { %2044 = vmatprep.subr.bf16.mxu0 %v3510_v1 }
  0x4e   : > { %3042 = vmatpush1.bf16.msra.mxu1 %v3569_v4  ;;  %v3290_v4 = vld [vmem:[%s3649_s30 + $0x154] ss:$28 sps:$4 sm:$0xff]  }
  0x4f   : > { %1663 = vmatmul.mubr.bf16.gmra.mrb[4].mxu1 %v3259_v41  ;;  %3027 = vmatprep.subr.bf16.mxu1 %v3510_v1  ;;  %v3344_v41 = vld [vmem:[%s3649_s30 + $0x2e0] ss:$28 sps:$4 sm:$0xff]  }
  0x50   : > { %1872 = vmatmul.mubr.bf16.gmra.mrb[4].mxu0 %v3260_v42  ;;  %1670 = vmatprep.mubr.bf16.mxu1 %v3262_v43  ;;  %v3345_v42 = vld [vmem:[%s3649_s30 + $0x314] ss:$28 sps:$4 sm:$0xff]   ;;  %v3347_v43 = vld [vmem:[%s3649_s30 + $0x31c] ss:$28 sps:$4 sm:$0xff]  }
  0x51   : > { %1879 = vmatprep.mubr.bf16.mxu0 %v3264_v44  ;;  %2045 = vmatpush1.bf16.msra.mxu0 %v3268_v45  ;;  %v3349_v44 = vld [vmem:[%s3649_s30 + $0x310] ss:$28 sps:$4 sm:$0xff]   ;;  %v3350_v45 = vld [vmem:[%s3649_s30 + $0x318] ss:$28 sps:$4 sm:$0xff]  }
  0x52   : > { %2046 = vmatprep.subr.bf16.mxu0 %v3510_v1  ;;  %3043 = vmatpush1.bf16.msra.mxu1 %v3580_v6  ;;  %v3324_v6 = vld [vmem:[%s4390_s1 + $0x150] sm:$0xff]  }
  0x53   : > { %3028 = vmatprep.subr.bf16.mxu1 %v3510_v1 }
  0x55   : > { %2047 = vmatpush1.bf16.msra.mxu0 %v3275_v46  ;;  %v3352_v46 = vld [vmem:[%s3649_s30 + $0x34c] ss:$28 sps:$4 sm:$0xff]  }
  0x56   : > { %2048 = vmatprep.subr.bf16.mxu0 %v3510_v1  ;;  %3044 = vmatpush1.bf16.msra.mxu1 %v3591_v8  ;;  %v3335_v8 = vld [vmem:[%s4390_s1 + $0x158] sm:$0xff]  }
  0x57   : > { %1671 = vmatmul.mubr.bf16.gmra.mrb[8].mxu1 %v3266_v47  ;;  %3029 = vmatprep.subr.bf16.mxu1 %v3510_v1  ;;  %v3354_v47 = vld [vmem:[%s3649_s30 + $0x354] ss:$28 sps:$4 sm:$0xff]  }
  0x58   : > { %1880 = vmatmul.mubr.bf16.gmra.mrb[8].mxu0 %v3267_v48  ;;  %1678 = vmatprep.mubr.bf16.mxu1 %v3269_v49  ;;  %v3356_v48 = vld [vmem:[%s3649_s30 + $0x348] ss:$28 sps:$4 sm:$0xff]   ;;  %v3357_v49 = vld [vmem:[%s3649_s30 + $0x350] ss:$28 sps:$4 sm:$0xff]  }
  0x59   : > { %1887 = vmatprep.mubr.bf16.mxu0 %v3271_v50  ;;  %2049 = vmatpush1.bf16.msra.mxu0 %v3282_v51  ;;  %v3359_v50 = vld [vmem:[%s3649_s30 + $0x384] ss:$28 sps:$4 sm:$0xff]   ;;  %v3361_v51 = vld [vmem:[%s3649_s30 + $0x38c] ss:$28 sps:$4 sm:$0xff]  }
  0x5a   : > { %2050 = vmatprep.subr.bf16.mxu0 %v3510_v1  ;;  %3045 = vmatpush1.bf16.msra.mxu1 %v3602_v10  ;;  %v3297_v10 = vld [vmem:[%s3649_s30 + $0x18c] ss:$28 sps:$4 sm:$0xff]  }
  0x5b   : > { %3030 = vmatprep.subr.bf16.mxu1 %v3510_v1 }
  0x5d   : > { %2051 = vmatpush1.bf16.msra.mxu0 %v3289_v52  ;;  %v3363_v52 = vld [vmem:[%s3649_s30 + $0x380] ss:$28 sps:$4 sm:$0xff]  }
  0x5e   : > { %2052 = vmatprep.subr.bf16.mxu0 %v3510_v1  ;;  %3046 = vmatpush1.bf16.msra.mxu1 %v3614_v12  ;;  %v3342_v12 = vld [vmem:[%s4390_s1 + $0x160] sm:$0xff]  }
  0x5f   : > { %1679 = vmatmul.mubr.bf16.gmra.mrb[12].mxu1 %v3273_v53  ;;  %3031 = vmatprep.subr.bf16.mxu1 %v3510_v1  ;;  %v3364_v53 = vld [vmem:[%s3649_s30 + $0x388] ss:$28 sps:$4 sm:$0xff]  }
  0x60   : > { %1888 = vmatmul.mubr.bf16.gmra.mrb[12].mxu0 %v3274_v54  ;;  %1686 = vmatprep.mubr.bf16.mxu1 %v3276_v55  ;;  %v3366_v54 = vld [vmem:[%s3649_s30 + $0x3bc] ss:$28 sps:$4 sm:$0xff]   ;;  %v3370_v55 = vld [vmem:[%s3649_s30 + $0x14] ss:$28 sps:$4 sm:$0xff]  }
  0x61   : > { %1895 = vmatprep.mubr.bf16.mxu0 %v3278_v56  ;;  %2053 = vmatpush1.bf16.msra.mxu0 %v3296_v57  ;;  %v3371_v56 = vld [vmem:[%s3649_s30 + $0x3b8] ss:$28 sps:$4 sm:$0xff]   ;;  %v3368_v57 = vld [vmem:[%s3649_s30 + $0x10] ss:$28 sps:$4 sm:$0xff]  }
  0x62   : > { %2054 = vmatprep.subr.bf16.mxu0 %v3510_v1  ;;  %3047 = vmatpush1.bf16.msra.mxu1 %v3628_v14  ;;  %v3351_v14 = vld [vmem:[%s4390_s1 + $0x168] sm:$0xff]  }
  0x63   : > { %3032 = vmatprep.subr.bf16.mxu1 %v3510_v1 }
  0x65   : > { %2055 = vmatpush1.bf16.msra.mxu0 %v3303_v58  ;;  %v3372_v58 = vld [vmem:[%s3649_s30 + $0x3f4] ss:$28 sps:$4 sm:$0xff]  }
  0x66   : > { %2056 = vmatprep.subr.bf16.mxu0 %v3510_v1  ;;  %3048 = vmatpush1.bf16.msra.mxu1 %v3640_v16  ;;  %v3304_v16 = vld [vmem:[%s3649_s30 + $0x1c4] ss:$28 sps:$4 sm:$0xff]  }
  0x67   : > { %1687 = vmatmul.mubr.bf16.gmra.mrb[16].mxu1 %v3280_v59  ;;  %3033 = vmatprep.subr.bf16.mxu1 %v3510_v1  ;;  %v3374_v59 = vld [vmem:[%s3649_s30 + $0x4c] ss:$28 sps:$4 sm:$0xff]  }
  0x68   : > { %1896 = vmatmul.mubr.bf16.gmra.mrb[16].mxu0 %v3281_v60  ;;  %1694 = vmatprep.mubr.bf16.mxu1 %v3283_v61  ;;  %v3376_v60 = vld [vmem:[%s3649_s30 + $0x3f0] ss:$28 sps:$4 sm:$0xff]   ;;  %v3377_v61 = vld [vmem:[%s3649_s30 + $0x48] ss:$28 sps:$4 sm:$0xff]  }
  0x69   : > { %1903 = vmatprep.mubr.bf16.mxu0 %v3285_v62  ;;  %2057 = vmatpush1.bf16.msra.mxu0 %v3310_v63  ;;  %v3378_v62 = vld [vmem:[%s3649_s30 + $0x42c] ss:$28 sps:$4 sm:$0xff]   ;;  %v3380_v63 = vld [vmem:[%s3649_s30 + $0x84] ss:$28 sps:$4 sm:$0xff]  }
  0x6a   : > { %2058 = vmatprep.subr.bf16.mxu0 %v3510_v1  ;;  %3049 = vmatpush1.bf16.msra.mxu1 %v3656_v18  ;;  %v3358_v18 = vld [vmem:[%s4390_s1 + $0x170] sm:$0xff]  }
  0x6b   : > { %3034 = vmatprep.subr.bf16.mxu1 %v3510_v1 }
  0x6d   : > { %2059 = vmatpush1.bf16.msra.mxu0 %v3317_v0  ;;  %v3382_v0 = vld [vmem:[%s3649_s30 + $0x428] ss:$28 sps:$4 sm:$0xff]  }
  0x6e   : > { %2060 = vmatprep.subr.bf16.mxu0 %v3510_v1  ;;  %3050 = vmatpush1.bf16.msra.mxu1 %v3669_v22  ;;  %v3309_v22 = vld [vmem:[%s3649_s30 + $0x1c8] ss:$28 sps:$4 sm:$0xff]  }
  0x6f   : > { %1695 = vmatmul.mubr.bf16.gmra.mrb[20].mxu1 %v3287_v2  ;;  %3035 = vmatprep.subr.bf16.mxu1 %v3510_v1  ;;  %v3383_v2 = vld [vmem:[%s3649_s30 + $0x80] ss:$28 sps:$4 sm:$0xff]  }
  0x70   : > { %1904 = vmatmul.mubr.bf16.gmra.mrb[20].mxu0 %v3288_v3  ;;  %1702 = vmatprep.mubr.bf16.mxu1 %v3290_v4  ;;  %v3384_v3 = vld [vmem:[%s3649_s30 + $0x464] ss:$28 sps:$4 sm:$0xff]   ;;  %v3386_v4 = vld [vmem:[%s3649_s30 + $0xbc] ss:$28 sps:$4 sm:$0xff]  }
  0x71   : > { %1911 = vmatprep.mubr.bf16.mxu0 %v3292_v5  ;;  %2061 = vmatpush1.bf16.msra.mxu0 %v3324_v6  ;;  %v3388_v5 = vld [vmem:[%s3649_s30 + $0x460] ss:$28 sps:$4 sm:$0xff]   ;;  %v3389_v6 = vld [vmem:[%s3649_s30 + $0xb8] ss:$28 sps:$4 sm:$0xff]  }
  0x72   : > { %2062 = vmatprep.subr.bf16.mxu0 %v3510_v1  ;;  %3051 = vmatpush1.bf16.msra.mxu1 %v3680_v24  ;;  %v3313_v24 = vld [vmem:[%s3649_s30 + $0x204] ss:$28 sps:$4 sm:$0xff]  }
  0x73   : > { %3036 = vmatprep.subr.bf16.mxu1 %v3510_v1 }
  0x75   : > { %2063 = vmatpush1.bf16.msra.mxu0 %v3335_v8  ;;  %v3392_v8 = vld [vmem:[%s3649_s30 + $0xf4] ss:$28 sps:$4 sm:$0xff]  }
  0x76   : > { %2064 = vmatprep.subr.bf16.mxu0 %v3510_v1  ;;  %3052 = vmatpush1.bf16.msra.mxu1 %v3691_v26  ;;  %v3316_v26 = vld [vmem:[%s3649_s30 + $0x200] ss:$28 sps:$4 sm:$0xff]  }
  0x77   : > { %1703 = vmatmul.mubr.bf16.gmra.mrb[24].mxu1 %v3294_v7  ;;  %3037 = vmatprep.subr.bf16.mxu1 %v3510_v1  ;;  %v3390_v7 = vld [vmem:[%s3649_s30 + $0x49c] ss:$28 sps:$4 sm:$0xff]  }
  0x78   : > { %1912 = vmatmul.mubr.bf16.gmra.mrb[24].mxu0 %v3295_v9  ;;  %1710 = vmatprep.mubr.bf16.mxu1 %v3297_v10  ;;  %v3394_v9 = vld [vmem:[%s3649_s30 + $0x498] ss:$28 sps:$4 sm:$0xff]   ;;  %v3395_v10 = vld [vmem:[%s3649_s30 + $0xf0] ss:$28 sps:$4 sm:$0xff]  }
  0x79   : > { %1919 = vmatprep.mubr.bf16.mxu0 %v3299_v11  ;;  %2065 = vmatpush1.bf16.msra.mxu0 %v3342_v12  ;;  %v3398_v11 = vld [vmem:[%s3649_s30 + $0x3c4] ss:$28 sps:$4 sm:$0xff]   ;;  %v3399_v12 = vld [vmem:[%s3649_s30 + $0x12c] ss:$28 sps:$4 sm:$0xff]  }
  0x7a   : > { %2066 = vmatprep.subr.bf16.mxu0 %v3510_v1  ;;  %3053 = vmatpush1.bf16.msra.mxu1 %v3702_v28  ;;  %v3322_v28 = vld [vmem:[%s3649_s30 + $0x230] ss:$28 sps:$4 sm:$0xff]  }
  0x7b   : > { %3038 = vmatprep.subr.bf16.mxu1 %v3510_v1 }
  0x7d   : > { %2067 = vmatpush1.bf16.msra.mxu0 %v3351_v14  ;;  %v3401_v14 = vld [vmem:[%s3649_s30 + $0x128] ss:$28 sps:$4 sm:$0xff]  }
  0x7e   : > { %2068 = vmatprep.subr.bf16.mxu0 %v3510_v1  ;;  %3054 = vmatpush1.bf16.msra.mxu1 %v3713_v30  ;;  %v3325_v30 = vld [vmem:[%s3649_s30 + $0x26c] ss:$28 sps:$4 sm:$0xff]  }
  0x7f   : > { %1711 = vmatmul.mubr.bf16.gmra.mrb[28].mxu1 %v3301_v13  ;;  %3039 = vmatprep.subr.bf16.mxu1 %v3510_v1  ;;  %v3396_v13 = vld [vmem:[%s3649_s30 + $0x3c0] ss:$28 sps:$4 sm:$0xff]  }
  0x80   : > { %1920 = vmatmul.mubr.bf16.gmra.mrb[28].mxu0 %v3302_v15  ;;  %1718 = vmatprep.mubr.bf16.mxu1 %v3304_v16  ;;  %v3402_v15 = vld [vmem:[%s3649_s30 + $0x3fc] ss:$28 sps:$4 sm:$0xff]   ;;  %v3404_v16 = vld [vmem:[%s3649_s30 + $0x164] ss:$28 sps:$4 sm:$0xff]  }
  0x81   : > { %1927 = vmatprep.mubr.bf16.mxu0 %v3306_v17  ;;  %2069 = vmatpush1.bf16.msra.mxu0 %v3358_v18  ;;  %v3421_v17 = vld [vmem:[%s4390_s1 + $0x188] sm:$0xff]   ;;  %v3406_v18 = vld [vmem:[%s3649_s30 + $0x3f8] ss:$28 sps:$4 sm:$0xff]  }
  0x82   : > { %2070 = vmatprep.subr.bf16.mxu0 %v3510_v1  ;;  %3055 = vmatpush1.bf16.msra.mxu1 %v3724_v32  ;;  %v3329_v32 = vld [vmem:[%s3649_s30 + $0x268] ss:$28 sps:$4 sm:$0xff]  }
  0x83   : > { %3040 = vmatprep.subr.bf16.mxu1 %v3510_v1  ;;  %v3320_v1 = vld [vmem:[%s3649_s30 + $0x23c] ss:$28 sps:$4 sm:$0xff]  }
  0x85   : > { %2071 = vmatpush1.bf16.msra.mxu0 %v3365_v19  ;;  %v3407_v19 = vld [vmem:[%s3649_s30 + $0x160] ss:$28 sps:$4 sm:$0xff]  }
  0x86   : > { %3056 = vmatpush1.bf16.msra.mxu1 %v3735_v34  ;;  %v3331_v34 = vld [vmem:[%s3649_s30 + $0x2a4] ss:$28 sps:$4 sm:$0xff]  }
  0x87   : > { %1719 = vmatmul.mubr.bf16.gmra.mrb[32].mxu1 %v3308_v20  ;;  %2977 = vmatprep.subr.bf16.mxu1 %v3867_v21  ;;  %v3409_v20 = vld [vmem:[%s3649_s30 + $0x434] ss:$28 sps:$4 sm:$0xff]  }
  0x88   : > { %1928 = vmatmul.mubr.bf16.gmra.mrb[32].mxu0 %v3309_v22  ;;  %1726 = vmatprep.mubr.bf16.mxu1 %v3311_v23  ;;  %v3411_v22 = vld [vmem:[%s3649_s30 + $0x19c] ss:$28 sps:$4 sm:$0xff]   ;;  %v3413_v23 = vld [vmem:[%s3649_s30 + $0x430] ss:$28 sps:$4 sm:$0xff]  }
  0x89   : > { %1935 = vmatprep.mubr.bf16.mxu0 %v3313_v24  ;;  %v3414_v24 = vld [vmem:[%s3649_s30 + $0x198] ss:$28 sps:$4 sm:$0xff]  }
  0x8f   : > { %1727 = vmatmul.mubr.bf16.gmra.mrb[36].mxu1 %v3315_v25  ;;  %v3415_v25 = vld [vmem:[%s3649_s30 + $0x46c] ss:$28 sps:$4 sm:$0xff]  }
  0x90   : > { %1936 = vmatmul.mubr.bf16.gmra.mrb[36].mxu0 %v3316_v26  ;;  %1734 = vmatprep.mubr.bf16.mxu1 %v3318_v27  ;;  %v3419_v26 = vld [vmem:[%s3649_s30 + $0x468] ss:$28 sps:$4 sm:$0xff]   ;;  %v3420_v27 = vld [vmem:[%s3649_s30 + $0x1d0] ss:$28 sps:$4 sm:$0xff]  }
  0x91   : > { %1943 = vmatprep.mubr.bf16.mxu0 %v3320_v1  ;;  %v3422_v1 = vld [vmem:[%s3649_s30 + $0x4a4] ss:$28 sps:$4 sm:$0xff]  }
  0x97   : > { %1735 = vmatmul.mubr.bf16.gmra.mrb[40].mxu1 %v3322_v28  ;;  %v3424_v28 = vld [vmem:[%s3649_s30 + $0x20c] ss:$28 sps:$4 sm:$0xff]  }
  0x98   : > { %1944 = vmatmul.mubr.bf16.gmra.mrb[40].mxu0 %v3323_v29  ;;  %1742 = vmatprep.mubr.bf16.mxu1 %v3325_v30  ;;  %v3426_v29 = vld [vmem:[%s3649_s30 + $0x4a0] ss:$28 sps:$4 sm:$0xff]   ;;  %v3427_v30 = vld [vmem:[%s3649_s30 + $0x208] ss:$28 sps:$4 sm:$0xff]  }
  0x99   : > { %1951 = vmatprep.mubr.bf16.mxu0 %v3327_v31  ;;  %v3430_v31 = vld [vmem:[%s3649_s30 + $0x18] ss:$28 sps:$4 sm:$0xff]  }
  0x9f   : > { %1743 = vmatmul.mubr.bf16.gmra.mrb[44].mxu1 %v3329_v32  ;;  %v3428_v32 = vld [vmem:[%s3649_s30 + $0x244] ss:$28 sps:$4 sm:$0xff]  }
  0xa0   : > { %1952 = vmatmul.mubr.bf16.gmra.mrb[44].mxu0 %v3330_v33  ;;  %1750 = vmatprep.mubr.bf16.mxu1 %v3331_v34  ;;  %v3432_v34 = vld [vmem:[%s3649_s30 + $0x50] ss:$28 sps:$4 sm:$0xff]  }
  0xa1   : > { %1959 = vmatprep.mubr.bf16.mxu0 %v3333_v35 }
  0xa7   : > { %1751 = vmatmul.mubr.bf16.gmra.mrb[48].mxu1 %v3336_v36  ;;  %v3431_v36 = vld [vmem:[%s3649_s30 + $0x240] ss:$28 sps:$4 sm:$0xff]  }
  0xa8   : > { %1960 = vmatmul.mubr.bf16.gmra.mrb[48].mxu0 %v3337_v37  ;;  %1758 = vmatprep.mubr.bf16.mxu1 %v3338_v38  ;;  %v3435_v38 = vld [vmem:[%s3649_s30 + $0x88] ss:$28 sps:$4 sm:$0xff]  }
  0xa9   : > { %1967 = vmatprep.mubr.bf16.mxu0 %v3340_v39 }
  0xaf   : > { %1759 = vmatmul.mubr.bf16.gmra.mrb[52].mxu1 %v3343_v40  ;;  %v3433_v40 = vld [vmem:[%s3649_s30 + $0x27c] ss:$28 sps:$4 sm:$0xff]  }
  0xb0   : > { %1968 = vmatmul.mubr.bf16.gmra.mrb[52].mxu0 %v3344_v41  ;;  %1766 = vmatprep.mubr.bf16.mxu1 %v3345_v42  ;;  %v3437_v42 = vld [vmem:[%s3649_s30 + $0xc0] ss:$28 sps:$4 sm:$0xff]  }
  0xb1   : > { %1975 = vmatprep.mubr.bf16.mxu0 %v3347_v43 }
  0xb7   : > { %1767 = vmatmul.mubr.bf16.gmra.mrb[56].mxu1 %v3349_v44  ;;  %v3436_v44 = vld [vmem:[%s3649_s30 + $0x278] ss:$28 sps:$4 sm:$0xff]  }
  0xb8   : > { %1976 = vmatmul.mubr.bf16.gmra.mrb[56].mxu0 %v3350_v45  ;;  %1774 = vmatprep.mubr.bf16.mxu1 %v3352_v46  ;;  %v3440_v46 = vld [vmem:[%s3649_s30 + $0xf8] ss:$28 sps:$4 sm:$0xff]  }
  0xb9   : > { %1983 = vmatprep.mubr.bf16.mxu0 %v3354_v47 }
  0xbf   : > { %1775 = vmatmul.mubr.bf16.gmra.mrb[60].mxu1 %v3356_v48  ;;  %v3438_v48 = vld [vmem:[%s3649_s30 + $0x2b4] ss:$28 sps:$4 sm:$0xff]  }
  0xc0   : > { %1984 = vmatmul.mubr.bf16.gmra.mrb[60].mxu0 %v3357_v49  ;;  %1782 = vmatprep.mubr.bf16.mxu1 %v3359_v50  ;;  %v3442_v50 = vld [vmem:[%s3649_s30 + $0x130] ss:$28 sps:$4 sm:$0xff]  }
  0xc1   : > { %1991 = vmatprep.mubr.bf16.mxu0 %v3361_v51 }
  0xc7   : > { %1783 = vmatmul.mubr.bf16.gmra.mrb[64].mxu1 %v3363_v52  ;;  %v3441_v52 = vld [vmem:[%s3649_s30 + $0x2b0] ss:$28 sps:$4 sm:$0xff]  }
  0xc8   : > { %1992 = vmatmul.mubr.bf16.gmra.mrb[64].mxu0 %v3364_v53  ;;  %1790 = vmatprep.mubr.bf16.mxu1 %v3366_v54  ;;  %v3445_v54 = vld [vmem:[%s3649_s30 + $0x168] ss:$28 sps:$4 sm:$0xff]  }
  0xc9   : > { %2072 = vmatprep.mubr.bf16.mxu0 %v3370_v55 }
  0xcf   : > { %1791 = vmatmul.mubr.bf16.gmra.mrb[68].mxu1 %v3371_v56  ;;  %v3443_v56 = vld [vmem:[%s3649_s30 + $0x2ec] ss:$28 sps:$4 sm:$0xff]  }
  0xd0   : > { %2073 = vmatmul.mubr.bf16.vlgmr.msra.gmra.mrb[0].mxu0 %v3368_v57  ;;  %1798 = vmatprep.mubr.bf16.mxu1 %v3372_v58  ;;  %v3447_v58 = vld [vmem:[%s3649_s30 + $0x1a0] ss:$28 sps:$4 sm:$0xff]  }
  0xd1   : > { %2080 = vmatprep.mubr.bf16.mxu0 %v3374_v59 }
  0xd7   : > { %1799 = vmatmul.mubr.bf16.gmra.mrb[72].mxu1 %v3376_v60  ;;  %v3446_v60 = vld [vmem:[%s3649_s30 + $0x2e8] ss:$28 sps:$4 sm:$0xff]  }
  0xd8   : > { %2081 = vmatmul.mubr.bf16.gmra.mrb[4].mxu0 %v3377_v61  ;;  %1806 = vmatprep.mubr.bf16.mxu1 %v3378_v62  ;;  %v3450_v62 = vld [vmem:[%s3649_s30 + $0x1d8] ss:$28 sps:$4 sm:$0xff]  }
  0xd9   : > { %2088 = vmatprep.mubr.bf16.mxu0 %v3380_v63 }
  0xdf   : > { %1807 = vmatmul.mubr.bf16.gmra.mrb[76].mxu1 %v3382_v0  ;;  %v3448_v0 = vld [vmem:[%s3649_s30 + $0x324] ss:$28 sps:$4 sm:$0xff]  }
  0xe0   : > { %2089 = vmatmul.mubr.bf16.gmra.mrb[8].mxu0 %v3383_v2  ;;  %1814 = vmatprep.mubr.bf16.mxu1 %v3384_v3  ;;  %v3452_v3 = vld [vmem:[%s3649_s30 + $0x210] ss:$28 sps:$4 sm:$0xff]  }
  0xe1   : > { %2096 = vmatprep.mubr.bf16.mxu0 %v3386_v4 }
  0xe7   : > { %1815 = vmatmul.mubr.bf16.gmra.mrb[80].mxu1 %v3388_v5  ;;  %v3451_v5 = vld [vmem:[%s3649_s30 + $0x320] ss:$28 sps:$4 sm:$0xff]  }
  0xe8   : > { %2097 = vmatmul.mubr.bf16.gmra.mrb[12].mxu0 %v3389_v6  ;;  %1822 = vmatprep.mubr.bf16.mxu1 %v3390_v7  ;;  %v3455_v7 = vld [vmem:[%s3649_s30 + $0x248] ss:$28 sps:$4 sm:$0xff]  }
  0xe9   : > { %2104 = vmatprep.mubr.bf16.mxu0 %v3392_v8 }
  0xef   : > { %1823 = vmatmul.mubr.bf16.gmra.mrb[84].mxu1 %v3394_v9  ;;  %v3453_v9 = vld [vmem:[%s3649_s30 + $0x35c] ss:$28 sps:$4 sm:$0xff]  }
  0xf0   : > { %2105 = vmatmul.mubr.bf16.gmra.mrb[16].mxu0 %v3395_v10  ;;  %1999 = vmatprep.mubr.bf16.mxu1 %v3398_v11  ;;  %v3457_v11 = vld [vmem:[%s3649_s30 + $0x280] ss:$28 sps:$4 sm:$0xff]  }
  0xf1   : > { %2112 = vmatprep.mubr.bf16.mxu0 %v3399_v12 }
  0xf7   : > { %2000 = vmatmul.mubr.bf16.vlgmr.msra.gmra.mrb[68].mxu1 %v3396_v13  ;;  %v3456_v13 = vld [vmem:[%s3649_s30 + $0x358] ss:$28 sps:$4 sm:$0xff]  }
  0xf8   : > { %2113 = vmatmul.mubr.bf16.gmra.mrb[20].mxu0 %v3401_v14  ;;  %2007 = vmatprep.mubr.bf16.mxu1 %v3402_v15  ;;  %v3460_v15 = vld [vmem:[%s3649_s30 + $0x2b8] ss:$28 sps:$4 sm:$0xff]  }
  0xf9   : > { %2120 = vmatprep.mubr.bf16.mxu0 %v3404_v16  ;;  %2978 = vmatpush3.bf16.msra.mxu1 %v3867_v21  ;;  %v3417_v21 = vld [vmem:[%s3649_s30 + $0x1d4] ss:$28 sps:$4 sm:$0xff]  }
  0xfa   : > { %2979 = vmatprep.subr.bf16.mxu1 %v3421_v17 }
  0xfd   : > { %2980 = vmatpush3.bf16.msra.mxu1 %v3421_v17  ;;  %v3458_v17 = vld [vmem:[%s3649_s30 + $0x394] ss:$28 sps:$4 sm:$0xff]  }
  0xff   : > { %2008 = vmatmul.mubr.bf16.gmra.mrb[72].mxu1 %v3406_v18 }
 0x100   : > { %2121 = vmatmul.mubr.bf16.gmra.mrb[24].mxu0 %v3407_v19  ;;  %2015 = vmatprep.mubr.bf16.mxu1 %v3409_v20  ;;  %v3462_v19 = vld [vmem:[%s3649_s30 + $0x2f0] ss:$28 sps:$4 sm:$0xff]  }
 0x101   : > { %2128 = vmatprep.mubr.bf16.mxu0 %v3411_v22  ;;  %v3461_v22 = vld [vmem:[%s3649_s30 + $0x390] ss:$28 sps:$4 sm:$0xff]  }
 0x107   : > { %2016 = vmatmul.mubr.bf16.gmra.mrb[76].mxu1 %v3413_v23 }
 0x108   : > { %2129 = vmatmul.mubr.bf16.gmra.mrb[28].mxu0 %v3414_v24  ;;  %2023 = vmatprep.mubr.bf16.mxu1 %v3415_v25  ;;  %v3465_v24 = vld [vmem:[%s3649_s30 + $0x328] ss:$28 sps:$4 sm:$0xff]  }
 0x109   : > { %2136 = vmatprep.mubr.bf16.mxu0 %v3417_v21  ;;  %v3463_v21 = vld [vmem:[%s3649_s30 + $0x3cc] ss:$28 sps:$4 sm:$0xff]  }
 0x10f   : > { %2024 = vmatmul.mubr.bf16.gmra.mrb[80].mxu1 %v3419_v26 }
 0x110   : > { %2137 = vmatmul.mubr.bf16.gmra.mrb[32].mxu0 %v3420_v27  ;;  %2031 = vmatprep.mubr.bf16.mxu1 %v3422_v1  ;;  %v3467_v27 = vld [vmem:[%s3649_s30 + $0x360] ss:$28 sps:$4 sm:$0xff]  }
 0x111   : > { %2144 = vmatprep.mubr.bf16.mxu0 %v3424_v28  ;;  %v3466_v28 = vld [vmem:[%s3649_s30 + $0x3c8] ss:$28 sps:$4 sm:$0xff]  }
 0x117   : > { %2032 = vmatmul.mubr.bf16.gmra.mrb[84].mxu1 %v3426_v29 }
 0x118   : > { %2145 = vmatmul.mubr.bf16.gmra.mrb[36].mxu0 %v3427_v30  ;;  %2981 = vmatprep.mubr.msk.bf16.mxu1 %vm1555_vm0, %v3430_v31  ;;  %v3470_v30 = vld [vmem:[%s3649_s30 + $0x398] ss:$28 sps:$4 sm:$0xff]  }
 0x119   : > { %2152 = vmatprep.mubr.bf16.mxu0 %v3428_v32  ;;  %v3468_v32 = vld [vmem:[%s3649_s30 + $0x404] ss:$28 sps:$4 sm:$0xff]  }
 0x11a   : > { %v3954_v33 = vpop.f32.mrb[0].mxu1 }
 0x11b   : > { %v1658_v35 = vpop.f32.mrb[1].mxu1 }
 0x11c   : > { %v3958_v37 = vpop.f32.mrb[2].mxu1  ;;  %v3472_v35 = vld [vmem:[%s3649_s30 + $0x3d0] ss:$28 sps:$4 sm:$0xff]  }
 0x11d   : > { %v1661_v39 = vpop.f32.mrb[3].mxu1 }
 0x11f   : > { %2982 = vmatmul.mubr.msk.bf16.vlgmr.msra.gmra.mrb[88].mxu1 %vm1555_vm0, %v3432_v34 }
 0x120   : > { %2153 = vmatmul.mubr.bf16.gmra.mrb[40].mxu0 %v3431_v36  ;;  %2985 = vmatprep.mubr.msk.bf16.mxu1 %vm1555_vm0, %v3435_v38  ;;  %v3471_v38 = vld [vmem:[%s3649_s30 + $0x400] ss:$28 sps:$4 sm:$0xff]  }
 0x121   : > { %2160 = vmatprep.mubr.bf16.mxu0 %v3433_v40  ;;  %v3475_v40 = vld [vmem:[%s3649_s30 + $0x408] ss:$28 sps:$4 sm:$0xff]  }
 0x122   : > { %v3964_v41 = vpop.f32.mrb[4].mxu1 }
 0x123   : > { %v1666_v43 = vpop.f32.mrb[5].mxu1 }
 0x124   : > { %v3968_v45 = vpop.f32.mrb[6].mxu1  ;;  %v3473_v43 = vld [vmem:[%s3649_s30 + $0x43c] ss:$28 sps:$4 sm:$0xff]  }
 0x125   : > { %v1669_v47 = vpop.f32.mrb[7].mxu1 }
 0x127   : > { %2986 = vmatmul.mubr.msk.bf16.gmra.mrb[92].mxu1 %vm1555_vm0, %v3437_v42 }
 0x128   : > { %2161 = vmatmul.mubr.bf16.gmra.mrb[44].mxu0 %v3436_v44  ;;  %2989 = vmatprep.mubr.msk.bf16.mxu1 %vm1555_vm0, %v3440_v46  ;;  %v3477_v46 = vld [vmem:[%s3649_s30 + $0x440] ss:$28 sps:$4 sm:$0xff]  }
 0x129   : > { %2168 = vmatprep.mubr.bf16.mxu0 %v3438_v48  ;;  %v3476_v48 = vld [vmem:[%s3649_s30 + $0x438] ss:$28 sps:$4 sm:$0xff]  }
 0x12a   : > { %v3974_v49 = vpop.f32.mrb[8].mxu1 }
 0x12b   : > { %v1674_v51 = vpop.f32.mrb[9].mxu1 }
 0x12c   : > { %v3978_v53 = vpop.f32.mrb[10].mxu1  ;;  %v3481_v51 = vld [vmem:[%s3649_s30 + $0x478] ss:$28 sps:$4 sm:$0xff]  }
 0x12d   : > { %v1677_v55 = vpop.f32.mrb[11].mxu1 }
 0x12f   : > { %2990 = vmatmul.mubr.msk.bf16.gmra.mrb[96].mxu1 %vm1555_vm0, %v3442_v50 }
 0x130   : > { %2169 = vmatmul.mubr.bf16.gmra.mrb[48].mxu0 %v3441_v52  ;;  %2993 = vmatprep.mubr.msk.bf16.mxu1 %vm1555_vm0, %v3445_v54  ;;  %v3478_v54 = vld [vmem:[%s3649_s30 + $0x474] ss:$28 sps:$4 sm:$0xff]  }
 0x131   : > { %2176 = vmatprep.mubr.bf16.mxu0 %v3443_v56  ;;  %v3482_v56 = vld [vmem:[%s3649_s30 + $0x4b0] ss:$28 sps:$4 sm:$0xff]  }
 0x132   : > { %v3984_v57 = vpop.f32.mrb[12].mxu1 }
 0x133   : > { %v1682_v59 = vpop.f32.mrb[13].mxu1 }
 0x134   : > { %v3988_v61 = vpop.f32.mrb[14].mxu1  ;;  %v3480_v59 = vld [vmem:[%s3649_s30 + $0x470] ss:$28 sps:$4 sm:$0xff]  }
 0x135   : > { %v1685_v63 = vpop.f32.mrb[15].mxu1 }
 0x136   : > { %v3483_v63 = vld [vmem:[%s3649_s30 + $0x4ac] ss:$28 sps:$4 sm:$0xff]  }
 0x137   : > { %2994 = vmatmul.mubr.msk.bf16.gmra.mrb[100].mxu1 %vm1555_vm0, %v3447_v58 }
 0x138   : > { %2177 = vmatmul.mubr.bf16.gmra.mrb[52].mxu0 %v3446_v60  ;;  %2997 = vmatprep.mubr.msk.bf16.mxu1 %vm1555_vm0, %v3450_v62 }
 0x139   : > { %2184 = vmatprep.mubr.bf16.mxu0 %v3448_v0 }
 0x13a   : > { %v3994_v2 = vpop.f32.mrb[16].mxu1 }
 0x13b   : > { %v1690_v4 = vpop.f32.mrb[17].mxu1 }
 0x13c   : > { %v3998_v6 = vpop.f32.mrb[18].mxu1  ;;  %v3485_v4 = vld [vmem:[%s3649_s30 + $0x4a8] ss:$28 sps:$4 sm:$0xff]  }
 0x13d   : > { %v1693_v8 = vpop.f32.mrb[19].mxu1 }
 0x13f   : > { %2998 = vmatmul.mubr.msk.bf16.gmra.mrb[104].mxu1 %vm1555_vm0, %v3452_v3 }
 0x140   : > { %2185 = vmatmul.mubr.bf16.gmra.mrb[56].mxu0 %v3451_v5  ;;  %3001 = vmatprep.mubr.msk.bf16.mxu1 %vm1555_vm0, %v3455_v7 }
 0x141   : > { %2192 = vmatprep.mubr.bf16.mxu0 %v3453_v9 }
 0x142   : > { %v4004_v10 = vpop.f32.mrb[20].mxu1 }
 0x143   : > { %v1698_v12 = vpop.f32.mrb[21].mxu1 }
 0x144   : > { %v4008_v14 = vpop.f32.mrb[22].mxu1 }
 0x145   : > { %v1701_v16 = vpop.f32.mrb[23].mxu1 }
 0x147   : > { %3002 = vmatmul.mubr.msk.bf16.gmra.mrb[108].mxu1 %vm1555_vm0, %v3457_v11 }
 0x148   : > { %2193 = vmatmul.mubr.bf16.gmra.mrb[60].mxu0 %v3456_v13  ;;  %3005 = vmatprep.mubr.msk.bf16.mxu1 %vm1555_vm0, %v3460_v15 }
 0x149   : > { %2200 = vmatprep.mubr.bf16.mxu0 %v3458_v17 }
 0x14a   : > { %v4014_v18 = vpop.f32.mrb[24].mxu1 }
 0x14b   : > { %v1706_v20 = vpop.f32.mrb[25].mxu1 }
 0x14c   : > { %v4018_v23 = vpop.f32.mrb[26].mxu1 }
 0x14d   : > { %v1709_v25 = vpop.f32.mrb[27].mxu1 }
 0x14f   : > { %3006 = vmatmul.mubr.msk.bf16.gmra.mrb[112].mxu1 %vm1555_vm0, %v3462_v19 }
 0x150   : > { %2201 = vmatmul.mubr.bf16.gmra.mrb[64].mxu0 %v3461_v22  ;;  %3009 = vmatprep.mubr.msk.bf16.mxu1 %vm1555_vm0, %v3465_v24 }
 0x151   : > { %2208 = vmatprep.mubr.bf16.mxu0 %v3463_v21 }
 0x152   : > { %v4024_v26 = vpop.f32.mrb[28].mxu1 }
 0x153   : > { %v1714_v1 = vpop.f32.mrb[29].mxu1 }
 0x154   : > { %v4028_v29 = vpop.f32.mrb[30].mxu1 }
 0x155   : > { %v1717_v31 = vpop.f32.mrb[31].mxu1 }
 0x157   : > { %3010 = vmatmul.mubr.msk.bf16.gmra.mrb[116].mxu1 %vm1555_vm0, %v3467_v27 }
 0x158   : > { %2209 = vmatmul.mubr.bf16.gmra.mrb[68].mxu0 %v3466_v28  ;;  %3013 = vmatprep.mubr.msk.bf16.mxu1 %vm1555_vm0, %v3470_v30 }
 0x159   : > { %2216 = vmatprep.mubr.bf16.mxu0 %v3468_v32 }
 0x15a   : > { %v4034_v34 = vpop.f32.mrb[32].mxu1 }
 0x15b   : > { %v1722_v36 = vpop.f32.mrb[33].mxu1 }
 0x15c   : > { %v4038_v39 = vpop.f32.mrb[34].mxu1 }
 0x15d   : > { %v1725_v42 = vpop.f32.mrb[35].mxu1 }
 0x15f   : > { %3014 = vmatmul.mubr.msk.bf16.gmra.mrb[120].mxu1 %vm1555_vm0, %v3472_v35 }
 0x160   : > { %2217 = vmatmul.mubr.bf16.gmra.mrb[72].mxu0 %v3471_v38  ;;  %3017 = vmatprep.mubr.msk.bf16.mxu1 %vm1555_vm0, %v3475_v40 }
 0x161   : > { %2224 = vmatprep.mubr.bf16.mxu0 %v3473_v43 }
 0x162   : > { %v4044_v44 = vpop.f32.mrb[36].mxu1 }
 0x163   : > { %v1730_v47 = vpop.f32.mrb[37].mxu1 }
 0x164   : > { %v4048_v50 = vpop.f32.mrb[38].mxu1 }
 0x165   : > { %v1733_v52 = vpop.f32.mrb[39].mxu1 }
 0x167   : > { %3018 = vmatmul.mubr.msk.bf16.gmra.mrb[124].mxu1 %vm1555_vm0, %v3477_v46 }
 0x168   : > { %2225 = vmatmul.mubr.bf16.gmra.mrb[76].mxu0 %v3476_v48  ;;  %3021 = vmatprep.mubr.msk.bf16.mxu1 %vm1555_vm0, %v3481_v51 }
 0x169   : > { %2232 = vmatprep.mubr.bf16.mxu0 %v3478_v54 }
 0x16a   : > { %v4054_v55 = vpop.f32.mrb[40].mxu1 }
 0x16b   : > { %v1738_v58 = vpop.f32.mrb[41].mxu1 }
 0x16c   : > { %v4058_v60 = vpop.f32.mrb[42].mxu1 }
 0x16d   : > { %v1741_v62 = vpop.f32.mrb[43].mxu1 }
 0x16f   : > { %3022 = vmatmul.mubr.msk.bf16.gmra.mrb[128].mxu1 %vm1555_vm0, %v3482_v56 }
 0x170   : > { %2233 = vmatmul.mubr.bf16.gmra.mrb[80].mxu0 %v3480_v59 }
 0x171   : > { %2240 = vmatprep.mubr.bf16.mxu0 %v3483_v63 }
 0x172   : > { %v4062_v0 = vpop.f32.mrb[44].mxu1 }
 0x173   : > { %v1746_v3 = vpop.f32.mrb[45].mxu1 }
 0x174   : > { %v4065_v5 = vpop.f32.mrb[46].mxu1 }
 0x175   : > { %v1749_v7 = vpop.f32.mrb[47].mxu1 }
 0x178   : > { %2241 = vmatmul.mubr.bf16.gmra.mrb[84].mxu0 %v3485_v4 }
 0x17a   : > { %v4067_v8 = vpop.f32.mrb[48].mxu1 }
 0x17b   : > { %v1754_v9 = vpop.f32.mrb[49].mxu1 }
 0x17c   : > { %v4069_v11 = vpop.f32.mrb[50].mxu1 }
 0x17d   : > { %v1757_v12 = vpop.f32.mrb[51].mxu1 }
 0x182   : > { %v4071_v13 = vpop.f32.mrb[52].mxu1 }
 0x183   : > { %v1762_v15 = vpop.f32.mrb[53].mxu1 }
 0x184   : > { %v4073_v16 = vpop.f32.mrb[54].mxu1 }
 0x185   : > { %v1765_v17 = vpop.f32.mrb[55].mxu1 }
 0x18a   : > { %v4075_v19 = vpop.f32.mrb[56].mxu1 }
 0x18b   : > { %v1770_v20 = vpop.f32.mrb[57].mxu1 }
 0x18c   : > { %v4077_v22 = vpop.f32.mrb[58].mxu1 }
 0x18d   : > { %v1773_v24 = vpop.f32.mrb[59].mxu1 }
 0x192   : > { %v4079_v25 = vpop.f32.mrb[60].mxu1 }
 0x193   : > { %v1778_v21 = vpop.f32.mrb[61].mxu1 }
 0x194   : > { %v4081_v27 = vpop.f32.mrb[62].mxu1 }
 0x195   : > { %v1781_v1 = vpop.f32.mrb[63].mxu1 }
 0x19a   : > { %v4083_v28 = vpop.f32.mrb[64].mxu1 }
 0x19b   : > { %v1786_v30 = vpop.f32.mrb[65].mxu1 }
 0x19c   : > { %v4085_v31 = vpop.f32.mrb[66].mxu1 }
 0x19d   : > { %v1789_v32 = vpop.f32.mrb[67].mxu1 }
 0x1a3   : > { %v2074_v35 = vpop.f32.mrb[0].mxu0 }
 0x1a4   : > { %v4088_v36 = vadd.f32 %v2074_v35, %v3954_v33  ;;  %v2076_v38 = vpop.f32.mrb[1].mxu0 }
 0x1a5   : > { %v2077_v40 = vpop.f32.mrb[2].mxu0 }
 0x1a6   : > { %v4091_v42 = vadd.f32 %v2077_v40, %v3958_v37  ;;  %v2079_v43 = vpop.f32.mrb[3].mxu0 }
 0x1ab   : > { %v2082_v46 = vpop.f32.mrb[4].mxu0 }
 0x1ac   : > { %v4094_v47 = vadd.f32 %v2082_v46, %v3964_v41  ;;  %v2084_v48 = vpop.f32.mrb[5].mxu0 }
 0x1ad   : > { %v2085_v51 = vpop.f32.mrb[6].mxu0 }
 0x1ae   : > { %v4097_v52 = vadd.f32 %v2085_v51, %v3968_v45  ;;  %v2087_v54 = vpop.f32.mrb[7].mxu0 }
 0x1b3   : > { %v2090_v56 = vpop.f32.mrb[8].mxu0 }
 0x1b4   : > { %v4100_v33 = vadd.f32 %v2090_v56, %v3974_v49  ;;  %v2092_v58 = vpop.f32.mrb[9].mxu0 }
 0x1b5   : > { %v2093_v59 = vpop.f32.mrb[10].mxu0 }
 0x1b6   : > { %v4103_v37 = vadd.f32 %v2093_v59, %v3978_v53  ;;  %v2095_v62 = vpop.f32.mrb[11].mxu0 }
 0x1bb   : > { %v2098_v63 = vpop.f32.mrb[12].mxu0 }
 0x1bc   : > { %v4106_v41 = vadd.f32 %v2098_v63, %v3984_v57  ;;  %v2100_v3 = vpop.f32.mrb[13].mxu0 }
 0x1bd   : > { %v2101_v4 = vpop.f32.mrb[14].mxu0 }
 0x1be   : > { %v4109_v45 = vadd.f32 %v2101_v4, %v3988_v61  ;;  %v2103_v7 = vpop.f32.mrb[15].mxu0 }
 0x1c3   : > { %v2106_v9 = vpop.f32.mrb[16].mxu0 }
 0x1c4   : > { %v4112_v49 = vadd.f32 %v2106_v9, %v3994_v2  ;;  %v2108_v12 = vpop.f32.mrb[17].mxu0 }
 0x1c5   : > { %v2109_v15 = vpop.f32.mrb[18].mxu0 }
 0x1c6   : > { %v4115_v53 = vadd.f32 %v2109_v15, %v3998_v6  ;;  %v2111_v17 = vpop.f32.mrb[19].mxu0 }
 0x1ca   : > { %v4117_v20 = vpop.f32.mrb[68].mxu1 }
 0x1cb   : > { %v2114_v57 = vpop.f32.mrb[20].mxu0  ;;  %v2003_v24 = vpop.f32.mrb[69].mxu1 }
 0x1cc   : > { %v4120_v21 = vadd.f32 %v2114_v57, %v4004_v10  ;;  %v2116_v61 = vpop.f32.mrb[21].mxu0  ;;  %v4122_v1 = vpop.f32.mrb[70].mxu1 }
 0x1cd   : > { %v2117_v30 = vpop.f32.mrb[22].mxu0  ;;  %v2006_v32 = vpop.f32.mrb[71].mxu1 }
 0x1ce   : > { %v4125_v2 = vadd.f32 %v2117_v30, %v4008_v14  ;;  %v2119_v35 = vpop.f32.mrb[23].mxu0 }
 0x1d2   : > { %v4127_v38 = vpop.f32.mrb[72].mxu1 }
 0x1d3   : > { %v2122_v6 = vpop.f32.mrb[24].mxu0  ;;  %v2011_v40 = vpop.f32.mrb[73].mxu1 }
 0x1d4   : > { %v4130_v43 = vadd.f32 %v2122_v6, %v4014_v18  ;;  %v2124_v46 = vpop.f32.mrb[25].mxu0  ;;  %v4132_v48 = vpop.f32.mrb[74].mxu1 }
 0x1d5   : > { %v2125_v10 = vpop.f32.mrb[26].mxu0  ;;  %v2014_v51 = vpop.f32.mrb[75].mxu1 }
 0x1d6   : > { %v4135_v54 = vadd.f32 %v2125_v10, %v4018_v23  ;;  %v2127_v56 = vpop.f32.mrb[27].mxu0 }
 0x1da   : > { %v4137_v58 = vpop.f32.mrb[76].mxu1 }
 0x1db   : > { %v2130_v14 = vpop.f32.mrb[28].mxu0  ;;  %v2019_v59 = vpop.f32.mrb[77].mxu1 }
 0x1dc   : > { %v4140_v62 = vadd.f32 %v2130_v14, %v4024_v26  ;;  %v2132_v63 = vpop.f32.mrb[29].mxu0  ;;  %v4142_v3 = vpop.f32.mrb[78].mxu1 }
 0x1dd   : > { %v2133_v18 = vpop.f32.mrb[30].mxu0  ;;  %v2022_v4 = vpop.f32.mrb[79].mxu1 }
 0x1de   : > { %v4145_v7 = vadd.f32 %v2133_v18, %v4028_v29  ;;  %v2135_v9 = vpop.f32.mrb[31].mxu0 }
 0x1e2   : > { %v4147_v12 = vpop.f32.mrb[80].mxu1 }
 0x1e3   : > { %v2138_v23 = vpop.f32.mrb[32].mxu0  ;;  %v2027_v15 = vpop.f32.mrb[81].mxu1 }
 0x1e4   : > { %v4150_v17 = vadd.f32 %v2138_v23, %v4034_v34  ;;  %v2140_v57 = vpop.f32.mrb[33].mxu0  ;;  %v4152_v24 = vpop.f32.mrb[82].mxu1 }
 0x1e5   : > { %v2141_v26 = vpop.f32.mrb[34].mxu0  ;;  %v2030_v61 = vpop.f32.mrb[83].mxu1 }
 0x1e6   : > { %v4155_v30 = vadd.f32 %v2141_v26, %v4038_v39  ;;  %v2143_v32 = vpop.f32.mrb[35].mxu0 }
 0x1ea   : > { %v4157_v35 = vpop.f32.mrb[84].mxu1 }
 0x1eb   : > { %v2146_v29 = vpop.f32.mrb[36].mxu0  ;;  %v2035_v6 = vpop.f32.mrb[85].mxu1 }
 0x1ec   : > { %v4160_v40 = vadd.f32 %v2146_v29, %v4044_v44  ;;  %v2148_v46 = vpop.f32.mrb[37].mxu0  ;;  %v4162_v10 = vpop.f32.mrb[86].mxu1 }
 0x1ed   : > { %v2149_v34 = vpop.f32.mrb[38].mxu0  ;;  %v2038_v51 = vpop.f32.mrb[87].mxu1 }
 0x1ee   : > { %v4165_v56 = vadd.f32 %v2149_v34, %v4048_v50  ;;  %v2151_v14 = vpop.f32.mrb[39].mxu0 }
 0x1f2   : > { %v2983_v59 = vpop.f32.mrb[88].mxu1 }
 0x1f3   : > { %v2154_v39 = vpop.f32.mrb[40].mxu0  ;;  %v4168_v63 = vadd.f32 %v4094_v47, %v2983_v59  ;;  %v2283_v18 = vpop.f32.mrb[89].mxu1 }
 0x1f4   : > { %v4171_v4 = vadd.f32 %v2154_v39, %v4054_v55  ;;  %v2156_v44 = vpop.f32.mrb[41].mxu0  ;;  %v4174_v9 = vadd.f32 %v4088_v36, %v2283_v18  ;;  %v2984_v23 = vpop.f32.mrb[90].mxu1 }
 0x1f5   : > { %v2157_v15 = vpop.f32.mrb[42].mxu0  ;;  %v4177_v57 = vadd.f32 %v4097_v52, %v2984_v23  ;;  %v2286_v50 = vpop.f32.mrb[91].mxu1 }
 0x1f6   : > { %v4180_v26 = vadd.f32 %v2157_v15, %v4058_v60  ;;  %v2159_v61 = vpop.f32.mrb[43].mxu0  ;;  %v4183_v47 = vadd.f32 %v4091_v42, %v2286_v50 }
 0x1fa   : > { %v2987_v32 = vpop.f32.mrb[92].mxu1 }
 0x1fb   : > { %v2162_v55 = vpop.f32.mrb[44].mxu0  ;;  %v4186_v29 = vadd.f32 %v4106_v41, %v2987_v32  ;;  %v2299_v36 = vpop.f32.mrb[93].mxu1 }
 0x1fc   : > { %v4189_v6 = vadd.f32 %v2162_v55, %v4062_v0  ;;  %v2164_v46 = vpop.f32.mrb[45].mxu0  ;;  %v4192_v52 = vadd.f32 %v4100_v33, %v2299_v36  ;;  %v2988_v34 = vpop.f32.mrb[94].mxu1 }
 0x1fd   : > { %v2165_v60 = vpop.f32.mrb[46].mxu0  ;;  %v4195_v51 = vadd.f32 %v4109_v45, %v2988_v34  ;;  %v2302_v42 = vpop.f32.mrb[95].mxu1 }
 0x1fe   : > { %v4198_v14 = vadd.f32 %v2165_v60, %v4065_v5  ;;  %v2167_v59 = vpop.f32.mrb[47].mxu0  ;;  %v4201_v41 = vadd.f32 %v4103_v37, %v2302_v42 }
 0x202   : > { %v2991_v39 = vpop.f32.mrb[96].mxu1 }
 0x203   : > { %v2170_v0 = vpop.f32.mrb[48].mxu0  ;;  %v4204_v18 = vadd.f32 %v4120_v21, %v2991_v39  ;;  %v2315_v33 = vpop.f32.mrb[97].mxu1 }
 0x204   : > { %v4207_v44 = vadd.f32 %v2170_v0, %v4067_v8  ;;  %v2172_v23 = vpop.f32.mrb[49].mxu0  ;;  %v4210_v45 = vadd.f32 %v4112_v49, %v2315_v33  ;;  %v2992_v15 = vpop.f32.mrb[98].mxu1 }
 0x205   : > { %v2173_v5 = vpop.f32.mrb[50].mxu0  ;;  %v4213_v50 = vadd.f32 %v4125_v2, %v2992_v15  ;;  %v2318_v37 = vpop.f32.mrb[99].mxu1 }
 0x206   : > { %v4216_v61 = vadd.f32 %v2173_v5, %v4069_v11  ;;  %v2175_v32 = vpop.f32.mrb[51].mxu0  ;;  %v4219_v21 = vadd.f32 %v4115_v53, %v2318_v37 }
 0x207   : > { %v2458_v8 = vmax.f32 %v4174_v9, %v4213_v50 }
 0x20a   : > { %v2995_v55 = vpop.f32.mrb[100].mxu1 }
 0x20b   : > { %v2178_v36 = vpop.f32.mrb[52].mxu0  ;;  %v4224_v49 = vadd.f32 %v4140_v62, %v2995_v55  ;;  %v2331_v46 = vpop.f32.mrb[101].mxu1 }
 0x20c   : > { %v3083_v2 = vadd.f32 %v2178_v36, %v4071_v13  ;;  %v2180_v34 = vpop.f32.mrb[53].mxu0  ;;  %v4228_v60 = vadd.f32 %v4130_v43, %v2331_v46  ;;  %v2996_v11 = vpop.f32.mrb[102].mxu1 }
 0x20d   : > { %v2181_v42 = vpop.f32.mrb[54].mxu0  ;;  %v4233_v59 = vadd.f32 %v4145_v7, %v2996_v11  ;;  %v2334_v39 = vpop.f32.mrb[103].mxu1 }
 0x20e   : > { %v2459_v62 = vmax.f32 %v4183_v47, %v4228_v60  ;;  %v3084_v0 = vadd.f32 %v2181_v42, %v4073_v16  ;;  %v2183_v33 = vpop.f32.mrb[55].mxu0  ;;  %v4239_v13 = vadd.f32 %v4135_v54, %v2334_v39 }
 0x210   : > { %v2460_v23 = vmax.f32 %v4168_v63, %v4239_v13 }
 0x212   : > { %v2999_v15 = vpop.f32.mrb[104].mxu1 }
 0x213   : > { %v2186_v5 = vpop.f32.mrb[56].mxu0  ;;  %v4246_v7 = vadd.f32 %v4160_v40, %v2999_v15  ;;  %v2347_v37 = vpop.f32.mrb[105].mxu1 }
 0x214   : > { %v3085_v32 = vadd.f32 %v2186_v5, %v4075_v19  ;;  %v2188_v55 = vpop.f32.mrb[57].mxu0  ;;  %v4250_v16 = vadd.f32 %v4150_v17, %v2347_v37  ;;  %v3000_v54 = vpop.f32.mrb[106].mxu1 }
 0x215   : > { %v2189_v46 = vpop.f32.mrb[58].mxu0  ;;  %v4255_v34 = vadd.f32 %v4165_v56, %v3000_v54  ;;  %v2350_v11 = vpop.f32.mrb[107].mxu1 }
 0x216   : > { %v3086_v42 = vadd.f32 %v2189_v46, %v4077_v22  ;;  %v2191_v39 = vpop.f32.mrb[59].mxu0  ;;  %v4261_v19 = vadd.f32 %v4155_v30, %v2350_v11 }
 0x21a   : > { %v3003_v15 = vpop.f32.mrb[108].mxu1 }
 0x21b   : > { %v2194_v5 = vpop.f32.mrb[60].mxu0  ;;  %v4268_v56 = vadd.f32 %v4189_v6, %v3003_v15  ;;  %v2363_v37 = vpop.f32.mrb[109].mxu1 }
 0x21c   : > { %v3087_v55 = vadd.f32 %v2194_v5, %v4079_v25  ;;  %v2196_v54 = vpop.f32.mrb[61].mxu0  ;;  %v4272_v22 = vadd.f32 %v4171_v4, %v2363_v37  ;;  %v3004_v30 = vpop.f32.mrb[110].mxu1 }
 0x21d   : > { %v2197_v46 = vpop.f32.mrb[62].mxu0  ;;  %v2375_v11 = vadd.f32 %v4198_v14, %v3004_v30  ;;  %v2366_v39 = vpop.f32.mrb[111].mxu1 }
 0x21e   : > { %v3088_v36 = vadd.f32 %v2197_v46, %v4081_v27  ;;  %v2199_v33 = vpop.f32.mrb[63].mxu0  ;;  %v4279_v6 = vadd.f32 %v4180_v26, %v2366_v39 }
 0x222   : > { %v3007_v15 = vpop.f32.mrb[112].mxu1 }
 0x223   : > { %v2202_v4 = vpop.f32.mrb[64].mxu0  ;;  %v4283_v5 = vadd.f32 %v3083_v2, %v3007_v15  ;;  %v2379_v37 = vpop.f32.mrb[113].mxu1 }
 0x224   : > { %v3089_v14 = vadd.f32 %v2202_v4, %v4083_v28  ;;  %v2204_v54 = vpop.f32.mrb[65].mxu0  ;;  %v2380_v30 = vadd.f32 %v4207_v44, %v2379_v37  ;;  %v3008_v17 = vpop.f32.mrb[114].mxu1 }
 0x225   : > { %v2205_v43 = vpop.f32.mrb[66].mxu0  ;;  %v4287_v27 = vadd.f32 %v3084_v0, %v3008_v17  ;;  %v2382_v33 = vpop.f32.mrb[115].mxu1 }
 0x226   : > { %v3090_v26 = vadd.f32 %v2205_v43, %v4085_v31  ;;  %v2207_v46 = vpop.f32.mrb[67].mxu0  ;;  %v2383_v39 = vadd.f32 %v4216_v61, %v2382_v33 }
 0x22a   : > { %v3011_v25 = vpop.f32.mrb[116].mxu1 }
 0x22b   : > { %v2210_v40 = vpop.f32.mrb[68].mxu0  ;;  %v4291_v2 = vadd.f32 %v3087_v55, %v3011_v25  ;;  %v2395_v15 = vpop.f32.mrb[117].mxu1 }
 0x22c   : > { %v3091_v28 = vadd.f32 %v2210_v40, %v4117_v20  ;;  %v2212_v4 = vpop.f32.mrb[69].mxu0  ;;  %v4294_v54 = vadd.f32 %v3085_v32, %v2395_v15  ;;  %v3012_v44 = vpop.f32.mrb[118].mxu1 }
 0x22d   : > { %v2213_v37 = vpop.f32.mrb[70].mxu0  ;;  %v4296_v0 = vadd.f32 %v3088_v36, %v3012_v44  ;;  %v2398_v17 = vpop.f32.mrb[119].mxu1 }
 0x22e   : > { %v3092_v31 = vadd.f32 %v2213_v37, %v4122_v1  ;;  %v2215_v43 = vpop.f32.mrb[71].mxu0  ;;  %v4299_v46 = vadd.f32 %v3086_v42, %v2398_v17  ;;  %v4307_v1 = vld [vmem:[%s4391_s2] ss:$0 sm:$0xff] }
 0x232   : > { %v3015_v61 = vpop.f32.mrb[120].mxu1 }
 0x233   : > { %v2218_v33 = vpop.f32.mrb[72].mxu0  ;;  %v2420_v55 = vadd.f32 %v3091_v28, %v3015_v61  ;;  %v2411_v25 = vpop.f32.mrb[121].mxu1 }
 0x234   : > { %v3093_v53 = vadd.f32 %v2218_v33, %v4127_v38  ;;  %v2220_v20 = vpop.f32.mrb[73].mxu0  ;;  %v4302_v40 = vadd.f32 %v3089_v14, %v2411_v25  ;;  %v3016_v32 = vpop.f32.mrb[122].mxu1 }
 0x235   : > { %v2470_v15 = vmax.f32 %v2375_v11, %v2420_v55  ;;  %v2221_v36 = vpop.f32.mrb[74].mxu0  ;;  %v2423_v4 = vadd.f32 %v3092_v31, %v3016_v32  ;;  %v2414_v44 = vpop.f32.mrb[123].mxu1  ;;  %v4393_v32 = vmax.f32 %v4177_v57, %v4224_v49 }
 0x236   : > { %v3094_v42 = vadd.f32 %v2221_v36, %v4132_v48  ;;  %v2223_v28 = vpop.f32.mrb[75].mxu0  ;;  %v2415_v37 = vadd.f32 %v3090_v26, %v2414_v44  ;;  %v4394_v36 = vmax.f32 %v4201_v41, %v4250_v16  ;;  %v4396_v41 = vmax.f32 %v4186_v29, %v4261_v19 }
 0x237   : > { %v2481_v38 = vmax.f32 %v2459_v62, %v2470_v15  ;;  %v2471_v14 = vmax.f32 %v2380_v30, %v2423_v4 }
 0x238   : > { %v2469_v17 = vmax.f32 %v4268_v56, %v2415_v37 }
 0x239   : > { %v2499_v11 = vadd.f32 %v4307_v1, %v2481_v38  ;;  %v2482_v31 = vmax.f32 %v2460_v23, %v2471_v14 }
 0x23a   : > { %v2480_v43 = vmax.f32 %v2458_v8, %v2469_v17  ;;  %v3019_v48 = vpop.f32.mrb[124].mxu1 }
 0x23b   : > { %v2226_v26 = vpop.f32.mrb[76].mxu0  ;;  %v2427_v61 = vpop.f32.mrb[125].mxu1  ;;  %v2510_v33 = vmax.f32 %v2499_v11, 0.0  ;;  %v2500_v8 = vadd.f32 %v4307_v1, %v2482_v31 }
 0x23c   : > { %v2498_v47 = vadd.f32 %v4307_v1, %v2480_v43  ;;  %v3095_v60 = vadd.f32 %v2226_v26, %v4137_v58  ;;  %v2228_v62 = vpop.f32.mrb[77].mxu0  ;;  %v2428_v56 = vadd.f32 %v3093_v53, %v2427_v61  ;;  %v3020_v30 = vpop.f32.mrb[126].mxu1 }
 0x23d   : > { %v2229_v55 = vpop.f32.mrb[78].mxu0  ;;  %v2430_v25 = vpop.f32.mrb[127].mxu1  ;;  %v2511_v37 = vmax.f32 %v2500_v8, 0.0 }
 0x23e   : > { %v2509_v63 = vmax.f32 %v2498_v47, 0.0  ;;  %v2436_v13 = vadd.f32 %v3095_v60, %v3019_v48  ;;  %v2472_v23 = vmax.f32 %v2383_v39, %v2428_v56  ;;  %v3096_v9 = vadd.f32 %v2229_v55, %v4142_v3  ;;  %v2231_v50 = vpop.f32.mrb[79].mxu0 }
 0x23f   : > { %v2431_v58 = vadd.f32 %v3094_v42, %v2430_v25 }
 0x240   : > { %v2927_v53 = vpack.c.bf16 %v2510_v33, %v2509_v63  ;;  %v2474_v20 = vmax.f32 %v4287_v27, %v2436_v13  ;;  %v2483_v15 = vmax.f32 %v4393_v32, %v2472_v23  ;;  %v2439_v39 = vadd.f32 %v3096_v9, %v3020_v30 }
 0x241   : > { %v2473_v3 = vmax.f32 %v4283_v5, %v2431_v58  ;;  %v4395_v27 = vmax.f32 %v4192_v52, %v4233_v59  ;;  %v4397_v30 = vmax.f32 %v4195_v51, %v4246_v7  ;;  %v4400_v32 = vmax.f32 %v4204_v18, %v4279_v6 }
 0x242   : > { %2928 = vst [vmem:[%s4329_s7] sm:$0xff] %v2927_v53   ;;  %v2485_v4 = vmax.f32 %v4394_v36, %v2474_v20  ;;  %v2501_v44 = vadd.f32 %v4307_v1, %v2483_v15  ;;  %v2475_v28 = vmax.f32 %v4294_v54, %v2439_v39  ;;  %v3023_v42 = vpop.f32.mrb[128].mxu1 }
 0x243   : > { %v2484_v38 = vmax.f32 %v4395_v27, %v2473_v3  ;;  %v2234_v57 = vpop.f32.mrb[80].mxu0  ;;  %v2443_v49 = vpop.f32.mrb[129].mxu1 }
 0x244   : > { %v2503_v5 = vadd.f32 %v4307_v1, %v2485_v4  ;;  %v2512_v14 = vmax.f32 %v2501_v44, 0.0  ;;  %v2486_v16 = vmax.f32 %v4396_v41, %v2475_v28  ;;  %v3097_v17 = vadd.f32 %v2234_v57, %v4147_v12  ;;  %v2236_v11 = vpop.f32.mrb[81].mxu0  ;;  %v3024_v54 = vpop.f32.mrb[130].mxu1 }
 0x245   : > { %v2502_v31 = vadd.f32 %v4307_v1, %v2484_v38  ;;  %v2237_v43 = vpop.f32.mrb[82].mxu0  ;;  %v2446_v52 = vpop.f32.mrb[131].mxu1 }
 0x246   : > { %v2514_v59 = vmax.f32 %v2503_v5, 0.0  ;;  %v2932_v48 = vpack.c.bf16 %v2512_v14, %v2511_v37  ;;  %v3098_v26 = vadd.f32 %v2237_v43, %v4152_v24  ;;  %v2239_v61 = vpop.f32.mrb[83].mxu0  ;;  %v2444_v60 = vadd.f32 %v3097_v17, %v2443_v49 }
 0x247   : > { %v2513_v47 = vmax.f32 %v2502_v31, 0.0  ;;  %v2504_v56 = vadd.f32 %v4307_v1, %v2486_v16  ;;  %v4398_v24 = vmax.f32 %v4210_v45, %v4255_v34 }
 0x248   : > { %2949 = vst [vmem:[%s4329_s7 + $0x8] sm:$0xff] %v2932_v48   ;;  %v2447_v62 = vadd.f32 %v3098_v26, %v2446_v52  ;;  %v2476_v19 = vmax.f32 %v4299_v46, %v2444_v60 }
 0x249   : > { %v2937_v29 = vpack.c.bf16 %v2514_v59, %v2513_v47  ;;  %v2515_v8 = vmax.f32 %v2504_v56, 0.0 }
 0x24a   : > { %v2477_v12 = vmax.f32 %v4291_v2, %v2447_v62  ;;  %v2487_v33 = vmax.f32 %v4397_v30, %v2476_v19 }
 0x24b   : > { %2950 = vst [vmem:[%s4329_s7 + $0x10] sm:$0xff] %v2937_v29   ;;  %v2242_v55 = vpop.f32.mrb[84].mxu0 }
 0x24c   : > { %v2488_v25 = vmax.f32 %v4398_v24, %v2477_v12  ;;  %v3099_v63 = vadd.f32 %v2242_v55, %v4157_v35  ;;  %v2244_v13 = vpop.f32.mrb[85].mxu0  ;;  %v2505_v46 = vadd.f32 %v4307_v1, %v2487_v33  ;;  %v4399_v35 = vmax.f32 %v4219_v21, %v4272_v22 }
 0x24d   : > { %v2245_v23 = vpop.f32.mrb[86].mxu0 }
 0x24e   : > { %v2452_v2 = vadd.f32 %v3099_v63, %v3023_v42  ;;  %v3100_v9 = vadd.f32 %v2245_v23, %v4162_v10  ;;  %v2247_v50 = vpop.f32.mrb[87].mxu0  ;;  %v2516_v51 = vmax.f32 %v2505_v46, 0.0  ;;  %v2506_v34 = vadd.f32 %v4307_v1, %v2488_v25 }
 0x250   : > { %v2478_v7 = vmax.f32 %v4296_v0, %v2452_v2  ;;  %v2455_v58 = vadd.f32 %v3100_v9, %v3024_v54  ;;  %v2942_v45 = vpack.c.bf16 %v2516_v51, %v2515_v8  ;;  %v2517_v39 = vmax.f32 %v2506_v34, 0.0 }
 0x252   : > { %v2489_v53 = vmax.f32 %v4399_v35, %v2478_v7  ;;  %v2479_v20 = vmax.f32 %v4302_v40, %v2455_v58  ;;  %2951 = vst [vmem:[%s4329_s7 + $0x18] sm:$0xff] %v2942_v45  }
 0x254   : > { %v2507_v10 = vadd.f32 %v4307_v1, %v2489_v53  ;;  %v2490_v15 = vmax.f32 %v4400_v32, %v2479_v20 }
 0x256   : > { %v2518_v0 = vmax.f32 %v2507_v10, 0.0  ;;  %v2508_v3 = vadd.f32 %v4307_v1, %v2490_v15 }
 0x258   : > { %v2947_v36 = vpack.c.bf16 %v2518_v0, %v2517_v39  ;;  %v2519_v4 = vmax.f32 %v2508_v3, 0.0 }
 0x25a   : > { %2952 = vst [vmem:[%s4329_s7 + $0x20] sm:$0xff] %v2947_v36   ;;  %v2923_v44 = vpack.c.bf16 %v2519_v4, %v2519_v4 }
 0x25c   : > { %2575 = vst [vmem:[%s4329_s7 + $0x28] sm:$0xf] %v2923_v44 }
 0x25d PF: > { %s13_s14 = sadd.s32 1, %s3508_s14   ;;  %s4401_s12 = smov %s3504_s13 }
 0x25e   : > { %p10_p5 = scmp.ge.s32.totalorder %s13_s14, 4   ;;  %s4402_s13 = smov %s4404_s15 }
 0x260   :  { %12 = sbr.rel (!%p10_p5) target bundleno = 2 (0x2), region = 62 }

// kernel: net_forward.5
= control target key start
LH: loop header
LB: loop body
LE: loop exit
PB: predicated region body
PF: predicated region fallthrough
CT: control target
= control target key end

     0   :  { %vm1459_vm0 = vcmask 523264   ;;  %vm3499_vm1 = vcmask 15360   ;;  %s6130_s1 = inlined_call_operand.vmem [shape: bf16[1600,128], index: 1, kind: input, shape index: {}]   ;;  %s6131_s0 = inlined_call_operand.vmem [shape: bf16[1,128,1600], index: 0, kind: input, shape index: {}]   ;;  %s6132_s3 = inlined_call_operand.vmem [shape: bf16[512,512], index: 3, kind: input, shape index: {}]   ;;  %s6133_s5 = inlined_call_operand.vmem [shape: bf16[512,2], index: 5, kind: input, shape index: {}]   ;;  %s6134_s2 = inlined_call_operand.vmem [shape: f32[1,128], index: 2, kind: input, shape index: {}]   ;;  %s6135_s4 = inlined_call_operand.vmem [shape: f32[1,512], index: 4, kind: input, shape index: {}]   ;;  %s6136_s6 = inlined_call_operand.vmem [shape: f32[1,2], index: 6, kind: input, shape index: {}]   ;;  %s6137_s7 = inlined_call_operand.vmem [shape: f32[8,2], index: 7, kind: output, shape index: {}]  }
   0x1   :  { %v4366_v0 = vld [vmem:[%s6130_s1 + $0x40] sm:$0xff]   ;;  %v4370_v4 = vld [vmem:[%s6130_s1 + $0x48] sm:$0xff]   ;;  %v4374_v8 = vld [vmem:[%s6130_s1 + $0x50] sm:$0xff]  }
   0x2   :  { %v4367_v1 = vld [vmem:[%s6130_s1 + $0xc0] sm:$0xff]   ;;  %3890 = vmatprep.subr.bf16.mxu0 %v4366_v0  ;;  %v4371_v5 = vld [vmem:[%s6130_s1 + $0xc8] sm:$0xff]   ;;  %v4375_v9 = vld [vmem:[%s6130_s1 + $0xd0] sm:$0xff]  }
   0x3   :  { %v4368_v2 = vld [vmem:[%s6130_s1] sm:$0xff]   ;;  %3954 = vmatprep.subr.bf16.mxu1 %v4367_v1  ;;  %v4372_v6 = vld [vmem:[%s6130_s1 + $0x8] sm:$0xff]   ;;  %v4376_v10 = vld [vmem:[%s6130_s1 + $0x10] sm:$0xff]  }
   0x4   :  { %v4369_v3 = vld [vmem:[%s6130_s1 + $0x80] sm:$0xff]   ;;  %3891 = vmatpush3.bf16.msra.mxu0 %v4368_v2  ;;  %v4373_v7 = vld [vmem:[%s6130_s1 + $0x88] sm:$0xff]   ;;  %v4377_v11 = vld [vmem:[%s6130_s1 + $0x90] sm:$0xff]  }
   0x5   :  { %3955 = vmatpush3.bf16.msra.mxu1 %v4369_v3  ;;  %3892 = vmatprep.subr.bf16.mxu0 %v4370_v4  ;;  %v4378_v12 = vld [vmem:[%s6130_s1 + $0x58] sm:$0xff]   ;;  %v4382_v16 = vld [vmem:[%s6130_s1 + $0x60] sm:$0xff]   ;;  %v4386_v20 = vld [vmem:[%s6130_s1 + $0x68] sm:$0xff]  }
   0x6   :  { %3956 = vmatprep.subr.bf16.mxu1 %v4371_v5  ;;  %v4379_v13 = vld [vmem:[%s6130_s1 + $0xd8] sm:$0xff]   ;;  %v4383_v17 = vld [vmem:[%s6130_s1 + $0xe0] sm:$0xff]   ;;  %v4387_v21 = vld [vmem:[%s6130_s1 + $0xe8] sm:$0xff]  }
   0x7   :  { %v4380_v14 = vld [vmem:[%s6130_s1 + $0x18] sm:$0xff]   ;;  %v4384_v18 = vld [vmem:[%s6130_s1 + $0x20] sm:$0xff]   ;;  %v4388_v22 = vld [vmem:[%s6130_s1 + $0x28] sm:$0xff]  }
   0x8   :  { %3893 = vmatpush3.bf16.msra.mxu0 %v4372_v6  ;;  %v4381_v15 = vld [vmem:[%s6130_s1 + $0x98] sm:$0xff]   ;;  %v4385_v19 = vld [vmem:[%s6130_s1 + $0xa0] sm:$0xff]   ;;  %v4389_v23 = vld [vmem:[%s6130_s1 + $0xa8] sm:$0xff]  }
   0x9   :  { %3957 = vmatpush3.bf16.msra.mxu1 %v4373_v7  ;;  %3894 = vmatprep.subr.bf16.mxu0 %v4374_v8  ;;  %v4390_v24 = vld [vmem:[%s6130_s1 + $0x70] sm:$0xff]   ;;  %v4394_v28 = vld [vmem:[%s6130_s1 + $0x78] sm:$0xff]   ;;  %v4403_v35 = vld [vmem:[%s6131_s0 + $0xc] ss:$52 sps:$4 sm:$0xff]  }
   0xa   :  { %3958 = vmatprep.subr.bf16.mxu1 %v4375_v9  ;;  %v4391_v25 = vld [vmem:[%s6130_s1 + $0xf0] sm:$0xff]   ;;  %v4395_v29 = vld [vmem:[%s6130_s1 + $0xf8] sm:$0xff]   ;;  %v4404_v36 = vld [vmem:[%s6130_s1 + $0x140] sm:$0xff]   ;;  %1613 = vmatprep.mubr.bf16.mxu1 %v4403_v35 }
   0xb   :  { %v4392_v26 = vld [vmem:[%s6130_s1 + $0x30] sm:$0xff]   ;;  %v4396_v30 = vld [vmem:[%s6130_s1 + $0x38] sm:$0xff]   ;;  %v4405_v37 = vld [vmem:[%s6130_s1 + $0x100] sm:$0xff]  }
   0xc   :  { %3895 = vmatpush3.bf16.msra.mxu0 %v4376_v10  ;;  %v4393_v27 = vld [vmem:[%s6130_s1 + $0xb0] sm:$0xff]   ;;  %v4397_v31 = vld [vmem:[%s6130_s1 + $0xb8] sm:$0xff]   ;;  %v4406_v38 = vld [vmem:[%s6131_s0 + $0x6c] ss:$52 sps:$4 sm:$0xff]  }
   0xd   :  { %3959 = vmatpush3.bf16.msra.mxu1 %v4377_v11  ;;  %3896 = vmatprep.subr.bf16.mxu0 %v4378_v12  ;;  %v4398_v32 = vld [vmem:[%s6131_s0] ss:$52 sps:$4 sm:$0xff]   ;;  %v4400_v33 = vld [vmem:[%s6131_s0 + $0x4] ss:$52 sps:$4 sm:$0xff]   ;;  %v4401_v34 = vld [vmem:[%s6131_s0 + $0x8] ss:$52 sps:$4 sm:$0xff]  }
   0xe   :  { %3960 = vmatprep.subr.bf16.mxu1 %v4379_v13  ;;  %1516 = vmatprep.mubr.bf16.mxu0 %v4400_v33  ;;  %v4408_v39 = vld [vmem:[%s6131_s0 + $0x74] ss:$52 sps:$4 sm:$0xff]   ;;  %v4411_v41 = vld [vmem:[%s6131_s0 + $0x70] ss:$52 sps:$4 sm:$0xff]   ;;  %v4419_v49 = vld [vmem:[%s6131_s0 + $0xd8] ss:$52 sps:$4 sm:$0xff]  }
   0xf   :  { %v4410_v40 = vld [vmem:[%s6131_s0 + $0x68] ss:$52 sps:$4 sm:$0xff]   ;;  %v4420_v46 = vld [vmem:[%s6130_s1 + $0x150] sm:$0xff]   ;;  %v4424_v51 = vld [vmem:[%s6131_s0 + $0x144] ss:$52 sps:$4 sm:$0xff]  }
  0x10   :  { %3897 = vmatpush3.bf16.msra.mxu0 %v4380_v14  ;;  %v4412_v42 = vld [vmem:[%s6130_s1 + $0x148] sm:$0xff]   ;;  %v4416_v45 = vld [vmem:[%s6131_s0 + $0xdc] ss:$52 sps:$4 sm:$0xff]   ;;  %v4436_v55 = vld [vmem:[%s6130_s1 + $0x160] sm:$0xff]  }
  0x11   :  { %3961 = vmatpush3.bf16.msra.mxu1 %v4381_v15  ;;  %3898 = vmatprep.subr.bf16.mxu0 %v4382_v16  ;;  %v4413_v43 = vld [vmem:[%s6130_s1 + $0x108] sm:$0xff]   ;;  %v4421_v47 = vld [vmem:[%s6130_s1 + $0x110] sm:$0xff]   ;;  %v4428_v52 = vld [vmem:[%s6130_s1 + $0x158] sm:$0xff]  }
  0x12   :  { %3962 = vmatprep.subr.bf16.mxu1 %v4383_v17  ;;  %v4414_v44 = vld [vmem:[%s6131_s0 + $0xd4] ss:$52 sps:$4 sm:$0xff]   ;;  %v4418_v48 = vld [vmem:[%s6131_s0 + $0xd0] ss:$52 sps:$4 sm:$0xff]   ;;  %v4429_v53 = vld [vmem:[%s6130_s1 + $0x118] sm:$0xff]  }
  0x13   :  { %v4422_v50 = vld [vmem:[%s6131_s0 + $0x13c] ss:$52 sps:$4 sm:$0xff]   ;;  %v4426_v54 = vld [vmem:[%s6131_s0 + $0x138] ss:$52 sps:$4 sm:$0xff]   ;;  %v4427_v56 = vld [vmem:[%s6131_s0 + $0x140] ss:$52 sps:$4 sm:$0xff]  }
  0x14   :  { %3899 = vmatpush3.bf16.msra.mxu0 %v4384_v18  ;;  %v4430_v57 = vld [vmem:[%s6131_s0 + $0x1a4] ss:$52 sps:$4 sm:$0xff]   ;;  %v4432_v59 = vld [vmem:[%s6131_s0 + $0x1ac] ss:$52 sps:$4 sm:$0xff]   ;;  %v4435_v2 = vld [vmem:[%s6131_s0 + $0x1a8] ss:$52 sps:$4 sm:$0xff]  }
  0x15   :  { %3963 = vmatpush3.bf16.msra.mxu1 %v4385_v19  ;;  %3900 = vmatprep.subr.bf16.mxu0 %v4386_v20  ;;  %v4437_v58 = vld [vmem:[%s6130_s1 + $0x120] sm:$0xff]   ;;  %v4440_v62 = vld [vmem:[%s6130_s1 + $0x1c8] sm:$0xff]   ;;  %v4450_v6 = vld [vmem:[%s6130_s1 + $0x1d0] sm:$0xff]  }
  0x16   :  { %3964 = vmatprep.subr.bf16.mxu1 %v4387_v21  ;;  %v4438_v60 = vld [vmem:[%s6130_s1 + $0x1c0] sm:$0xff]   ;;  %v4445_v63 = vld [vmem:[%s6130_s1 + $0x188] sm:$0xff]   ;;  %v4451_v7 = vld [vmem:[%s6130_s1 + $0x190] sm:$0xff]  }
  0x17   :  { %v4439_v61 = vld [vmem:[%s6130_s1 + $0x180] sm:$0xff]   ;;  %v4448_v1 = vld [vmem:[%s6130_s1 + $0x168] sm:$0xff]   ;;  %v4452_v8 = vld [vmem:[%s6130_s1 + $0x1d8] sm:$0xff]  }
  0x18   :  { %3901 = vmatpush3.bf16.msra.mxu0 %v4388_v22  ;;  %v4434_v0 = vld [vmem:[%s6131_s0 + $0x1a0] ss:$52 sps:$4 sm:$0xff]   ;;  %v4449_v4 = vld [vmem:[%s6130_s1 + $0x128] sm:$0xff]   ;;  %v4457_v9 = vld [vmem:[%s6130_s1 + $0x198] sm:$0xff]  }
  0x19   :  { %3965 = vmatpush3.bf16.msra.mxu1 %v4389_v23  ;;  %3902 = vmatprep.subr.bf16.mxu0 %v4390_v24  ;;  %v4441_v3 = vld [vmem:[%s6131_s0 + $0x20c] ss:$52 sps:$4 sm:$0xff]   ;;  %v4443_v5 = vld [vmem:[%s6131_s0 + $0x214] ss:$52 sps:$4 sm:$0xff]   ;;  %v4447_v11 = vld [vmem:[%s6131_s0 + $0x210] ss:$52 sps:$4 sm:$0xff]  }
  0x1a   :  { %3966 = vmatprep.subr.bf16.mxu1 %v4391_v25  ;;  %v4446_v10 = vld [vmem:[%s6131_s0 + $0x208] ss:$52 sps:$4 sm:$0xff]   ;;  %v4460_v13 = vld [vmem:[%s6130_s1 + $0x170] sm:$0xff]   ;;  %v4462_v16 = vld [vmem:[%s6130_s1 + $0x1e0] sm:$0xff]  }
  0x1b   :  { %v4453_v12 = vld [vmem:[%s6131_s0 + $0x274] ss:$52 sps:$4 sm:$0xff]   ;;  %v4455_v14 = vld [vmem:[%s6131_s0 + $0x27c] ss:$52 sps:$4 sm:$0xff]   ;;  %v4463_v17 = vld [vmem:[%s6130_s1 + $0x1a0] sm:$0xff]  }
  0x1c   :  { %3903 = vmatpush3.bf16.msra.mxu0 %v4392_v26  ;;  %v4461_v15 = vld [vmem:[%s6130_s1 + $0x130] sm:$0xff]   ;;  %v4464_v18 = vld [vmem:[%s6130_s1 + $0x1e8] sm:$0xff]   ;;  %v4467_v23 = vld [vmem:[%s6131_s0 + $0x2e4] ss:$52 sps:$4 sm:$0xff]  }
  0x1d   :  { %3967 = vmatpush3.bf16.msra.mxu1 %v4393_v27  ;;  %3904 = vmatprep.subr.bf16.mxu0 %v4394_v28  ;;  %v4458_v19 = vld [vmem:[%s6131_s0 + $0x270] ss:$52 sps:$4 sm:$0xff]   ;;  %v4469_v20 = vld [vmem:[%s6130_s1 + $0x1a8] sm:$0xff]   ;;  %v4472_v24 = vld [vmem:[%s6130_s1 + $0x178] sm:$0xff]  }
  0x1e   :  { %3968 = vmatprep.subr.bf16.mxu1 %v4395_v29  ;;  %v4459_v21 = vld [vmem:[%s6131_s0 + $0x278] ss:$52 sps:$4 sm:$0xff]   ;;  %v4465_v22 = vld [vmem:[%s6131_s0 + $0x2dc] ss:$52 sps:$4 sm:$0xff]   ;;  %v4479_v33 = vld [vmem:[%s6131_s0 + $0x14] ss:$52 sps:$4 sm:$0xff]  }
  0x1f   :  { %v4473_v25 = vld [vmem:[%s6130_s1 + $0x138] sm:$0xff]   ;;  %v4474_v26 = vld [vmem:[%s6130_s1 + $0x1f0] sm:$0xff]  }
  0x20   :  { %3905 = vmatpush3.bf16.msra.mxu0 %v4396_v30  ;;  %v4475_v27 = vld [vmem:[%s6130_s1 + $0x1b0] sm:$0xff]   ;;  %v4476_v28 = vld [vmem:[%s6130_s1 + $0x1f8] sm:$0xff]   ;;  %v4481_v30 = vld [vmem:[%s6130_s1 + $0x240] sm:$0xff]  }
  0x21   :  { %3969 = vmatpush3.bf16.msra.mxu1 %v4397_v31  ;;  %4018 = vmatprep.subr.bf16.mxu0 %v4404_v36  ;;  %v4480_v29 = vld [vmem:[%s6130_s1 + $0x1b8] sm:$0xff]   ;;  %v4477_v35 = vld [vmem:[%s6131_s0 + $0x10] ss:$52 sps:$4 sm:$0xff]  }
  0x22   :  { %4082 = vmatprep.subr.bf16.mxu1 %v4438_v60  ;;  %v4470_v31 = vld [vmem:[%s6131_s0 + $0x2d8] ss:$52 sps:$4 sm:$0xff]  }
  0x23   :  { %1517 = vmatmul.mubr.bf16.vlgmr.msra.gmra.mrb[0].mxu0 %v4398_v32  ;;  %v4471_v32 = vld [vmem:[%s6131_s0 + $0x2e0] ss:$52 sps:$4 sm:$0xff]   ;;  %v4482_v36 = vld [vmem:[%s6131_s0 + $0x18] ss:$52 sps:$4 sm:$0xff]  }
  0x24   :  { %1614 = vmatmul.mubr.bf16.vlgmr.msra.gmra.mrb[0].mxu1 %v4401_v34  ;;  %4019 = vmatpush3.bf16.msra.mxu0 %v4405_v37  ;;  %v4484_v34 = vld [vmem:[%s6131_s0 + $0x1c] ss:$52 sps:$4 sm:$0xff]   ;;  %v4485_v37 = vld [vmem:[%s6130_s1 + $0x200] sm:$0xff]   ;;  %v4525_v60 = vld [vmem:[%s6130_s1 + $0x268] sm:$0xff]  }
  0x25   :  { %1524 = vmatprep.mubr.bf16.mxu0 %v4406_v38  ;;  %1621 = vmatprep.mubr.bf16.mxu1 %v4408_v39  ;;  %v4486_v38 = vld [vmem:[%s6131_s0 + $0x7c] ss:$52 sps:$4 sm:$0xff]   ;;  %v4489_v39 = vld [vmem:[%s6130_s1 + $0x248] sm:$0xff]  }
  0x26   :  { %4020 = vmatprep.subr.bf16.mxu0 %v4412_v42  ;;  %4083 = vmatpush3.bf16.msra.mxu1 %v4439_v61  ;;  %v4497_v42 = vld [vmem:[%s6130_s1 + $0x250] sm:$0xff]   ;;  %v4528_v61 = vld [vmem:[%s6130_s1 + $0x228] sm:$0xff]  }
  0x27   :  { %4084 = vmatprep.subr.bf16.mxu1 %v4440_v62  ;;  %v4504_v62 = vld [vmem:[%s6131_s0 + $0x148] ss:$52 sps:$4 sm:$0xff]  }
  0x28   :  { %4021 = vmatpush3.bf16.msra.mxu0 %v4413_v43  ;;  %v4488_v43 = vld [vmem:[%s6131_s0 + $0x78] ss:$52 sps:$4 sm:$0xff]  }
  0x29   :  { %4022 = vmatprep.subr.bf16.mxu0 %v4420_v46  ;;  %v4498_v46 = vld [vmem:[%s6131_s0 + $0xec] ss:$52 sps:$4 sm:$0xff]  }
  0x2a   :  { %4085 = vmatpush3.bf16.msra.mxu1 %v4445_v63  ;;  %v4530_v63 = vld [vmem:[%s6130_s1 + $0x2d0] sm:$0xff]  }
  0x2b   :  { %1525 = vmatmul.mubr.bf16.gmra.mrb[4].mxu0 %v4410_v40  ;;  %4086 = vmatprep.subr.bf16.mxu1 %v4450_v6  ;;  %v4490_v40 = vld [vmem:[%s6131_s0 + $0x84] ss:$52 sps:$4 sm:$0xff]   ;;  %v4537_v6 = vld [vmem:[%s6130_s1 + $0x270] sm:$0xff]  }
  0x2c   :  { %1622 = vmatmul.mubr.bf16.gmra.mrb[4].mxu1 %v4411_v41  ;;  %1532 = vmatprep.mubr.bf16.mxu0 %v4414_v44  ;;  %v4492_v41 = vld [vmem:[%s6130_s1 + $0x208] sm:$0xff]   ;;  %v4493_v44 = vld [vmem:[%s6131_s0 + $0x80] ss:$52 sps:$4 sm:$0xff]  }
  0x2d   :  { %1629 = vmatprep.mubr.bf16.mxu1 %v4416_v45  ;;  %4023 = vmatpush3.bf16.msra.mxu0 %v4421_v47  ;;  %v4494_v45 = vld [vmem:[%s6131_s0 + $0xe4] ss:$52 sps:$4 sm:$0xff]   ;;  %v4500_v47 = vld [vmem:[%s6130_s1 + $0x210] sm:$0xff]  }
  0x2e   :  { %4024 = vmatprep.subr.bf16.mxu0 %v4428_v52  ;;  %4087 = vmatpush3.bf16.msra.mxu1 %v4451_v7  ;;  %v4496_v52 = vld [vmem:[%s6131_s0 + $0xe0] ss:$52 sps:$4 sm:$0xff]  }
  0x2f   :  { %4088 = vmatprep.subr.bf16.mxu1 %v4452_v8  ;;  %v4540_v7 = vld [vmem:[%s6130_s1 + $0x230] sm:$0xff]  }
  0x30   :  { %v4512_v8 = vld [vmem:[%s6131_s0 + $0x1b0] ss:$52 sps:$4 sm:$0xff]  }
  0x31   :  { %4025 = vmatpush3.bf16.msra.mxu0 %v4429_v53  ;;  %v4519_v53 = vld [vmem:[%s6130_s1 + $0x280] sm:$0xff]  }
  0x32   :  { %4026 = vmatprep.subr.bf16.mxu0 %v4436_v55  ;;  %4089 = vmatpush3.bf16.msra.mxu1 %v4457_v9  ;;  %v4520_v55 = vld [vmem:[%s6130_s1 + $0x2c8] sm:$0xff]   ;;  %v4542_v9 = vld [vmem:[%s6130_s1 + $0x2e0] sm:$0xff]  }
  0x33   :  { %1533 = vmatmul.mubr.bf16.gmra.mrb[8].mxu0 %v4418_v48  ;;  %4090 = vmatprep.subr.bf16.mxu1 %v4462_v16  ;;  %v4505_v48 = vld [vmem:[%s6130_s1 + $0x258] sm:$0xff]  }
  0x34   :  { %1630 = vmatmul.mubr.bf16.gmra.mrb[8].mxu1 %v4419_v49  ;;  %1540 = vmatprep.mubr.bf16.mxu0 %v4422_v50  ;;  %v4508_v49 = vld [vmem:[%s6130_s1 + $0x218] sm:$0xff]   ;;  %v4513_v50 = vld [vmem:[%s6130_s1 + $0x260] sm:$0xff]  }
  0x35   :  { %1637 = vmatprep.mubr.bf16.mxu1 %v4424_v51  ;;  %4027 = vmatpush3.bf16.msra.mxu0 %v4437_v58  ;;  %v4518_v51 = vld [vmem:[%s6130_s1 + $0x2c0] sm:$0xff]   ;;  %v4523_v58 = vld [vmem:[%s6130_s1 + $0x288] sm:$0xff]   ;;  %v4549_v16 = vld [vmem:[%s6130_s1 + $0x278] sm:$0xff]  }
  0x36   :  { %4028 = vmatprep.subr.bf16.mxu0 %v4448_v1  ;;  %4091 = vmatpush3.bf16.msra.mxu1 %v4463_v17  ;;  %v4531_v1 = vld [vmem:[%s6130_s1 + $0x290] sm:$0xff]   ;;  %v4524_v17 = vld [vmem:[%s6131_s0 + $0x218] ss:$52 sps:$4 sm:$0xff]  }
  0x37   :  { %4092 = vmatprep.subr.bf16.mxu1 %v4464_v18  ;;  %v4552_v18 = vld [vmem:[%s6130_s1 + $0x238] sm:$0xff]  }
  0x39   :  { %4029 = vmatpush3.bf16.msra.mxu0 %v4449_v4  ;;  %v4514_v4 = vld [vmem:[%s6131_s0 + $0x1bc] ss:$52 sps:$4 sm:$0xff]  }
  0x3a   :  { %4030 = vmatprep.subr.bf16.mxu0 %v4460_v13  ;;  %4093 = vmatpush3.bf16.msra.mxu1 %v4469_v20  ;;  %v4544_v13 = vld [vmem:[%s6130_s1 + $0x2e8] sm:$0xff]   ;;  %v4533_v20 = vld [vmem:[%s6131_s0 + $0x284] ss:$52 sps:$4 sm:$0xff]  }
  0x3b   :  { %1541 = vmatmul.mubr.bf16.gmra.mrb[12].mxu0 %v4426_v54  ;;  %4094 = vmatprep.subr.bf16.mxu1 %v4474_v26  ;;  %v4501_v54 = vld [vmem:[%s6131_s0 + $0xe8] ss:$52 sps:$4 sm:$0xff]   ;;  %v4561_v26 = vld [vmem:[%s6130_s1 + $0x300] sm:$0xff]  }
  0x3c   :  { %1638 = vmatmul.mubr.bf16.gmra.mrb[12].mxu1 %v4427_v56  ;;  %1548 = vmatprep.mubr.bf16.mxu0 %v4430_v57  ;;  %v4502_v56 = vld [vmem:[%s6131_s0 + $0x14c] ss:$52 sps:$4 sm:$0xff]   ;;  %v4506_v57 = vld [vmem:[%s6131_s0 + $0x154] ss:$52 sps:$4 sm:$0xff]  }
  0x3d   :  { %1645 = vmatprep.mubr.bf16.mxu1 %v4432_v59  ;;  %4031 = vmatpush3.bf16.msra.mxu0 %v4461_v15  ;;  %v4516_v59 = vld [vmem:[%s6130_s1 + $0x220] sm:$0xff]   ;;  %v4547_v15 = vld [vmem:[%s6130_s1 + $0x2a8] sm:$0xff]  }
  0x3e   :  { %4032 = vmatprep.subr.bf16.mxu0 %v4472_v24  ;;  %4095 = vmatpush3.bf16.msra.mxu1 %v4475_v27  ;;  %v4538_v24 = vld [vmem:[%s6131_s0 + $0x28c] ss:$52 sps:$4 sm:$0xff]  }
  0x3f   :  { %4096 = vmatprep.subr.bf16.mxu1 %v4476_v28  ;;  %v4536_v27 = vld [vmem:[%s6131_s0 + $0x280] ss:$52 sps:$4 sm:$0xff]   ;;  %v4541_v28 = vld [vmem:[%s6131_s0 + $0x288] ss:$52 sps:$4 sm:$0xff]  }
  0x41   :  { %4033 = vmatpush3.bf16.msra.mxu0 %v4473_v25  ;;  %v4560_v25 = vld [vmem:[%s6130_s1 + $0x2b8] sm:$0xff]  }
  0x42   :  { %4146 = vmatprep.subr.bf16.mxu0 %v4481_v30  ;;  %4097 = vmatpush3.bf16.msra.mxu1 %v4480_v29  ;;  %v4545_v29 = vld [vmem:[%s6131_s0 + $0x2ec] ss:$52 sps:$4 sm:$0xff]   ;;  %v4550_v30 = vld [vmem:[%s6131_s0 + $0x2f4] ss:$52 sps:$4 sm:$0xff]  }
  0x43   :  { %1549 = vmatmul.mubr.bf16.gmra.mrb[16].mxu0 %v4434_v0  ;;  %4210 = vmatprep.subr.bf16.mxu1 %v4518_v51  ;;  %v4509_v0 = vld [vmem:[%s6131_s0 + $0x150] ss:$52 sps:$4 sm:$0xff]   ;;  %v4583_v51 = vld [vmem:[%s6131_s0 + $0x160] ss:$52 sps:$4 sm:$0xff]  }
  0x44   :  { %1646 = vmatmul.mubr.bf16.gmra.mrb[16].mxu1 %v4435_v2  ;;  %1556 = vmatprep.mubr.bf16.mxu0 %v4441_v3  ;;  %v4532_v2 = vld [vmem:[%s6130_s1 + $0x2d8] sm:$0xff]   ;;  %v4510_v3 = vld [vmem:[%s6131_s0 + $0x1b4] ss:$52 sps:$4 sm:$0xff]  }
  0x45   :  { %1653 = vmatprep.mubr.bf16.mxu1 %v4443_v5  ;;  %v4535_v5 = vld [vmem:[%s6130_s1 + $0x298] sm:$0xff]  }
  0x4b   :  { %1557 = vmatmul.mubr.bf16.gmra.mrb[20].mxu0 %v4446_v10  ;;  %v4517_v10 = vld [vmem:[%s6131_s0 + $0x1b8] ss:$52 sps:$4 sm:$0xff]  }
  0x4c   :  { %1654 = vmatmul.mubr.bf16.gmra.mrb[20].mxu1 %v4447_v11  ;;  %1564 = vmatprep.mubr.bf16.mxu0 %v4453_v12  ;;  %v4521_v11 = vld [vmem:[%s6131_s0 + $0x21c] ss:$52 sps:$4 sm:$0xff]   ;;  %v4543_v12 = vld [vmem:[%s6130_s1 + $0x2a0] sm:$0xff]  }
  0x4d   :  { %1661 = vmatprep.mubr.bf16.mxu1 %v4455_v14  ;;  %v4526_v14 = vld [vmem:[%s6131_s0 + $0x224] ss:$52 sps:$4 sm:$0xff]  }
  0x53   :  { %1565 = vmatmul.mubr.bf16.gmra.mrb[24].mxu0 %v4458_v19  ;;  %v4529_v19 = vld [vmem:[%s6131_s0 + $0x220] ss:$52 sps:$4 sm:$0xff]  }
  0x54   :  { %1662 = vmatmul.mubr.bf16.gmra.mrb[24].mxu1 %v4459_v21  ;;  %1572 = vmatprep.mubr.bf16.mxu0 %v4465_v22  ;;  %v4554_v21 = vld [vmem:[%s6130_s1 + $0x2f0] sm:$0xff]  }
  0x55   :  { %1669 = vmatprep.mubr.bf16.mxu1 %v4467_v23  ;;  %v4555_v22 = vld [vmem:[%s6130_s1 + $0x2b0] sm:$0xff]   ;;  %v4556_v23 = vld [vmem:[%s6130_s1 + $0x2f8] sm:$0xff]  }
  0x5b   :  { %1573 = vmatmul.mubr.bf16.gmra.mrb[28].mxu0 %v4470_v31  ;;  %v4548_v31 = vld [vmem:[%s6131_s0 + $0x2e8] ss:$52 sps:$4 sm:$0xff]  }
  0x5c   :  { %1670 = vmatmul.mubr.bf16.gmra.mrb[28].mxu1 %v4471_v32  ;;  %1710 = vmatprep.mubr.bf16.mxu0 %v4479_v33  ;;  %v4553_v32 = vld [vmem:[%s6131_s0 + $0x2f0] ss:$52 sps:$4 sm:$0xff]  }
  0x5d   :  { %1807 = vmatprep.mubr.bf16.mxu1 %v4484_v34  ;;  %v4559_v33 = vld [vmem:[%s6131_s0 + $0x24] ss:$52 sps:$4 sm:$0xff]   ;;  %v4564_v34 = vld [vmem:[%s6131_s0 + $0x2c] ss:$52 sps:$4 sm:$0xff]  }
  0x63   :  { %1711 = vmatmul.mubr.bf16.vlgmr.msra.gmra.mrb[32].mxu0 %v4477_v35  ;;  %v4557_v35 = vld [vmem:[%s6131_s0 + $0x20] ss:$52 sps:$4 sm:$0xff]  }
  0x64   :  { %4147 = vmatpush3.bf16.msra.mxu0 %v4485_v37  ;;  %1808 = vmatmul.mubr.bf16.vlgmr.msra.gmra.mrb[32].mxu1 %v4482_v36  ;;  %v4562_v36 = vld [vmem:[%s6131_s0 + $0x28] ss:$52 sps:$4 sm:$0xff]   ;;  %v4565_v37 = vld [vmem:[%s6131_s0 + $0x8c] ss:$52 sps:$4 sm:$0xff]  }
  0x65   :  { %1718 = vmatprep.mubr.bf16.mxu0 %v4486_v38  ;;  %4148 = vmatprep.subr.bf16.mxu0 %v4489_v39  ;;  %v4568_v38 = vld [vmem:[%s6131_s0 + $0x94] ss:$52 sps:$4 sm:$0xff]  }
  0x66   :  { %1815 = vmatprep.mubr.bf16.mxu1 %v4490_v40  ;;  %4211 = vmatpush3.bf16.msra.mxu1 %v4519_v53  ;;  %v4574_v39 = vld [vmem:[%s6130_s1 + $0x308] sm:$0xff]   ;;  %v4587_v40 = vld [vmem:[%s6130_s1 + $0x310] sm:$0xff]  }
  0x67   :  { %4212 = vmatprep.subr.bf16.mxu1 %v4520_v55  ;;  %v4588_v53 = vld [vmem:[%s6131_s0 + $0x1cc] ss:$52 sps:$4 sm:$0xff]   ;;  %v4590_v55 = vld [vmem:[%s6131_s0 + $0x1c8] ss:$52 sps:$4 sm:$0xff]  }
  0x68   :  { %4149 = vmatpush3.bf16.msra.mxu0 %v4492_v41  ;;  %v4567_v41 = vld [vmem:[%s6131_s0 + $0x88] ss:$52 sps:$4 sm:$0xff]  }
  0x69   :  { %4150 = vmatprep.subr.bf16.mxu0 %v4497_v42  ;;  %v4570_v42 = vld [vmem:[%s6131_s0 + $0x90] ss:$52 sps:$4 sm:$0xff]  }
  0x6a   :  { %4213 = vmatpush3.bf16.msra.mxu1 %v4523_v58  ;;  %v4593_v58 = vld [vmem:[%s6131_s0 + $0x228] ss:$52 sps:$4 sm:$0xff]  }
  0x6b   :  { %1719 = vmatmul.mubr.bf16.gmra.mrb[36].mxu0 %v4488_v43  ;;  %4214 = vmatprep.subr.bf16.mxu1 %v4530_v63  ;;  %v4571_v43 = vld [vmem:[%s6131_s0 + $0xf4] ss:$52 sps:$4 sm:$0xff]   ;;  %v4603_v63 = vld [vmem:[%s6131_s0 + $0x298] ss:$52 sps:$4 sm:$0xff]  }
  0x6c   :  { %1816 = vmatmul.mubr.bf16.gmra.mrb[36].mxu1 %v4493_v44  ;;  %1726 = vmatprep.mubr.bf16.mxu0 %v4494_v45  ;;  %v4575_v44 = vld [vmem:[%s6131_s0 + $0xfc] ss:$52 sps:$4 sm:$0xff]  }
  0x6d   :  { %1823 = vmatprep.mubr.bf16.mxu1 %v4498_v46  ;;  %4151 = vmatpush3.bf16.msra.mxu0 %v4500_v47  ;;  %v4600_v45 = vld [vmem:[%s6130_s1 + $0x318] sm:$0xff]   ;;  %v4573_v46 = vld [vmem:[%s6131_s0 + $0xf0] ss:$52 sps:$4 sm:$0xff]  }
  0x6e   :  { %4152 = vmatprep.subr.bf16.mxu0 %v4505_v48  ;;  %4215 = vmatpush3.bf16.msra.mxu1 %v4531_v1  ;;  %v4577_v47 = vld [vmem:[%s6131_s0 + $0xf8] ss:$52 sps:$4 sm:$0xff]   ;;  %v4578_v48 = vld [vmem:[%s6131_s0 + $0x15c] ss:$52 sps:$4 sm:$0xff]  }
  0x6f   :  { %4216 = vmatprep.subr.bf16.mxu1 %v4532_v2  ;;  %v4607_v1 = vld [vmem:[%s6131_s0 + $0x304] ss:$52 sps:$4 sm:$0xff]  }
  0x70   :  { %v4606_v2 = vld [vmem:[%s6131_s0 + $0x2f8] ss:$52 sps:$4 sm:$0xff]  }
  0x71   :  { %4153 = vmatpush3.bf16.msra.mxu0 %v4508_v49  ;;  %v4581_v49 = vld [vmem:[%s6131_s0 + $0x164] ss:$52 sps:$4 sm:$0xff]  }
  0x72   :  { %4154 = vmatprep.subr.bf16.mxu0 %v4513_v50  ;;  %4217 = vmatpush3.bf16.msra.mxu1 %v4535_v5  ;;  %v4580_v50 = vld [vmem:[%s6131_s0 + $0x158] ss:$52 sps:$4 sm:$0xff]  }
  0x73   :  { %1727 = vmatmul.mubr.bf16.gmra.mrb[40].mxu0 %v4496_v52  ;;  %4218 = vmatprep.subr.bf16.mxu1 %v4542_v9  ;;  %v4584_v52 = vld [vmem:[%s6131_s0 + $0x1c4] ss:$52 sps:$4 sm:$0xff]  }
  0x74   :  { %1824 = vmatmul.mubr.bf16.gmra.mrb[40].mxu1 %v4501_v54  ;;  %1734 = vmatprep.mubr.bf16.mxu0 %v4502_v56  ;;  %v4586_v54 = vld [vmem:[%s6131_s0 + $0x1c0] ss:$52 sps:$4 sm:$0xff]   ;;  %v4611_v5 = vld [vmem:[%s6131_s0 + $0x98] ss:$52 sps:$4 sm:$0xff]  }
  0x75   :  { %1831 = vmatprep.mubr.bf16.mxu1 %v4506_v57  ;;  %4155 = vmatpush3.bf16.msra.mxu0 %v4516_v59  ;;  %v4591_v56 = vld [vmem:[%s6131_s0 + $0x22c] ss:$52 sps:$4 sm:$0xff]   ;;  %v4594_v57 = vld [vmem:[%s6131_s0 + $0x234] ss:$52 sps:$4 sm:$0xff]   ;;  %v4596_v59 = vld [vmem:[%s6131_s0 + $0x230] ss:$52 sps:$4 sm:$0xff]  }
  0x76   :  { %4156 = vmatprep.subr.bf16.mxu0 %v4525_v60  ;;  %4219 = vmatpush3.bf16.msra.mxu1 %v4543_v12  ;;  %v4597_v60 = vld [vmem:[%s6131_s0 + $0x294] ss:$52 sps:$4 sm:$0xff]   ;;  %v4615_v9 = vld [vmem:[%s6131_s0 + $0x238] ss:$52 sps:$4 sm:$0xff]  }
  0x77   :  { %4220 = vmatprep.subr.bf16.mxu1 %v4544_v13 }
  0x79   :  { %4157 = vmatpush3.bf16.msra.mxu0 %v4528_v61  ;;  %v4601_v61 = vld [vmem:[%s6131_s0 + $0x29c] ss:$52 sps:$4 sm:$0xff]  }
  0x7a   :  { %4158 = vmatprep.subr.bf16.mxu0 %v4537_v6  ;;  %4221 = vmatpush3.bf16.msra.mxu1 %v4547_v15  ;;  %v4612_v6 = vld [vmem:[%s6131_s0 + $0x100] ss:$52 sps:$4 sm:$0xff]  }
  0x7b   :  { %1735 = vmatmul.mubr.bf16.gmra.mrb[44].mxu0 %v4504_v62  ;;  %4222 = vmatprep.subr.bf16.mxu1 %v4554_v21  ;;  %v4599_v62 = vld [vmem:[%s6131_s0 + $0x290] ss:$52 sps:$4 sm:$0xff]  }
  0x7c   :  { %1832 = vmatmul.mubr.bf16.gmra.mrb[44].mxu1 %v4509_v0  ;;  %1742 = vmatprep.mubr.bf16.mxu0 %v4510_v3  ;;  %v4604_v0 = vld [vmem:[%s6131_s0 + $0x2fc] ss:$52 sps:$4 sm:$0xff]   ;;  %v4609_v3 = vld [vmem:[%s6131_s0 + $0x300] ss:$52 sps:$4 sm:$0xff]  }
  0x7d   :  { %1839 = vmatprep.mubr.bf16.mxu1 %v4514_v4  ;;  %4159 = vmatpush3.bf16.msra.mxu0 %v4540_v7  ;;  %v4610_v4 = vld [vmem:[%s6131_s0 + $0x30] ss:$52 sps:$4 sm:$0xff]   ;;  %v4613_v7 = vld [vmem:[%s6131_s0 + $0x168] ss:$52 sps:$4 sm:$0xff]  }
  0x7e   :  { %4160 = vmatprep.subr.bf16.mxu0 %v4549_v16  ;;  %4223 = vmatpush3.bf16.msra.mxu1 %v4555_v22 }
  0x7f   :  { %4224 = vmatprep.subr.bf16.mxu1 %v4556_v23 }
  0x81   :  { %4161 = vmatpush3.bf16.msra.mxu0 %v4552_v18 }
  0x82   :  { %4225 = vmatpush3.bf16.msra.mxu1 %v4560_v25  ;;  %4330 = vmatprep.subr.bf16.mxu0 %v4561_v26 }
  0x83   :  { %1743 = vmatmul.mubr.bf16.gmra.mrb[48].mxu0 %v4512_v8  ;;  %v4614_v8 = vld [vmem:[%s6131_s0 + $0x1d0] ss:$52 sps:$4 sm:$0xff]  }
  0x84   :  { %1840 = vmatmul.mubr.bf16.gmra.mrb[48].mxu1 %v4517_v10  ;;  %1750 = vmatprep.mubr.bf16.mxu0 %v4521_v11  ;;  %v4616_v10 = vld [vmem:[%s6131_s0 + $0x2a0] ss:$52 sps:$4 sm:$0xff]  }
  0x85   :  { %1847 = vmatprep.mubr.bf16.mxu1 %v4526_v14  ;;  %v4617_v14 = vld [vmem:[%s6131_s0 + $0x308] ss:$52 sps:$4 sm:$0xff]  }
  0x8b   :  { %1751 = vmatmul.mubr.bf16.gmra.mrb[52].mxu0 %v4524_v17 }
  0x8c   :  { %1848 = vmatmul.mubr.bf16.gmra.mrb[52].mxu1 %v4529_v19  ;;  %1758 = vmatprep.mubr.bf16.mxu0 %v4533_v20 }
  0x8d   :  { %1855 = vmatprep.mubr.bf16.mxu1 %v4538_v24 }
  0x93   :  { %1759 = vmatmul.mubr.bf16.gmra.mrb[56].mxu0 %v4536_v27 }
  0x94   :  { %1856 = vmatmul.mubr.bf16.gmra.mrb[56].mxu1 %v4541_v28  ;;  %1766 = vmatprep.mubr.bf16.mxu0 %v4545_v29 }
  0x95   :  { %1863 = vmatprep.mubr.bf16.mxu1 %v4550_v30 }
  0x9b   :  { %1767 = vmatmul.mubr.bf16.gmra.mrb[60].mxu0 %v4548_v31 }
  0x9c   :  { %1864 = vmatmul.mubr.bf16.gmra.mrb[60].mxu1 %v4553_v32  ;;  %1904 = vmatprep.mubr.bf16.mxu0 %v4559_v33 }
  0x9d   :  { %2001 = vmatprep.mubr.bf16.mxu1 %v4564_v34 }
  0xa3   :  { %1905 = vmatmul.mubr.bf16.vlgmr.msra.gmra.mrb[64].mxu0 %v4557_v35 }
  0xa4   :  { %4331 = vmatpush3.bf16.msra.mxu0 %v4561_v26  ;;  %2002 = vmatmul.mubr.bf16.vlgmr.msra.gmra.mrb[64].mxu1 %v4562_v36 }
  0xa5   :  { %1912 = vmatprep.mubr.bf16.mxu0 %v4565_v37  ;;  %2009 = vmatprep.mubr.bf16.mxu1 %v4568_v38 }
  0xa6   :  { %4332 = vmatprep.subr.bf16.mxu0 %v4574_v39 }
  0xa8   :  { %4333 = vmatpush3.bf16.msra.mxu0 %v4574_v39 }
  0xa9   :  { %4334 = vmatprep.subr.bf16.mxu0 %v4587_v40 }
  0xab   :  { %1913 = vmatmul.mubr.bf16.gmra.mrb[68].mxu0 %v4567_v41 }
  0xac   :  { %2010 = vmatmul.mubr.bf16.gmra.mrb[68].mxu1 %v4570_v42  ;;  %1920 = vmatprep.mubr.bf16.mxu0 %v4571_v43 }
  0xad   :  { %2017 = vmatprep.mubr.bf16.mxu1 %v4575_v44  ;;  %4335 = vmatpush3.bf16.msra.mxu0 %v4587_v40 }
  0xae   :  { %4336 = vmatprep.subr.bf16.mxu0 %v4600_v45 }
  0xb1   :  { %4337 = vmatpush3.bf16.msra.mxu0 %v4600_v45 }
  0xb3   :  { %1921 = vmatmul.mubr.bf16.gmra.mrb[72].mxu0 %v4573_v46 }
  0xb4   :  { %2018 = vmatmul.mubr.bf16.gmra.mrb[72].mxu1 %v4577_v47  ;;  %1928 = vmatprep.mubr.bf16.mxu0 %v4578_v48 }
  0xb5   :  { %2025 = vmatprep.mubr.bf16.mxu1 %v4581_v49 }
  0xbb   :  { %1929 = vmatmul.mubr.bf16.gmra.mrb[76].mxu0 %v4580_v50 }
  0xbc   :  { %2026 = vmatmul.mubr.bf16.gmra.mrb[76].mxu1 %v4583_v51  ;;  %1936 = vmatprep.mubr.bf16.mxu0 %v4584_v52 }
  0xbd   :  { %2033 = vmatprep.mubr.bf16.mxu1 %v4588_v53 }
  0xc3   :  { %1937 = vmatmul.mubr.bf16.gmra.mrb[80].mxu0 %v4586_v54 }
  0xc4   :  { %2034 = vmatmul.mubr.bf16.gmra.mrb[80].mxu1 %v4590_v55  ;;  %1944 = vmatprep.mubr.bf16.mxu0 %v4591_v56 }
  0xc5   :  { %2041 = vmatprep.mubr.bf16.mxu1 %v4594_v57 }
  0xcb   :  { %1945 = vmatmul.mubr.bf16.gmra.mrb[84].mxu0 %v4593_v58 }
  0xcc   :  { %2042 = vmatmul.mubr.bf16.gmra.mrb[84].mxu1 %v4596_v59  ;;  %1952 = vmatprep.mubr.bf16.mxu0 %v4597_v60 }
  0xcd   :  { %2049 = vmatprep.mubr.bf16.mxu1 %v4601_v61 }
  0xd3   :  { %1953 = vmatmul.mubr.bf16.gmra.mrb[88].mxu0 %v4599_v62 }
  0xd4   :  { %2050 = vmatmul.mubr.bf16.gmra.mrb[88].mxu1 %v4603_v63  ;;  %1960 = vmatprep.mubr.bf16.mxu0 %v4604_v0 }
  0xd5   :  { %2057 = vmatprep.mubr.bf16.mxu1 %v4607_v1 }
  0xdb   :  { %1961 = vmatmul.mubr.bf16.gmra.mrb[92].mxu0 %v4606_v2 }
  0xdc   :  { %2058 = vmatmul.mubr.bf16.gmra.mrb[92].mxu1 %v4609_v3  ;;  %4338 = vmatprep.mubr.msk.bf16.mxu0 %vm1459_vm0, %v4610_v4 }
  0xe3   :  { %4339 = vmatmul.mubr.msk.bf16.vlgmr.msra.gmra.mrb[96].mxu0 %vm1459_vm0, %v4611_v5 }
  0xe4   :  { %4342 = vmatprep.mubr.msk.bf16.mxu0 %vm1459_vm0, %v4612_v6 }
  0xeb   :  { %4343 = vmatmul.mubr.msk.bf16.gmra.mrb[100].mxu0 %vm1459_vm0, %v4613_v7 }
  0xec   :  { %4346 = vmatprep.mubr.msk.bf16.mxu0 %vm1459_vm0, %v4614_v8 }
  0xf3   :  { %4347 = vmatmul.mubr.msk.bf16.gmra.mrb[104].mxu0 %vm1459_vm0, %v4615_v9 }
  0xf4   :  { %4350 = vmatprep.mubr.msk.bf16.mxu0 %vm1459_vm0, %v4616_v10 }
  0xf6   :  { %v3906_v11 = vpop.f32.mrb[0].mxu0 }
  0xf7   :  { %v3970_v12 = vpop.f32.mrb[0].mxu1  ;;  %v3907_v13 = vpop.f32.mrb[1].mxu0 }
  0xf8   :  { %v3908_v15 = vadd.f32 %v3907_v13, %v3906_v11  ;;  %v3971_v16 = vpop.f32.mrb[1].mxu1  ;;  %v3909_v17 = vpop.f32.mrb[2].mxu0 }
  0xf9   :  { %v3972_v18 = vadd.f32 %v3971_v16, %v3970_v12  ;;  %v3973_v19 = vpop.f32.mrb[2].mxu1  ;;  %v3910_v20 = vpop.f32.mrb[3].mxu0 }
  0xfa   :  { %v3911_v21 = vadd.f32 %v3910_v20, %v3909_v17  ;;  %v3974_v22 = vpop.f32.mrb[3].mxu1  ;;  %v4620_v17 = vld [vmem:[%s6132_s3 + $0x4] ss:$16 sps:$4 sm:$0xff]   ;;  %v4621_v20 = vld [vmem:[%s6132_s3 + $0x8] ss:$16 sps:$4 sm:$0xff]  }
  0xfb   :  { %v5505_v23 = vadd.f32 %v3972_v18, %v3908_v15  ;;  %v3975_v24 = vadd.f32 %v3974_v22, %v3973_v19  ;;  %4351 = vmatmul.mubr.msk.bf16.gmra.mrb[108].mxu0 %vm1459_vm0, %v4617_v14  ;;  %v4618_v18 = vld [vmem:[%s6132_s3] ss:$16 sps:$4 sm:$0xff]   ;;  %2984 = vmatprep.subr.bf16.mxu1 %v4620_v17 }
  0xfc   :  { %2985 = vmatpush1.bf16.msra.mxu1 %v4618_v18 }
  0xfd   :  { %v5508_v25 = vadd.f32 %v3975_v24, %v3911_v21  ;;  %v4623_v21 = vld [vmem:[%s6132_s3 + $0xc] ss:$16 sps:$4 sm:$0xff]  }
  0xfe   :  { %v3912_v26 = vpop.f32.mrb[4].mxu0  ;;  %3066 = vmatprep.subr.bf16.mxu0 %v4623_v21  ;;  %v4651_v21 = vld [vmem:[%s6132_s3 + $0xa8] ss:$16 sps:$4 sm:$0xff]  }
  0xff   :  { %v3976_v27 = vpop.f32.mrb[4].mxu1  ;;  %v3913_v28 = vpop.f32.mrb[5].mxu0  ;;  %3067 = vmatpush1.bf16.msra.mxu0 %v4621_v20  ;;  %v4648_v20 = vld [vmem:[%s6132_s3 + $0xa0] ss:$16 sps:$4 sm:$0xff]  }
 0x100   :  { %v3914_v29 = vadd.f32 %v3913_v28, %v3912_v26  ;;  %v3977_v30 = vpop.f32.mrb[5].mxu1  ;;  %v3915_v31 = vpop.f32.mrb[6].mxu0  ;;  %v4629_v28 = vld [vmem:[%s6132_s3 + $0x2c] ss:$16 sps:$4 sm:$0xff]  }
 0x101   :  { %v3978_v32 = vadd.f32 %v3977_v30, %v3976_v27  ;;  %v3979_v33 = vpop.f32.mrb[6].mxu1  ;;  %v3916_v34 = vpop.f32.mrb[7].mxu0  ;;  %v4626_v27 = vld [vmem:[%s6132_s3 + $0x24] ss:$16 sps:$4 sm:$0xff]   ;;  %3068 = vmatprep.subr.bf16.mxu0 %v4629_v28 }
 0x102   :  { %v3917_v35 = vadd.f32 %v3916_v34, %v3915_v31  ;;  %v3980_v36 = vpop.f32.mrb[7].mxu1  ;;  %2986 = vmatprep.subr.bf16.mxu1 %v4626_v27 }
 0x103   :  { %v5510_v37 = vadd.f32 %v3978_v32, %v3914_v29  ;;  %v3981_v38 = vadd.f32 %v3980_v36, %v3979_v33  ;;  %v4624_v32 = vld [vmem:[%s6132_s3 + $0x20] ss:$16 sps:$4 sm:$0xff]   ;;  %v4627_v33 = vld [vmem:[%s6132_s3 + $0x28] ss:$16 sps:$4 sm:$0xff]  }
 0x104   :  { %2987 = vmatpush1.bf16.msra.mxu1 %v4624_v32  ;;  %3069 = vmatpush1.bf16.msra.mxu0 %v4627_v33  ;;  %v4659_v32 = vld [vmem:[%s6132_s3 + $0xcc] ss:$16 sps:$4 sm:$0xff]   ;;  %v4654_v33 = vld [vmem:[%s6132_s3 + $0xc0] ss:$16 sps:$4 sm:$0xff]  }
 0x105   :  { %v5512_v39 = vadd.f32 %v3981_v38, %v3917_v35 }
 0x106   :  { %v3918_v40 = vpop.f32.mrb[8].mxu0 }
 0x107   :  { %v3982_v41 = vpop.f32.mrb[8].mxu1  ;;  %v3919_v42 = vpop.f32.mrb[9].mxu0 }
 0x108   :  { %v3920_v43 = vadd.f32 %v3919_v42, %v3918_v40  ;;  %v3983_v44 = vpop.f32.mrb[9].mxu1  ;;  %v3921_v45 = vpop.f32.mrb[10].mxu0 }
 0x109   :  { %v3984_v46 = vadd.f32 %v3983_v44, %v3982_v41  ;;  %v3985_v47 = vpop.f32.mrb[10].mxu1  ;;  %v3922_v48 = vpop.f32.mrb[11].mxu0  ;;  %v4635_v44 = vld [vmem:[%s6132_s3 + $0x4c] ss:$16 sps:$4 sm:$0xff]  }
 0x10a   :  { %v3923_v49 = vadd.f32 %v3922_v48, %v3921_v45  ;;  %v3986_v50 = vpop.f32.mrb[11].mxu1  ;;  %v4630_v45 = vld [vmem:[%s6132_s3 + $0x40] ss:$16 sps:$4 sm:$0xff]   ;;  %3070 = vmatprep.subr.bf16.mxu0 %v4635_v44 }
 0x10b   :  { %v5514_v51 = vadd.f32 %v3984_v46, %v3920_v43  ;;  %v3987_v52 = vadd.f32 %v3986_v50, %v3985_v47  ;;  %v4632_v43 = vld [vmem:[%s6132_s3 + $0x44] ss:$16 sps:$4 sm:$0xff]   ;;  %v4633_v46 = vld [vmem:[%s6132_s3 + $0x48] ss:$16 sps:$4 sm:$0xff]  }
 0x10c   :  { %2988 = vmatprep.subr.bf16.mxu1 %v4632_v43  ;;  %3071 = vmatpush1.bf16.msra.mxu0 %v4633_v46  ;;  %v4665_v43 = vld [vmem:[%s6132_s3 + $0xec] ss:$16 sps:$4 sm:$0xff]  }
 0x10d   :  { %v5516_v53 = vadd.f32 %v3987_v52, %v3923_v49  ;;  %2989 = vmatpush1.bf16.msra.mxu1 %v4630_v45  ;;  %v4638_v52 = vld [vmem:[%s6132_s3 + $0x64] ss:$16 sps:$4 sm:$0xff]  }
 0x10e   :  { %v3924_v54 = vpop.f32.mrb[12].mxu0  ;;  %2990 = vmatprep.subr.bf16.mxu1 %v4638_v52 }
 0x10f   :  { %v3988_v55 = vpop.f32.mrb[12].mxu1  ;;  %v3925_v56 = vpop.f32.mrb[13].mxu0 }
 0x110   :  { %v3926_v57 = vadd.f32 %v3925_v56, %v3924_v54  ;;  %v3989_v58 = vpop.f32.mrb[13].mxu1  ;;  %v3927_v59 = vpop.f32.mrb[14].mxu0  ;;  %v4641_v54 = vld [vmem:[%s6132_s3 + $0x6c] ss:$16 sps:$4 sm:$0xff]  }
 0x111   :  { %v3990_v60 = vadd.f32 %v3989_v58, %v3988_v55  ;;  %v3991_v61 = vpop.f32.mrb[14].mxu1  ;;  %v3928_v62 = vpop.f32.mrb[15].mxu0  ;;  %v4636_v58 = vld [vmem:[%s6132_s3 + $0x60] ss:$16 sps:$4 sm:$0xff]   ;;  %3072 = vmatprep.subr.bf16.mxu0 %v4641_v54 }
 0x112   :  { %v3929_v63 = vadd.f32 %v3928_v62, %v3927_v59  ;;  %v3992_v0 = vpop.f32.mrb[15].mxu1  ;;  %v4639_v59 = vld [vmem:[%s6132_s3 + $0x68] ss:$16 sps:$4 sm:$0xff]   ;;  %2991 = vmatpush1.bf16.msra.mxu1 %v4636_v58  ;;  %v4666_v58 = vld [vmem:[%s6132_s3 + $0x100] ss:$16 sps:$4 sm:$0xff]  }
 0x113   :  { %v5518_v1 = vadd.f32 %v3990_v60, %v3926_v57  ;;  %v3993_v2 = vadd.f32 %v3992_v0, %v3991_v61  ;;  %3073 = vmatpush1.bf16.msra.mxu0 %v4639_v59  ;;  %v4668_v59 = vld [vmem:[%s6132_s3 + $0x104] ss:$16 sps:$4 sm:$0xff]  }
 0x115   :  { %v5520_v3 = vadd.f32 %v3993_v2, %v3929_v63 }
 0x116   :  { %v3930_v4 = vpop.f32.mrb[16].mxu0 }
 0x117   :  { %v3994_v5 = vpop.f32.mrb[16].mxu1  ;;  %v3931_v6 = vpop.f32.mrb[17].mxu0 }
 0x118   :  { %v3932_v7 = vadd.f32 %v3931_v6, %v3930_v4  ;;  %v3995_v8 = vpop.f32.mrb[17].mxu1  ;;  %v3933_v9 = vpop.f32.mrb[18].mxu0  ;;  %v4647_v6 = vld [vmem:[%s6132_s3 + $0x8c] ss:$16 sps:$4 sm:$0xff]  }
 0x119   :  { %v3996_v10 = vadd.f32 %v3995_v8, %v3994_v5  ;;  %v3997_v11 = vpop.f32.mrb[18].mxu1  ;;  %v3934_v12 = vpop.f32.mrb[19].mxu0  ;;  %v4644_v5 = vld [vmem:[%s6132_s3 + $0x84] ss:$16 sps:$4 sm:$0xff]   ;;  %v4645_v8 = vld [vmem:[%s6132_s3 + $0x88] ss:$16 sps:$4 sm:$0xff]   ;;  %3074 = vmatprep.subr.bf16.mxu0 %v4647_v6 }
 0x11a   :  { %v3935_v13 = vadd.f32 %v3934_v12, %v3933_v9  ;;  %v3998_v14 = vpop.f32.mrb[19].mxu1  ;;  %2992 = vmatprep.subr.bf16.mxu1 %v4644_v5  ;;  %3075 = vmatpush1.bf16.msra.mxu0 %v4645_v8  ;;  %v4677_v8 = vld [vmem:[%s6132_s3 + $0x12c] ss:$16 sps:$4 sm:$0xff]  }
 0x11b   :  { %v5522_v15 = vadd.f32 %v3996_v10, %v3932_v7  ;;  %v3999_v16 = vadd.f32 %v3998_v14, %v3997_v11  ;;  %v4642_v7 = vld [vmem:[%s6132_s3 + $0x80] ss:$16 sps:$4 sm:$0xff]   ;;  %v4653_v14 = vld [vmem:[%s6132_s3 + $0xac] ss:$16 sps:$4 sm:$0xff]  }
 0x11c   :  { %2993 = vmatpush1.bf16.msra.mxu1 %v4642_v7  ;;  %3076 = vmatprep.subr.bf16.mxu0 %v4653_v14  ;;  %v4674_v7 = vld [vmem:[%s6132_s3 + $0x124] ss:$16 sps:$4 sm:$0xff]  }
 0x11d   :  { %v5530_v19 = vadd.f32 %v3999_v16, %v3935_v13  ;;  %v4650_v13 = vld [vmem:[%s6132_s3 + $0xa4] ss:$16 sps:$4 sm:$0xff]  }
 0x11e   :  { %v3936_v22 = vpop.f32.mrb[20].mxu0  ;;  %2994 = vmatprep.subr.bf16.mxu1 %v4650_v13  ;;  %3077 = vmatpush1.bf16.msra.mxu0 %v4651_v21  ;;  %v4675_v13 = vld [vmem:[%s6132_s3 + $0x128] ss:$16 sps:$4 sm:$0xff]  }
 0x11f   :  { %v4000_v24 = vpop.f32.mrb[20].mxu1  ;;  %v3937_v26 = vpop.f32.mrb[21].mxu0  ;;  %3078 = vmatprep.subr.bf16.mxu0 %v4659_v32 }
 0x120   :  { %v3938_v29 = vadd.f32 %v3937_v26, %v3936_v22  ;;  %v4001_v30 = vpop.f32.mrb[21].mxu1  ;;  %v3939_v31 = vpop.f32.mrb[22].mxu0  ;;  %2995 = vmatpush1.bf16.msra.mxu1 %v4648_v20 }
 0x121   :  { %v4002_v34 = vadd.f32 %v4001_v30, %v4000_v24  ;;  %v4003_v35 = vpop.f32.mrb[22].mxu1  ;;  %v3940_v36 = vpop.f32.mrb[23].mxu0 }
 0x122   :  { %v3941_v38 = vadd.f32 %v3940_v36, %v3939_v31  ;;  %v4004_v40 = vpop.f32.mrb[23].mxu1  ;;  %v4656_v31 = vld [vmem:[%s6132_s3 + $0xc4] ss:$16 sps:$4 sm:$0xff]  }
 0x123   :  { %v5550_v41 = vadd.f32 %v4002_v34, %v3938_v29  ;;  %v4005_v42 = vadd.f32 %v4004_v40, %v4003_v35  ;;  %v4657_v34 = vld [vmem:[%s6132_s3 + $0xc8] ss:$16 sps:$4 sm:$0xff]   ;;  %2996 = vmatprep.subr.bf16.mxu1 %v4656_v31 }
 0x124   :  { %2997 = vmatpush1.bf16.msra.mxu1 %v4654_v33  ;;  %3079 = vmatpush1.bf16.msra.mxu0 %v4657_v34 }
 0x125   :  { %v5564_v47 = vadd.f32 %v4005_v42, %v3941_v38  ;;  %v4662_v42 = vld [vmem:[%s6132_s3 + $0xe4] ss:$16 sps:$4 sm:$0xff]   ;;  %3080 = vmatprep.subr.bf16.mxu0 %v4665_v43  ;;  %v4684_v43 = vld [vmem:[%s6132_s3 + $0x160] ss:$16 sps:$4 sm:$0xff]  }
 0x126   :  { %v3942_v48 = vpop.f32.mrb[24].mxu0  ;;  %2998 = vmatprep.subr.bf16.mxu1 %v4662_v42 }
 0x127   :  { %v4006_v49 = vpop.f32.mrb[24].mxu1  ;;  %v3943_v50 = vpop.f32.mrb[25].mxu0 }
 0x128   :  { %v3944_v55 = vadd.f32 %v3943_v50, %v3942_v48  ;;  %v4007_v56 = vpop.f32.mrb[25].mxu1  ;;  %v3945_v57 = vpop.f32.mrb[26].mxu0  ;;  %v4660_v48 = vld [vmem:[%s6132_s3 + $0xe0] ss:$16 sps:$4 sm:$0xff]  }
 0x129   :  { %v4008_v60 = vadd.f32 %v4007_v56, %v4006_v49  ;;  %v4009_v61 = vpop.f32.mrb[26].mxu1  ;;  %v3946_v62 = vpop.f32.mrb[27].mxu0  ;;  %v4663_v49 = vld [vmem:[%s6132_s3 + $0xe8] ss:$16 sps:$4 sm:$0xff]   ;;  %2999 = vmatpush1.bf16.msra.mxu1 %v4660_v48 }
 0x12a   :  { %v3947_v63 = vadd.f32 %v3946_v62, %v3945_v57  ;;  %v4010_v0 = vpop.f32.mrb[27].mxu1  ;;  %3081 = vmatpush1.bf16.msra.mxu0 %v4663_v49  ;;  %3000 = vmatprep.subr.bf16.mxu1 %v4668_v59  ;;  %v4693_v59 = vld [vmem:[%s6132_s3 + $0x188] ss:$16 sps:$4 sm:$0xff]  }
 0x12b   :  { %v5578_v2 = vadd.f32 %v4008_v60, %v3944_v55  ;;  %v4011_v4 = vadd.f32 %v4010_v0, %v4009_v61  ;;  %v4669_v61 = vld [vmem:[%s6132_s3 + $0x108] ss:$16 sps:$4 sm:$0xff]  }
 0x12d   :  { %v5592_v9 = vadd.f32 %v4011_v4, %v3947_v63  ;;  %3001 = vmatpush1.bf16.msra.mxu1 %v4666_v58 }
 0x12e   :  { %v3948_v10 = vpop.f32.mrb[28].mxu0  ;;  %3002 = vmatprep.subr.bf16.mxu1 %v4674_v7  ;;  %v4696_v7 = vld [vmem:[%s6132_s3 + $0x1a0] ss:$16 sps:$4 sm:$0xff]  }
 0x12f   :  { %v4012_v11 = vpop.f32.mrb[28].mxu1  ;;  %v3949_v12 = vpop.f32.mrb[29].mxu0 }
 0x130   :  { %v3950_v16 = vadd.f32 %v3949_v12, %v3948_v10  ;;  %v4013_v17 = vpop.f32.mrb[29].mxu1  ;;  %v3951_v18 = vpop.f32.mrb[30].mxu0  ;;  %v4672_v12 = vld [vmem:[%s6132_s3 + $0x120] ss:$16 sps:$4 sm:$0xff]  }
 0x131   :  { %v4014_v22 = vadd.f32 %v4013_v17, %v4012_v11  ;;  %v4015_v24 = vpop.f32.mrb[30].mxu1  ;;  %v3952_v26 = vpop.f32.mrb[31].mxu0  ;;  %3003 = vmatpush1.bf16.msra.mxu1 %v4672_v12  ;;  %v4701_v12 = vld [vmem:[%s6132_s3 + $0x1ac] ss:$16 sps:$4 sm:$0xff]  }
 0x132   :  { %v3953_v27 = vadd.f32 %v3952_v26, %v3951_v18  ;;  %v4016_v28 = vpop.f32.mrb[31].mxu1  ;;  %v4683_v26 = vld [vmem:[%s6132_s3 + $0x14c] ss:$16 sps:$4 sm:$0xff]  }
 0x133   :  { %v5606_v29 = vadd.f32 %v4014_v22, %v3950_v16  ;;  %v4017_v30 = vadd.f32 %v4016_v28, %v4015_v24  ;;  %v4680_v24 = vld [vmem:[%s6132_s3 + $0x144] ss:$16 sps:$4 sm:$0xff]  }
 0x134   :  { %3004 = vmatprep.subr.bf16.mxu1 %v4680_v24  ;;  %v4705_v24 = vld [vmem:[%s6132_s3 + $0x1c8] ss:$16 sps:$4 sm:$0xff]  }
 0x135   :  { %v5620_v35 = vadd.f32 %v4017_v30, %v3953_v27  ;;  %v4681_v30 = vld [vmem:[%s6132_s3 + $0x148] ss:$16 sps:$4 sm:$0xff]  }
 0x136   :  { %v4034_v36 = vpop.f32.mrb[32].mxu0 }
 0x137   :  { %v4035_v38 = vpop.f32.mrb[33].mxu0  ;;  %v4098_v40 = vpop.f32.mrb[32].mxu1 }
 0x138   :  { %v4036_v44 = vadd.f32 %v4035_v38, %v4034_v36  ;;  %v4037_v45 = vpop.f32.mrb[34].mxu0  ;;  %v4099_v46 = vpop.f32.mrb[33].mxu1  ;;  %v4689_v36 = vld [vmem:[%s6132_s3 + $0x16c] ss:$16 sps:$4 sm:$0xff]  }
 0x139   :  { %v4038_v50 = vpop.f32.mrb[35].mxu0  ;;  %v4100_v52 = vadd.f32 %v4099_v46, %v4098_v40  ;;  %v4101_v54 = vpop.f32.mrb[34].mxu1 }
 0x13a   :  { %v1713_v55 = vadd.f32 %v4036_v44, %v5505_v23  ;;  %v4039_v56 = vadd.f32 %v4038_v50, %v4037_v45  ;;  %v4102_v57 = vpop.f32.mrb[35].mxu1  ;;  %v4671_v23 = vld [vmem:[%s6132_s3 + $0x10c] ss:$16 sps:$4 sm:$0xff]   ;;  %v4687_v44 = vld [vmem:[%s6132_s3 + $0x168] ss:$16 sps:$4 sm:$0xff]  }
 0x13b   :  { %v4103_v60 = vadd.f32 %v4102_v57, %v4101_v54  ;;  %3082 = vmatprep.subr.bf16.mxu0 %v4671_v23 }
 0x13c   :  { %v1716_v62 = vadd.f32 %v4039_v56, %v5508_v25  ;;  %v5648_v63 = vadd.f32 %v4100_v52, %v1713_v55  ;;  %3083 = vmatpush1.bf16.msra.mxu0 %v4669_v61  ;;  %v4692_v55 = vld [vmem:[%s6132_s3 + $0x184] ss:$16 sps:$4 sm:$0xff]   ;;  %v4695_v56 = vld [vmem:[%s6132_s3 + $0x18c] ss:$16 sps:$4 sm:$0xff]  }
 0x13d   :  { %3084 = vmatprep.subr.bf16.mxu0 %v4677_v8  ;;  %v4699_v8 = vld [vmem:[%s6132_s3 + $0x1a8] ss:$16 sps:$4 sm:$0xff]  }
 0x13e   :  { %v5650_v0 = vadd.f32 %v4103_v60, %v1716_v62  ;;  %v4040_v4 = vpop.f32.mrb[36].mxu0 }
 0x13f   :  { %v4041_v5 = vpop.f32.mrb[37].mxu0  ;;  %v4104_v6 = vpop.f32.mrb[36].mxu1 }
 0x140   :  { %v4042_v25 = vadd.f32 %v4041_v5, %v4040_v4  ;;  %v4043_v10 = vpop.f32.mrb[38].mxu0  ;;  %v4105_v11 = vpop.f32.mrb[37].mxu1  ;;  %3085 = vmatpush1.bf16.msra.mxu0 %v4675_v13 }
 0x141   :  { %v4044_v14 = vpop.f32.mrb[39].mxu0  ;;  %v4106_v16 = vadd.f32 %v4105_v11, %v4104_v6  ;;  %v4107_v17 = vpop.f32.mrb[38].mxu1  ;;  %3086 = vmatprep.subr.bf16.mxu0 %v4683_v26 }
 0x142   :  { %v1721_v18 = vadd.f32 %v4042_v25, %v5510_v37  ;;  %v4045_v20 = vadd.f32 %v4044_v14, %v4043_v10  ;;  %v4108_v21 = vpop.f32.mrb[39].mxu1  ;;  %v4678_v37 = vld [vmem:[%s6132_s3 + $0x140] ss:$16 sps:$4 sm:$0xff]  }
 0x143   :  { %v4109_v22 = vadd.f32 %v4108_v21, %v4107_v17  ;;  %3005 = vmatpush1.bf16.msra.mxu1 %v4678_v37 }
 0x144   :  { %v1724_v27 = vadd.f32 %v4045_v20, %v5512_v39  ;;  %v5672_v28 = vadd.f32 %v4106_v16, %v1721_v18  ;;  %v4686_v39 = vld [vmem:[%s6132_s3 + $0x164] ss:$16 sps:$4 sm:$0xff]   ;;  %3087 = vmatpush1.bf16.msra.mxu0 %v4681_v30  ;;  %v4707_v20 = vld [vmem:[%s6132_s3 + $0x1cc] ss:$16 sps:$4 sm:$0xff]  }
 0x145   :  { %3006 = vmatprep.subr.bf16.mxu1 %v4686_v39  ;;  %3088 = vmatprep.subr.bf16.mxu0 %v4689_v36  ;;  %v4704_v18 = vld [vmem:[%s6132_s3 + $0x1c4] ss:$16 sps:$4 sm:$0xff]   ;;  %v4708_v36 = vld [vmem:[%s6132_s3 + $0x1e0] ss:$16 sps:$4 sm:$0xff]  }
 0x146   :  { %v5680_v31 = vadd.f32 %v4109_v22, %v1724_v27  ;;  %v4046_v32 = vpop.f32.mrb[40].mxu0 }
 0x147   :  { %v4047_v33 = vpop.f32.mrb[41].mxu0  ;;  %v4110_v34 = vpop.f32.mrb[40].mxu1  ;;  %3007 = vmatpush1.bf16.msra.mxu1 %v4684_v43 }
 0x148   :  { %v4048_v38 = vadd.f32 %v4047_v33, %v4046_v32  ;;  %v4049_v40 = vpop.f32.mrb[42].mxu0  ;;  %v4111_v42 = vpop.f32.mrb[41].mxu1  ;;  %3089 = vmatpush1.bf16.msra.mxu0 %v4687_v44  ;;  %3008 = vmatprep.subr.bf16.mxu1 %v4692_v55  ;;  %v4713_v32 = vld [vmem:[%s6132_s3 + $0x1ec] ss:$16 sps:$4 sm:$0xff]  }
 0x149   :  { %v4050_v45 = vpop.f32.mrb[43].mxu0  ;;  %v4112_v46 = vadd.f32 %v4111_v42, %v4110_v34  ;;  %v4113_v48 = vpop.f32.mrb[42].mxu1  ;;  %3090 = vmatprep.subr.bf16.mxu0 %v4695_v56 }
 0x14a   :  { %v1729_v49 = vadd.f32 %v4048_v38, %v5514_v51  ;;  %v4051_v50 = vadd.f32 %v4050_v45, %v4049_v40  ;;  %v4114_v52 = vpop.f32.mrb[43].mxu1  ;;  %v4690_v51 = vld [vmem:[%s6132_s3 + $0x180] ss:$16 sps:$4 sm:$0xff]   ;;  %v4711_v38 = vld [vmem:[%s6132_s3 + $0x1e8] ss:$16 sps:$4 sm:$0xff]  }
 0x14b   :  { %v4115_v54 = vadd.f32 %v4114_v52, %v4113_v48  ;;  %3009 = vmatpush1.bf16.msra.mxu1 %v4690_v51 }
 0x14c   :  { %v1732_v57 = vadd.f32 %v4051_v50, %v5516_v53  ;;  %v5702_v58 = vadd.f32 %v4112_v46, %v1729_v49  ;;  %v4698_v53 = vld [vmem:[%s6132_s3 + $0x1a4] ss:$16 sps:$4 sm:$0xff]   ;;  %3091 = vmatpush1.bf16.msra.mxu0 %v4693_v59  ;;  %v4719_v50 = vld [vmem:[%s6132_s3 + $0x20c] ss:$16 sps:$4 sm:$0xff]  }
 0x14d   :  { %3010 = vmatprep.subr.bf16.mxu1 %v4698_v53  ;;  %3092 = vmatprep.subr.bf16.mxu0 %v4701_v12  ;;  %v4716_v49 = vld [vmem:[%s6132_s3 + $0x204] ss:$16 sps:$4 sm:$0xff]  }
 0x14e   :  { %v5710_v60 = vadd.f32 %v4115_v54, %v1732_v57  ;;  %v4052_v61 = vpop.f32.mrb[44].mxu0 }
 0x14f   :  { %v4053_v23 = vpop.f32.mrb[45].mxu0  ;;  %v4116_v62 = vpop.f32.mrb[44].mxu1  ;;  %3011 = vmatpush1.bf16.msra.mxu1 %v4696_v7 }
 0x150   :  { %v4054_v4 = vadd.f32 %v4053_v23, %v4052_v61  ;;  %v4055_v5 = vpop.f32.mrb[46].mxu0  ;;  %v4117_v6 = vpop.f32.mrb[45].mxu1  ;;  %3093 = vmatpush1.bf16.msra.mxu0 %v4699_v8  ;;  %3012 = vmatprep.subr.bf16.mxu1 %v4704_v18 }
 0x151   :  { %v4056_v25 = vpop.f32.mrb[47].mxu0  ;;  %v4118_v10 = vadd.f32 %v4117_v6, %v4116_v62  ;;  %v4119_v11 = vpop.f32.mrb[46].mxu1  ;;  %3094 = vmatprep.subr.bf16.mxu0 %v4707_v20 }
 0x152   :  { %v1737_v13 = vadd.f32 %v4054_v4, %v5518_v1  ;;  %v4057_v14 = vadd.f32 %v4056_v25, %v4055_v5  ;;  %v4120_v16 = vpop.f32.mrb[47].mxu1  ;;  %v4702_v1 = vld [vmem:[%s6132_s3 + $0x1c0] ss:$16 sps:$4 sm:$0xff]  }
 0x153   :  { %v4121_v17 = vadd.f32 %v4120_v16, %v4119_v11  ;;  %3013 = vmatpush1.bf16.msra.mxu1 %v4702_v1 }
 0x154   :  { %v1740_v21 = vadd.f32 %v4057_v14, %v5520_v3  ;;  %v5732_v22 = vadd.f32 %v4118_v10, %v1737_v13  ;;  %v4710_v3 = vld [vmem:[%s6132_s3 + $0x1e4] ss:$16 sps:$4 sm:$0xff]   ;;  %3095 = vmatpush1.bf16.msra.mxu0 %v4705_v24 }
 0x155   :  { %3014 = vmatprep.subr.bf16.mxu1 %v4710_v3  ;;  %3096 = vmatprep.subr.bf16.mxu0 %v4713_v32 }
 0x156   :  { %v5740_v26 = vadd.f32 %v4121_v17, %v1740_v21  ;;  %v4058_v27 = vpop.f32.mrb[48].mxu0 }
 0x157   :  { %v4059_v37 = vpop.f32.mrb[49].mxu0  ;;  %v4122_v30 = vpop.f32.mrb[48].mxu1  ;;  %3015 = vmatpush1.bf16.msra.mxu1 %v4708_v36 }
 0x158   :  { %v4060_v33 = vadd.f32 %v4059_v37, %v4058_v27  ;;  %v4061_v34 = vpop.f32.mrb[50].mxu0  ;;  %v4123_v39 = vpop.f32.mrb[49].mxu1  ;;  %3097 = vmatpush1.bf16.msra.mxu0 %v4711_v38  ;;  %3025 = vmatprep.subr.bf16.mxu1 %v4716_v49 }
 0x159   :  { %v4062_v40 = vpop.f32.mrb[51].mxu0  ;;  %v4124_v42 = vadd.f32 %v4123_v39, %v4122_v30  ;;  %v4125_v43 = vpop.f32.mrb[50].mxu1  ;;  %3107 = vmatprep.subr.bf16.mxu0 %v4719_v50 }
 0x15a   :  { %v1745_v44 = vadd.f32 %v4060_v33, %v5522_v15  ;;  %v4063_v45 = vadd.f32 %v4062_v40, %v4061_v34  ;;  %v4126_v46 = vpop.f32.mrb[51].mxu1 }
 0x15b   :  { %v4127_v48 = vadd.f32 %v4126_v46, %v4125_v43 }
 0x15c   :  { %v1748_v52 = vadd.f32 %v4063_v45, %v5530_v19  ;;  %v5762_v54 = vadd.f32 %v4124_v42, %v1745_v44 }
 0x15e   :  { %v5764_v15 = vadd.f32 %v4127_v48, %v1748_v52  ;;  %v4064_v55 = vpop.f32.mrb[52].mxu0 }
 0x15f   :  { %v4065_v56 = vpop.f32.mrb[53].mxu0  ;;  %v4128_v57 = vpop.f32.mrb[52].mxu1 }
 0x160   :  { %v4066_v51 = vadd.f32 %v4065_v56, %v4064_v55  ;;  %v4067_v59 = vpop.f32.mrb[54].mxu0  ;;  %v4129_v61 = vpop.f32.mrb[53].mxu1 }
 0x161   :  { %v4068_v23 = vpop.f32.mrb[55].mxu0  ;;  %v4130_v62 = vadd.f32 %v4129_v61, %v4128_v57  ;;  %v4131_v53 = vpop.f32.mrb[54].mxu1 }
 0x162   :  { %v1753_v4 = vadd.f32 %v4066_v51, %v5550_v41  ;;  %v4069_v5 = vadd.f32 %v4068_v23, %v4067_v59  ;;  %v4132_v19 = vpop.f32.mrb[55].mxu1 }
 0x163   :  { %v4133_v6 = vadd.f32 %v4132_v19, %v4131_v53 }
 0x164   :  { %v1756_v7 = vadd.f32 %v4069_v5, %v5564_v47  ;;  %v5768_v8 = vadd.f32 %v4130_v62, %v1753_v4 }
 0x166   :  { %v5770_v25 = vadd.f32 %v4133_v6, %v1756_v7  ;;  %v4070_v10 = vpop.f32.mrb[56].mxu0 }
 0x167   :  { %v4071_v11 = vpop.f32.mrb[57].mxu0  ;;  %v4134_v12 = vpop.f32.mrb[56].mxu1 }
 0x168   :  { %v4072_v13 = vadd.f32 %v4071_v11, %v4070_v10  ;;  %v4073_v14 = vpop.f32.mrb[58].mxu0  ;;  %v4135_v16 = vpop.f32.mrb[57].mxu1 }
 0x169   :  { %v4074_v17 = vpop.f32.mrb[59].mxu0  ;;  %v4136_v18 = vadd.f32 %v4135_v16, %v4134_v12  ;;  %v4137_v20 = vpop.f32.mrb[58].mxu1 }
 0x16a   :  { %v1761_v41 = vadd.f32 %v4072_v13, %v5578_v2  ;;  %v4075_v21 = vadd.f32 %v4074_v17, %v4073_v14  ;;  %v4138_v1 = vpop.f32.mrb[59].mxu1 }
 0x16b   :  { %v4139_v24 = vadd.f32 %v4138_v1, %v4137_v20 }
 0x16c   :  { %v1764_v47 = vadd.f32 %v4075_v21, %v5592_v9  ;;  %v5774_v27 = vadd.f32 %v4136_v18, %v1761_v41 }
 0x16e   :  { %v5776_v37 = vadd.f32 %v4139_v24, %v1764_v47  ;;  %v4076_v30 = vpop.f32.mrb[60].mxu0 }
 0x16f   :  { %v4077_v3 = vpop.f32.mrb[61].mxu0  ;;  %v4140_v32 = vpop.f32.mrb[60].mxu1 }
 0x170   :  { %v4078_v33 = vadd.f32 %v4077_v3, %v4076_v30  ;;  %v4079_v34 = vpop.f32.mrb[62].mxu0  ;;  %v4141_v39 = vpop.f32.mrb[61].mxu1 }
 0x171   :  { %v4080_v36 = vpop.f32.mrb[63].mxu0  ;;  %v4142_v38 = vadd.f32 %v4141_v39, %v4140_v32  ;;  %v4143_v40 = vpop.f32.mrb[62].mxu1 }
 0x172   :  { %v1769_v2 = vadd.f32 %v4078_v33, %v5606_v29  ;;  %v4081_v42 = vadd.f32 %v4080_v36, %v4079_v34  ;;  %v4144_v43 = vpop.f32.mrb[63].mxu1 }
 0x173   :  { %v4145_v44 = vadd.f32 %v4144_v43, %v4143_v40 }
 0x174   :  { %v1772_v9 = vadd.f32 %v4081_v42, %v5620_v35  ;;  %v5780_v45 = vadd.f32 %v4142_v38, %v1769_v2 }
 0x176   :  { %v5782_v46 = vadd.f32 %v4145_v44, %v1772_v9  ;;  %v4162_v48 = vpop.f32.mrb[64].mxu0 }
 0x177   :  { %v4163_v49 = vpop.f32.mrb[65].mxu0  ;;  %v4226_v50 = vpop.f32.mrb[64].mxu1 }
 0x178   :  { %v4164_v52 = vadd.f32 %v4163_v49, %v4162_v48  ;;  %v4165_v55 = vpop.f32.mrb[66].mxu0  ;;  %v4227_v56 = vpop.f32.mrb[65].mxu1 }
 0x179   :  { %v4166_v57 = vpop.f32.mrb[67].mxu0  ;;  %v4228_v51 = vadd.f32 %v4227_v56, %v4226_v50  ;;  %v4229_v59 = vpop.f32.mrb[66].mxu1 }
 0x17a   :  { %v1907_v29 = vadd.f32 %v4164_v52, %v5648_v63  ;;  %v4167_v61 = vadd.f32 %v4166_v57, %v4165_v55  ;;  %v4230_v23 = vpop.f32.mrb[67].mxu1 }
 0x17b   :  { %v4231_v62 = vadd.f32 %v4230_v23, %v4229_v59 }
 0x17c   :  { %v1910_v35 = vadd.f32 %v4167_v61, %v5650_v0  ;;  %v5786_v53 = vadd.f32 %v4228_v51, %v1907_v29 }
 0x17e   :  { %v4168_v4 = vpop.f32.mrb[68].mxu0  ;;  %v5788_v5 = vadd.f32 %v4231_v62, %v1910_v35 }
 0x17f   :  { %v4169_v19 = vpop.f32.mrb[69].mxu0  ;;  %v4232_v6 = vpop.f32.mrb[68].mxu1 }
 0x180   :  { %v4170_v7 = vadd.f32 %v4169_v19, %v4168_v4  ;;  %v4171_v10 = vpop.f32.mrb[70].mxu0  ;;  %v4233_v11 = vpop.f32.mrb[69].mxu1 }
 0x181   :  { %v4172_v12 = vpop.f32.mrb[71].mxu0  ;;  %v4234_v13 = vadd.f32 %v4233_v11, %v4232_v6  ;;  %v4235_v14 = vpop.f32.mrb[70].mxu1 }
 0x182   :  { %v1915_v63 = vadd.f32 %v4170_v7, %v5672_v28  ;;  %v4173_v16 = vadd.f32 %v4172_v12, %v4171_v10  ;;  %v4236_v17 = vpop.f32.mrb[71].mxu1 }
 0x183   :  { %v4237_v18 = vadd.f32 %v4236_v17, %v4235_v14 }
 0x184   :  { %v1918_v0 = vadd.f32 %v4173_v16, %v5680_v31  ;;  %v5792_v20 = vadd.f32 %v4234_v13, %v1915_v63 }
 0x186   :  { %v4174_v41 = vpop.f32.mrb[72].mxu0  ;;  %v5794_v21 = vadd.f32 %v4237_v18, %v1918_v0 }
 0x187   :  { %v4175_v1 = vpop.f32.mrb[73].mxu0  ;;  %v4238_v24 = vpop.f32.mrb[72].mxu1 }
 0x188   :  { %v4176_v47 = vadd.f32 %v4175_v1, %v4174_v41  ;;  %v4177_v30 = vpop.f32.mrb[74].mxu0  ;;  %v4239_v3 = vpop.f32.mrb[73].mxu1 }
 0x189   :  { %v4178_v32 = vpop.f32.mrb[75].mxu0  ;;  %v4240_v33 = vadd.f32 %v4239_v3, %v4238_v24  ;;  %v4241_v34 = vpop.f32.mrb[74].mxu1 }
 0x18a   :  { %v1923_v28 = vadd.f32 %v4176_v47, %v5702_v58  ;;  %v4179_v39 = vadd.f32 %v4178_v32, %v4177_v30  ;;  %v4242_v36 = vpop.f32.mrb[75].mxu1 }
 0x18b   :  { %v4243_v38 = vadd.f32 %v4242_v36, %v4241_v34 }
 0x18c   :  { %v1926_v31 = vadd.f32 %v4179_v39, %v5710_v60  ;;  %v5798_v40 = vadd.f32 %v4240_v33, %v1923_v28 }
 0x18e   :  { %v4180_v2 = vpop.f32.mrb[76].mxu0  ;;  %v5800_v42 = vadd.f32 %v4243_v38, %v1926_v31 }
 0x18f   :  { %v4181_v43 = vpop.f32.mrb[77].mxu0  ;;  %v4244_v44 = vpop.f32.mrb[76].mxu1 }
 0x190   :  { %v4182_v9 = vadd.f32 %v4181_v43, %v4180_v2  ;;  %v4183_v48 = vpop.f32.mrb[78].mxu0  ;;  %v4245_v49 = vpop.f32.mrb[77].mxu1 }
 0x191   :  { %v4184_v50 = vpop.f32.mrb[79].mxu0  ;;  %v4246_v52 = vadd.f32 %v4245_v49, %v4244_v44  ;;  %v4247_v55 = vpop.f32.mrb[78].mxu1 }
 0x192   :  { %v1931_v58 = vadd.f32 %v4182_v9, %v5732_v22  ;;  %v4185_v56 = vadd.f32 %v4184_v50, %v4183_v48  ;;  %v4248_v57 = vpop.f32.mrb[79].mxu1 }
 0x193   :  { %v4249_v51 = vadd.f32 %v4248_v57, %v4247_v55 }
 0x194   :  { %v1934_v60 = vadd.f32 %v4185_v56, %v5740_v26  ;;  %v5804_v59 = vadd.f32 %v4246_v52, %v1931_v58 }
 0x196   :  { %v4186_v29 = vpop.f32.mrb[80].mxu0  ;;  %v5806_v61 = vadd.f32 %v4249_v51, %v1934_v60 }
 0x197   :  { %v4187_v23 = vpop.f32.mrb[81].mxu0  ;;  %v4250_v62 = vpop.f32.mrb[80].mxu1 }
 0x198   :  { %v4188_v35 = vadd.f32 %v4187_v23, %v4186_v29  ;;  %v4189_v4 = vpop.f32.mrb[82].mxu0  ;;  %v4251_v19 = vpop.f32.mrb[81].mxu1 }
 0x199   :  { %v4190_v6 = vpop.f32.mrb[83].mxu0  ;;  %v4252_v7 = vadd.f32 %v4251_v19, %v4250_v62  ;;  %v4253_v10 = vpop.f32.mrb[82].mxu1 }
 0x19a   :  { %v1939_v22 = vadd.f32 %v4188_v35, %v5762_v54  ;;  %v4191_v11 = vadd.f32 %v4190_v6, %v4189_v4  ;;  %v4254_v12 = vpop.f32.mrb[83].mxu1 }
 0x19b   :  { %v4255_v13 = vadd.f32 %v4254_v12, %v4253_v10 }
 0x19c   :  { %v1942_v26 = vadd.f32 %v4191_v11, %v5764_v15  ;;  %v5810_v14 = vadd.f32 %v4252_v7, %v1939_v22 }
 0x19e   :  { %v4192_v63 = vpop.f32.mrb[84].mxu0  ;;  %v5812_v16 = vadd.f32 %v4255_v13, %v1942_v26 }
 0x19f   :  { %v4193_v17 = vpop.f32.mrb[85].mxu0  ;;  %v4256_v18 = vpop.f32.mrb[84].mxu1 }
 0x1a0   :  { %v4194_v0 = vadd.f32 %v4193_v17, %v4192_v63  ;;  %v4195_v41 = vpop.f32.mrb[86].mxu0  ;;  %v4257_v1 = vpop.f32.mrb[85].mxu1 }
 0x1a1   :  { %v4196_v24 = vpop.f32.mrb[87].mxu0  ;;  %v4258_v47 = vadd.f32 %v4257_v1, %v4256_v18  ;;  %v4259_v30 = vpop.f32.mrb[86].mxu1 }
 0x1a2   :  { %v1947_v54 = vadd.f32 %v4194_v0, %v5768_v8  ;;  %v4197_v3 = vadd.f32 %v4196_v24, %v4195_v41  ;;  %v4260_v32 = vpop.f32.mrb[87].mxu1 }
 0x1a3   :  { %v4261_v33 = vadd.f32 %v4260_v32, %v4259_v30 }
 0x1a4   :  { %v1950_v15 = vadd.f32 %v4197_v3, %v5770_v25  ;;  %v2044_v34 = vadd.f32 %v4258_v47, %v1947_v54 }
 0x1a6   :  { %v4198_v28 = vpop.f32.mrb[88].mxu0  ;;  %v2047_v39 = vadd.f32 %v4261_v33, %v1950_v15 }
 0x1a7   :  { %v4199_v36 = vpop.f32.mrb[89].mxu0  ;;  %v4262_v38 = vpop.f32.mrb[88].mxu1 }
 0x1a8   :  { %v4200_v31 = vadd.f32 %v4199_v36, %v4198_v28  ;;  %v4201_v2 = vpop.f32.mrb[90].mxu0  ;;  %v4263_v43 = vpop.f32.mrb[89].mxu1 }
 0x1a9   :  { %v4202_v44 = vpop.f32.mrb[91].mxu0  ;;  %v4264_v9 = vadd.f32 %v4263_v43, %v4262_v38  ;;  %v4265_v48 = vpop.f32.mrb[90].mxu1 }
 0x1aa   :  { %v1955_v49 = vadd.f32 %v4200_v31, %v5774_v27  ;;  %v4203_v50 = vadd.f32 %v4202_v44, %v4201_v2  ;;  %v4266_v8 = vpop.f32.mrb[91].mxu1 }
 0x1ab   :  { %v4267_v52 = vadd.f32 %v4266_v8, %v4265_v48 }
 0x1ac   :  { %v1958_v55 = vadd.f32 %v4203_v50, %v5776_v37  ;;  %v2052_v58 = vadd.f32 %v4264_v9, %v1955_v49 }
 0x1ae   :  { %v4204_v25 = vpop.f32.mrb[92].mxu0  ;;  %v2055_v56 = vadd.f32 %v4267_v52, %v1958_v55 }
 0x1af   :  { %v4205_v57 = vpop.f32.mrb[93].mxu0  ;;  %v4268_v51 = vpop.f32.mrb[92].mxu1 }
 0x1b0   :  { %v4206_v60 = vadd.f32 %v4205_v57, %v4204_v25  ;;  %v4207_v29 = vpop.f32.mrb[94].mxu0  ;;  %v4269_v23 = vpop.f32.mrb[93].mxu1 }
 0x1b1   :  { %v4208_v62 = vpop.f32.mrb[95].mxu0  ;;  %v4270_v35 = vadd.f32 %v4269_v23, %v4268_v51  ;;  %v4271_v4 = vpop.f32.mrb[94].mxu1 }
 0x1b2   :  { %v1963_v19 = vadd.f32 %v4206_v60, %v5780_v45  ;;  %v4209_v6 = vadd.f32 %v4208_v62, %v4207_v29  ;;  %v4272_v27 = vpop.f32.mrb[95].mxu1 }
 0x1b3   :  { %v4273_v7 = vadd.f32 %v4272_v27, %v4271_v4  ;;  %v4722_v4 = vld [vmem:[%s6132_s3 + $0x224] ss:$16 sps:$4 sm:$0xff]   ;;  %v4720_v27 = vld [vmem:[%s6132_s3 + $0x220] ss:$16 sps:$4 sm:$0xff]  }
 0x1b4   :  { %v1966_v10 = vadd.f32 %v4209_v6, %v5782_v46  ;;  %v2060_v22 = vadd.f32 %v4270_v35, %v1963_v19  ;;  %v4717_v35 = vld [vmem:[%s6132_s3 + $0x208] ss:$16 sps:$4 sm:$0xff]   ;;  %v4725_v19 = vld [vmem:[%s6132_s3 + $0x22c] ss:$16 sps:$4 sm:$0xff]  }
 0x1b6   :  { %v4340_v37 = vpop.f32.mrb[96].mxu0  ;;  %v2063_v11 = vadd.f32 %v4273_v7, %v1966_v10  ;;  %v4723_v7 = vld [vmem:[%s6132_s3 + $0x228] ss:$16 sps:$4 sm:$0xff]   ;;  %v4728_v10 = vld [vmem:[%s6132_s3 + $0x244] ss:$16 sps:$4 sm:$0xff]  }
 0x1b7   :  { %v2109_v12 = vadd.f32 %v4340_v37, %v5792_v20  ;;  %v2100_v13 = vpop.f32.mrb[97].mxu0  ;;  %v4726_v37 = vld [vmem:[%s6132_s3 + $0x240] ss:$16 sps:$4 sm:$0xff]  }
 0x1b8   :  { %v2101_v26 = vadd.f32 %v2100_v13, %v5786_v53  ;;  %v4341_v63 = vpop.f32.mrb[98].mxu0  ;;  %v4737_v13 = vld [vmem:[%s6132_s3 + $0x26c] ss:$16 sps:$4 sm:$0xff]  }
 0x1b9   :  { %v2112_v17 = vadd.f32 %v4341_v63, %v5794_v21  ;;  %v2103_v18 = vpop.f32.mrb[99].mxu0  ;;  %v4735_v63 = vld [vmem:[%s6132_s3 + $0x268] ss:$16 sps:$4 sm:$0xff]  }
 0x1ba   :  { %v2104_v0 = vadd.f32 %v2103_v18, %v5788_v5  ;;  %v4743_v18 = vld [vmem:[%s6132_s3 + $0x28c] ss:$16 sps:$4 sm:$0xff]  }
 0x1be   :  { %v4344_v45 = vpop.f32.mrb[100].mxu0 }
 0x1bf   :  { %v2125_v41 = vadd.f32 %v4344_v45, %v5804_v59  ;;  %v2116_v1 = vpop.f32.mrb[101].mxu0  ;;  %v4741_v45 = vld [vmem:[%s6132_s3 + $0x288] ss:$16 sps:$4 sm:$0xff]  }
 0x1c0   :  { %v2117_v46 = vadd.f32 %v2116_v1, %v5798_v40  ;;  %v4345_v24 = vpop.f32.mrb[102].mxu0  ;;  %v4749_v1 = vld [vmem:[%s6132_s3 + $0x2ac] ss:$16 sps:$4 sm:$0xff]  }
 0x1c1   :  { %v2180_v47 = vmax.f32 %v2109_v12, %v2125_v41  ;;  %v2128_v30 = vadd.f32 %v4345_v24, %v5806_v61  ;;  %v2119_v20 = vpop.f32.mrb[103].mxu0  ;;  %v4734_v12 = vld [vmem:[%s6132_s3 + $0x264] ss:$16 sps:$4 sm:$0xff]   ;;  %v4747_v24 = vld [vmem:[%s6132_s3 + $0x2a8] ss:$16 sps:$4 sm:$0xff]  }
 0x1c2   :  { %v2164_v54 = vmax.f32 %v2101_v26, %v2117_v46  ;;  %v2120_v53 = vadd.f32 %v2119_v20, %v5800_v42  ;;  %v3728_v42 = vld [vmem:[%s6134_s2] ss:$0 sm:$0xff]  ;;  %v4746_v41 = vld [vmem:[%s6132_s3 + $0x2a4] ss:$16 sps:$4 sm:$0xff]  }
 0x1c3   :  { %v2185_v3 = vmax.f32 %v2112_v17, %v2128_v30  ;;  %v4732_v26 = vld [vmem:[%s6132_s3 + $0x260] ss:$16 sps:$4 sm:$0xff]   ;;  %v4740_v17 = vld [vmem:[%s6132_s3 + $0x284] ss:$16 sps:$4 sm:$0xff]   ;;  %v4755_v30 = vld [vmem:[%s6132_s3 + $0x2cc] ss:$16 sps:$4 sm:$0xff]  }
 0x1c4   :  { %v2175_v32 = vmax.f32 %v2104_v0, %v2120_v53  ;;  %v4738_v0 = vld [vmem:[%s6132_s3 + $0x280] ss:$16 sps:$4 sm:$0xff]   ;;  %v4758_v53 = vld [vmem:[%s6132_s3 + $0x2e4] ss:$16 sps:$4 sm:$0xff]  }
 0x1c5   :  { %v4744_v46 = vld [vmem:[%s6132_s3 + $0x2a0] ss:$16 sps:$4 sm:$0xff]  }
 0x1c6   :  { %v4348_v21 = vpop.f32.mrb[104].mxu0  ;;  %v4750_v20 = vld [vmem:[%s6132_s3 + $0x2c0] ss:$16 sps:$4 sm:$0xff]  }
 0x1c7   :  { %v2141_v33 = vadd.f32 %v4348_v21, %v2044_v34  ;;  %v2132_v15 = vpop.f32.mrb[105].mxu0  ;;  %v4759_v21 = vld [vmem:[%s6132_s3 + $0x2e8] ss:$16 sps:$4 sm:$0xff]  }
 0x1c8   :  { %v2133_v5 = vadd.f32 %v2132_v15, %v5810_v14  ;;  %v4349_v28 = vpop.f32.mrb[106].mxu0  ;;  %v4767_v15 = vld [vmem:[%s6132_s3 + $0x30c] ss:$16 sps:$4 sm:$0xff]  }
 0x1c9   :  { %v2181_v59 = vmax.f32 %v2180_v47, %v2141_v33  ;;  %v2144_v36 = vadd.f32 %v4349_v28, %v2047_v39  ;;  %v2135_v38 = vpop.f32.mrb[107].mxu0  ;;  %v4752_v47 = vld [vmem:[%s6132_s3 + $0x2c4] ss:$16 sps:$4 sm:$0xff]   ;;  %v4765_v28 = vld [vmem:[%s6132_s3 + $0x308] ss:$16 sps:$4 sm:$0xff]  }
 0x1ca   :  { %v2165_v40 = vmax.f32 %v2164_v54, %v2133_v5  ;;  %v2136_v31 = vadd.f32 %v2135_v38, %v5812_v16  ;;  %v4753_v54 = vld [vmem:[%s6132_s3 + $0x2c8] ss:$16 sps:$4 sm:$0xff]   ;;  %v4764_v33 = vld [vmem:[%s6132_s3 + $0x304] ss:$16 sps:$4 sm:$0xff]   ;;  %v4762_v5 = vld [vmem:[%s6132_s3 + $0x300] ss:$16 sps:$4 sm:$0xff]  }
 0x1cb   :  { %v2186_v2 = vmax.f32 %v2185_v3, %v2144_v36  ;;  %v4761_v3 = vld [vmem:[%s6132_s3 + $0x2ec] ss:$16 sps:$4 sm:$0xff]   ;;  %v4768_v38 = vld [vmem:[%s6132_s3 + $0x320] ss:$16 sps:$4 sm:$0xff]  }
 0x1cc   :  { %v2176_v61 = vmax.f32 %v2175_v32, %v2136_v31  ;;  %v4756_v32 = vld [vmem:[%s6132_s3 + $0x2e0] ss:$16 sps:$4 sm:$0xff]   ;;  %v4773_v36 = vld [vmem:[%s6132_s3 + $0x32c] ss:$16 sps:$4 sm:$0xff]   ;;  %v4776_v31 = vld [vmem:[%s6132_s3 + $0x344] ss:$16 sps:$4 sm:$0xff]  }
 0x1ce   :  { %v4352_v43 = vpop.f32.mrb[108].mxu0 }
 0x1cf   :  { %v2157_v44 = vadd.f32 %v4352_v43, %v2060_v22  ;;  %v2148_v9 = vpop.f32.mrb[109].mxu0  ;;  %v4731_v22 = vld [vmem:[%s6132_s3 + $0x24c] ss:$16 sps:$4 sm:$0xff]   ;;  %v4777_v43 = vld [vmem:[%s6132_s3 + $0x348] ss:$16 sps:$4 sm:$0xff]  }
 0x1d0   :  { %v2149_v34 = vadd.f32 %v2148_v9, %v2052_v58  ;;  %v4353_v48 = vpop.f32.mrb[110].mxu0  ;;  %v4714_v58 = vld [vmem:[%s6132_s3 + $0x200] ss:$16 sps:$4 sm:$0xff]   ;;  %v4785_v9 = vld [vmem:[%s6132_s3 + $0x36c] ss:$16 sps:$4 sm:$0xff]  }
 0x1d1   :  { %v2182_v49 = vmax.f32 %v2181_v59, %v2157_v44  ;;  %v2160_v14 = vadd.f32 %v4353_v48, %v2063_v11  ;;  %v2151_v50 = vpop.f32.mrb[111].mxu0  ;;  %v4729_v11 = vld [vmem:[%s6132_s3 + $0x248] ss:$16 sps:$4 sm:$0xff]   ;;  %v4770_v59 = vld [vmem:[%s6132_s3 + $0x324] ss:$16 sps:$4 sm:$0xff]  }
 0x1d2   :  { %v2166_v8 = vmax.f32 %v2165_v40, %v2149_v34  ;;  %v2152_v39 = vadd.f32 %v2151_v50, %v2055_v56  ;;  %v4771_v40 = vld [vmem:[%s6132_s3 + $0x328] ss:$16 sps:$4 sm:$0xff]   ;;  %v4782_v44 = vld [vmem:[%s6132_s3 + $0x364] ss:$16 sps:$4 sm:$0xff]  }
 0x1d3   :  { %v5833_v52 = vadd.f32 %v3728_v42, %v2182_v49  ;;  %v2187_v55 = vmax.f32 %v2186_v2, %v2160_v14  ;;  %v4779_v2 = vld [vmem:[%s6132_s3 + $0x34c] ss:$16 sps:$4 sm:$0xff]   ;;  %v4783_v34 = vld [vmem:[%s6132_s3 + $0x368] ss:$16 sps:$4 sm:$0xff]   ;;  %v4788_v48 = vld [vmem:[%s6132_s3 + $0x384] ss:$16 sps:$4 sm:$0xff]  }
 0x1d4   :  { %v2173_v16 = vadd.f32 %v3728_v42, %v2166_v8  ;;  %v2177_v25 = vmax.f32 %v2176_v61, %v2152_v39  ;;  %v4774_v61 = vld [vmem:[%s6132_s3 + $0x340] ss:$16 sps:$4 sm:$0xff]   ;;  %v4791_v49 = vld [vmem:[%s6132_s3 + $0x38c] ss:$16 sps:$4 sm:$0xff]   ;;  %v4789_v50 = vld [vmem:[%s6132_s3 + $0x388] ss:$16 sps:$4 sm:$0xff]  }
 0x1d5   :  { %v2188_v57 = vadd.f32 %v3728_v42, %v2187_v55  ;;  %v4786_v14 = vld [vmem:[%s6132_s3 + $0x380] ss:$16 sps:$4 sm:$0xff]   ;;  %v4794_v8 = vld [vmem:[%s6132_s3 + $0x3a4] ss:$16 sps:$4 sm:$0xff]   ;;  %v4797_v39 = vld [vmem:[%s6132_s3 + $0x3ac] ss:$16 sps:$4 sm:$0xff]  }
 0x1d6   :  { %v2178_v51 = vadd.f32 %v3728_v42, %v2177_v25  ;;  %v2174_v60 = vmax.f32 %v2173_v16, 0.0  ;;  %v4780_v42 = vld [vmem:[%s6132_s3 + $0x360] ss:$16 sps:$4 sm:$0xff]   ;;  %v4795_v16 = vld [vmem:[%s6132_s3 + $0x3a8] ss:$16 sps:$4 sm:$0xff]  }
 0x1d7   :  { %v2189_v23 = vmax.f32 %v2188_v57, 0.0  ;;  %v4792_v55 = vld [vmem:[%s6132_s3 + $0x3a0] ss:$16 sps:$4 sm:$0xff]   ;;  %v4800_v25 = vld [vmem:[%s6132_s3 + $0x3c4] ss:$16 sps:$4 sm:$0xff]  }
 0x1d8   :  { %v2179_v29 = vmax.f32 %v2178_v51, 0.0  ;;  %v2190_v56 = vpack.c.bf16 %v2174_v60, %v2174_v60  ;;  %v4803_v57 = vld [vmem:[%s6132_s3 + $0x3cc] ss:$16 sps:$4 sm:$0xff]   ;;  %v4798_v51 = vld [vmem:[%s6132_s3 + $0x3c0] ss:$16 sps:$4 sm:$0xff]  }
 0x1d9   :  { %v2193_v6 = vpack.c.bf16 %v2189_v23, %v2189_v23  ;;  %v4801_v60 = vld [vmem:[%s6132_s3 + $0x3c8] ss:$16 sps:$4 sm:$0xff]   ;;  %v4809_v23 = vld [vmem:[%s6132_s3 + $0x3ec] ss:$16 sps:$4 sm:$0xff]  }
 0x1da   :  { %v2191_v62 = vpack.c.bf16 %v2179_v29, %v2179_v29  ;;  %v4806_v29 = vld [vmem:[%s6132_s3 + $0x3e4] ss:$16 sps:$4 sm:$0xff]  }
 0x1dc   :  { %3016 = vmatprep.mubr.bf16.mxu1 %v2191_v62  ;;  %3098 = vmatprep.mubr.bf16.mxu0 %v2191_v62  ;;  %v4804_v62 = vld [vmem:[%s6132_s3 + $0x3e0] ss:$16 sps:$4 sm:$0xff]  }
 0x1dd   :  { %3017 = vmatmul.mubr.bf16.vlgmr.msra.gmra.mrb[96].mxu1 %v2190_v56  ;;  %3099 = vmatmul.mubr.bf16.vlgmr.msra.gmra.mrb[112].mxu0 %v2190_v56  ;;  %v4810_v56 = vld [vmem:[%s6133_s5 + $0x40] sm:$0xff]  }
 0x1de   :  { %3026 = vmatpush1.bf16.msra.mxu1 %v4714_v58  ;;  %3108 = vmatpush1.bf16.msra.mxu0 %v4717_v35  ;;  %v4807_v58 = vld [vmem:[%s6132_s3 + $0x3e8] ss:$16 sps:$4 sm:$0xff]   ;;  %v2184_v35 = vmax.f32 %v5833_v52, 0.0 }
 0x1df   :  { %3057 = vmatprep.mubr.bf16.mxu1 %v2193_v6  ;;  %3139 = vmatprep.mubr.bf16.mxu0 %v2193_v6  ;;  %v4812_v6 = vld [vmem:[%s6133_s5 + $0x48] sm:$0xff]  }
 0x1e0   :  { %3027 = vmatprep.subr.bf16.mxu1 %v4722_v4  ;;  %3109 = vmatprep.subr.bf16.mxu0 %v4725_v19  ;;  %v4811_v4 = vld [vmem:[%s6133_s5] sm:$0xff]   ;;  %v2192_v19 = vpack.c.bf16 %v2184_v35, %v2184_v35  ;;  %v4813_v52 = vld [vmem:[%s6133_s5 + $0x8] sm:$0xff]  }
 0x1e2   :  { %3028 = vmatpush1.bf16.msra.mxu1 %v4720_v27  ;;  %3110 = vmatpush1.bf16.msra.mxu0 %v4723_v7  ;;  %v4814_v27 = vld [vmem:[%s6133_s5 + $0x50] sm:$0xff]  }
 0x1e3   :  { %3029 = vmatprep.subr.bf16.mxu1 %v4728_v10  ;;  %3111 = vmatprep.subr.bf16.mxu0 %v4731_v22  ;;  %v4815_v7 = vld [vmem:[%s6133_s5 + $0x10] sm:$0xff]   ;;  %v4816_v10 = vld [vmem:[%s6133_s5 + $0x58] sm:$0xff]  }
 0x1e4   :  { %v4817_v22 = vld [vmem:[%s6133_s5 + $0x18] sm:$0xff]  }
 0x1e6   :  { %3030 = vmatpush1.bf16.msra.mxu1 %v4726_v37  ;;  %3112 = vmatpush1.bf16.msra.mxu0 %v4729_v11  ;;  %v4818_v37 = vld [vmem:[%s6133_s5 + $0x60] sm:$0xff]  }
 0x1e7   :  { %3031 = vmatprep.subr.bf16.mxu1 %v4734_v12  ;;  %3113 = vmatprep.subr.bf16.mxu0 %v4737_v13  ;;  %v4819_v11 = vld [vmem:[%s6133_s5 + $0x20] sm:$0xff]   ;;  %v4820_v12 = vld [vmem:[%s6133_s5 + $0x68] sm:$0xff]  }
 0x1e8   :  { %v4821_v13 = vld [vmem:[%s6133_s5 + $0x28] sm:$0xff]  }
 0x1ea   :  { %3032 = vmatpush1.bf16.msra.mxu1 %v4732_v26  ;;  %3114 = vmatpush1.bf16.msra.mxu0 %v4735_v63  ;;  %v4822_v26 = vld [vmem:[%s6133_s5 + $0x70] sm:$0xff]  }
 0x1eb   :  { %3033 = vmatprep.subr.bf16.mxu1 %v4740_v17  ;;  %3115 = vmatprep.subr.bf16.mxu0 %v4743_v18  ;;  %v4823_v63 = vld [vmem:[%s6133_s5 + $0x30] sm:$0xff]   ;;  %v4824_v17 = vld [vmem:[%s6133_s5 + $0x78] sm:$0xff]  }
 0x1ec   :  { %v4825_v18 = vld [vmem:[%s6133_s5 + $0x38] sm:$0xff]  }
 0x1ee   :  { %3034 = vmatpush1.bf16.msra.mxu1 %v4738_v0  ;;  %3116 = vmatpush1.bf16.msra.mxu0 %v4741_v45  ;;  %v4826_v0 = vld [vmem:[%s6133_s5 + $0xc0] sm:$0xff]   ;;  %v2324_v45 = vlaneseq }
 0x1ef   :  { %3035 = vmatprep.subr.bf16.mxu1 %v4746_v41  ;;  %3117 = vmatprep.subr.bf16.mxu0 %v4749_v1 }
 0x1f0   :  { %v2325_v41 = vshrl.u32 %v2324_v45, 7 }
 0x1f2   :  { %3036 = vmatpush1.bf16.msra.mxu1 %v4744_v46  ;;  %3118 = vmatpush1.bf16.msra.mxu0 %v4747_v24  ;;  %v2326_v1 = vsub.s32 0, %v2325_v41  ;;  %v2322_v46 = vld [vmem:[%s6135_s4] sm:$0xf]  ;;  %v2330_v24 = vsub.s32 1, %v2325_v41 }
 0x1f3   :  { %3037 = vmatprep.subr.bf16.mxu1 %v4752_v47  ;;  %3119 = vmatprep.subr.bf16.mxu0 %v4755_v30  ;;  %v2338_v47 = vsub.s32 3, %v2325_v41 }
 0x1f4   :  { %v2327_v30 = vrot.slane %v2322_v46, %v2326_v1 }
 0x1f6   :  { %3038 = vmatpush1.bf16.msra.mxu1 %v4750_v20  ;;  %3120 = vmatpush1.bf16.msra.mxu0 %v4753_v54  ;;  %v2331_v20 = vrot.slane %v2322_v46, %v2330_v24  ;;  %v2339_v54 = vrot.slane %v2322_v46, %v2338_v47 }
 0x1f7   :  { %3039 = vmatprep.subr.bf16.mxu1 %v4758_v53  ;;  %3121 = vmatprep.subr.bf16.mxu0 %v4761_v3 }
 0x1fa   :  { %3040 = vmatpush1.bf16.msra.mxu1 %v4756_v32  ;;  %3122 = vmatpush1.bf16.msra.mxu0 %v4759_v21 }
 0x1fb   :  { %3041 = vmatprep.subr.bf16.mxu1 %v4764_v33  ;;  %3123 = vmatprep.subr.bf16.mxu0 %v4767_v15 }
 0x1fe   :  { %3042 = vmatpush1.bf16.msra.mxu1 %v4762_v5  ;;  %3124 = vmatpush1.bf16.msra.mxu0 %v4765_v28 }
 0x1ff   :  { %3043 = vmatprep.subr.bf16.mxu1 %v4770_v59  ;;  %3125 = vmatprep.subr.bf16.mxu0 %v4773_v36 }
 0x202   :  { %3044 = vmatpush1.bf16.msra.mxu1 %v4768_v38  ;;  %3126 = vmatpush1.bf16.msra.mxu0 %v4771_v40 }
 0x203   :  { %3045 = vmatprep.subr.bf16.mxu1 %v4776_v31  ;;  %3127 = vmatprep.subr.bf16.mxu0 %v4779_v2 }
 0x206   :  { %3046 = vmatpush1.bf16.msra.mxu1 %v4774_v61  ;;  %3128 = vmatpush1.bf16.msra.mxu0 %v4777_v43  ;;  %v4827_v43 = vld [vmem:[%s6133_s5 + $0x80] sm:$0xff]  }
 0x207   :  { %3047 = vmatprep.subr.bf16.mxu1 %v4782_v44  ;;  %3129 = vmatprep.subr.bf16.mxu0 %v4785_v9  ;;  %v4828_v9 = vld [vmem:[%s6133_s5 + $0xc8] sm:$0xff]  }
 0x20a   :  { %3048 = vmatpush1.bf16.msra.mxu1 %v4780_v42  ;;  %3130 = vmatpush1.bf16.msra.mxu0 %v4783_v34  ;;  %v4829_v34 = vld [vmem:[%s6133_s5 + $0x88] sm:$0xff]  }
 0x20b   :  { %3049 = vmatprep.subr.bf16.mxu1 %v4788_v48  ;;  %3131 = vmatprep.subr.bf16.mxu0 %v4791_v49  ;;  %v4830_v48 = vld [vmem:[%s6133_s5 + $0xd0] sm:$0xff]  }
 0x20c   :  { %v4831_v49 = vld [vmem:[%s6133_s5 + $0x90] sm:$0xff]  }
 0x20e   :  { %3050 = vmatpush1.bf16.msra.mxu1 %v4786_v14  ;;  %3132 = vmatpush1.bf16.msra.mxu0 %v4789_v50  ;;  %v4832_v14 = vld [vmem:[%s6133_s5 + $0xd8] sm:$0xff]  }
 0x20f   :  { %3051 = vmatprep.subr.bf16.mxu1 %v4794_v8  ;;  %3133 = vmatprep.subr.bf16.mxu0 %v4797_v39  ;;  %v4833_v50 = vld [vmem:[%s6133_s5 + $0x98] sm:$0xff]   ;;  %v4834_v8 = vld [vmem:[%s6133_s5 + $0xe0] sm:$0xff]  }
 0x210   :  { %v4835_v39 = vld [vmem:[%s6133_s5 + $0xa0] sm:$0xff]  }
 0x212   :  { %3052 = vmatpush1.bf16.msra.mxu1 %v4792_v55  ;;  %3134 = vmatpush1.bf16.msra.mxu0 %v4795_v16  ;;  %v2334_v55 = vsub.s32 2, %v2325_v41  ;;  %v4836_v16 = vld [vmem:[%s6133_s5 + $0xe8] sm:$0xff]  }
 0x213   :  { %3053 = vmatprep.subr.bf16.mxu1 %v4800_v25  ;;  %3135 = vmatprep.subr.bf16.mxu0 %v4803_v57  ;;  %v4837_v25 = vld [vmem:[%s6133_s5 + $0xa8] sm:$0xff]  }
 0x214   :  { %v2335_v57 = vrot.slane %v2322_v46, %v2334_v55 }
 0x216   :  { %3054 = vmatpush1.bf16.msra.mxu1 %v4798_v51  ;;  %3136 = vmatpush1.bf16.msra.mxu0 %v4801_v60  ;;  %v4838_v51 = vld [vmem:[%s6133_s5 + $0xf0] sm:$0xff]  }
 0x217   :  { %3055 = vmatprep.subr.bf16.mxu1 %v4806_v29  ;;  %3137 = vmatprep.subr.bf16.mxu0 %v4809_v23  ;;  %v4839_v60 = vld [vmem:[%s6133_s5 + $0xb0] sm:$0xff]   ;;  %v4840_v23 = vld [vmem:[%s6133_s5 + $0xf8] sm:$0xff]  }
 0x21a   :  { %3056 = vmatpush1.bf16.msra.mxu1 %v4804_v62  ;;  %3138 = vmatpush1.bf16.msra.mxu0 %v4807_v58  ;;  %v4841_v62 = vld [vmem:[%s6133_s5 + $0xb8] sm:$0xff]  }
 0x21b   :  { %4286 = vmatprep.subr.bf16.mxu1 %v4810_v56 }
 0x21d   :  { %3058 = vmatmul.mubr.bf16.vlgmr.msra.gmra.mrb[96].mxu1 %v2192_v19  ;;  %3140 = vmatmul.mubr.bf16.vlgmr.msra.gmra.mrb[112].mxu0 %v2192_v19 }
 0x21e   :  { %4287 = vmatpush3.bf16.msra.mxu1 %v4811_v4 }
 0x21f   :  { %4288 = vmatprep.subr.bf16.mxu1 %v4812_v6 }
 0x222   :  { %4289 = vmatpush3.bf16.msra.mxu1 %v4813_v52 }
 0x223   :  { %4290 = vmatprep.subr.bf16.mxu1 %v4814_v27  ;;  %v3857_v27 = vld [vmem:[%s6136_s6] ss:$0 sm:$0xff] }
 0x226   :  { %4291 = vmatpush3.bf16.msra.mxu1 %v4815_v7 }
 0x227   :  { %4292 = vmatprep.subr.bf16.mxu1 %v4816_v10 }
 0x22a   :  { %4293 = vmatpush3.bf16.msra.mxu1 %v4817_v22 }
 0x22b   :  { %4294 = vmatprep.subr.bf16.mxu1 %v4818_v37 }
 0x22e   :  { %4295 = vmatpush3.bf16.msra.mxu1 %v4819_v11 }
 0x22f   :  { %4296 = vmatprep.subr.bf16.mxu1 %v4820_v12 }
 0x232   :  { %4297 = vmatpush3.bf16.msra.mxu1 %v4821_v13 }
 0x233   :  { %4298 = vmatprep.subr.bf16.mxu1 %v4822_v26 }
 0x236   :  { %4299 = vmatpush3.bf16.msra.mxu1 %v4823_v63 }
 0x237   :  { %4300 = vmatprep.subr.bf16.mxu1 %v4824_v17 }
 0x23a   :  { %4301 = vmatpush3.bf16.msra.mxu1 %v4825_v18 }
 0x23b   :  { %4308 = vmatprep.subr.bf16.mxu1 %v4826_v0 }
 0x2f0   :  { %v3059_v53 = vpop.f32.mrb[96].mxu1  ;;  %v3141_v3 = vpop.f32.mrb[112].mxu0 }
 0x2f1   :  { %v4354_v32 = vadd.f32 %v3059_v53, %v2327_v30  ;;  %v3061_v21 = vpop.f32.mrb[97].mxu1  ;;  %v3143_v33 = vpop.f32.mrb[113].mxu0  ;;  %v4356_v29 = vadd.f32 %v3141_v3, %v2335_v57 }
 0x2f2   :  { %v4355_v15 = vadd.f32 %v3061_v21, %v2331_v20  ;;  %v4357_v5 = vadd.f32 %v3143_v33, %v2339_v54  ;;  %v3063_v28 = vpop.f32.mrb[98].mxu1  ;;  %v3145_v59 = vpop.f32.mrb[114].mxu0 }
 0x2f3   :  { %v3148_v36 = vmax.f32 %v4354_v32, 0.0  ;;  %v3064_v38 = vpop.f32.mrb[99].mxu1  ;;  %v3146_v40 = vpop.f32.mrb[115].mxu0  ;;  %v3150_v58 = vmax.f32 %v4356_v29, 0.0 }
 0x2f4   :  { %v3149_v31 = vmax.f32 %v4355_v15, 0.0  ;;  %v3151_v2 = vmax.f32 %v4357_v5, 0.0 }
 0x2f5   :  { %v3152_v44 = vpack.c.bf16 %v3148_v36, %v3148_v36  ;;  %v3154_v35 = vpack.c.bf16 %v3150_v58, %v3150_v58 }
 0x2f6   :  { %v3153_v61 = vpack.c.bf16 %v3149_v31, %v3149_v31  ;;  %v3155_v42 = vpack.c.bf16 %v3151_v2, %v3151_v2 }
 0x2f8   :  { %3451 = vmatprep.mubr.bf16.mxu1 %v3153_v61 }
 0x2f9   :  { %3452 = vmatmul.mubr.bf16.vlgmr.msra.gmra.mrb[100].mxu1 %v3152_v44 }
 0x2fa   :  { %4309 = vmatpush3.bf16.msra.mxu1 %v4827_v43  ;;  %3491 = vmatprep.mubr.bf16.mxu1 %v3155_v42 }
 0x2fb   :  { %4310 = vmatprep.subr.bf16.mxu1 %v4828_v9 }
 0x2fe   :  { %4311 = vmatpush3.bf16.msra.mxu1 %v4829_v34 }
 0x2ff   :  { %4312 = vmatprep.subr.bf16.mxu1 %v4830_v48 }
 0x302   :  { %4313 = vmatpush3.bf16.msra.mxu1 %v4831_v49 }
 0x303   :  { %4314 = vmatprep.subr.bf16.mxu1 %v4832_v14 }
 0x306   :  { %4315 = vmatpush3.bf16.msra.mxu1 %v4833_v50 }
 0x307   :  { %4316 = vmatprep.subr.bf16.mxu1 %v4834_v8 }
 0x30a   :  { %4317 = vmatpush3.bf16.msra.mxu1 %v4835_v39 }
 0x30b   :  { %4318 = vmatprep.subr.bf16.mxu1 %v4836_v16 }
 0x30e   :  { %4319 = vmatpush3.bf16.msra.mxu1 %v4837_v25 }
 0x30f   :  { %4320 = vmatprep.subr.bf16.mxu1 %v4838_v51 }
 0x312   :  { %4321 = vmatpush3.bf16.msra.mxu1 %v4839_v60 }
 0x313   :  { %4322 = vmatprep.subr.bf16.mxu1 %v4840_v23 }
 0x316   :  { %4323 = vmatpush3.bf16.msra.mxu1 %v4841_v62 }
 0x319   :  { %3492 = vmatmul.mubr.bf16.vlgmr.msra.gmra.mrb[104].mxu1 %v3154_v35 }
 0x3cc   :  { %v4302_v56 = vpop.f32.mrb[100].mxu1 }
 0x3cd   :  { %v4303_v4 = vpop.f32.mrb[101].mxu1 }
 0x3ce   :  { %v4304_v19 = vadd.f32 %v4303_v4, %v4302_v56  ;;  %v4305_v6 = vpop.f32.mrb[102].mxu1 }
 0x3cf   :  { %v4306_v52 = vpop.f32.mrb[103].mxu1 }
 0x3d0   :  { %v3454_v22 = vadd.f32 %v4304_v19, %v3857_v27 }
 0x3ec   :  { %v4324_v7 = vpop.f32.mrb[104].mxu1 }
 0x3ed   :  { %v4325_v10 = vpop.f32.mrb[105].mxu1 }
 0x3ee   :  { %v4326_v37 = vadd.f32 %v4325_v10, %v4324_v7  ;;  %v4327_v11 = vpop.f32.mrb[106].mxu1 }
 0x3ef   :  { %v4328_v12 = vpop.f32.mrb[107].mxu1 }
 0x3f0   :  { %v3494_v13 = vadd.f32 %v4326_v37, %v3454_v22 }
 0x3f2   :  { %v3500_v26 = vsel %vm3499_vm1, %v3494_v13, -inf }
 0x3f3   :  { %3501 = vmax.xlane.f32.xlu0 %v3500_v26 }
 0x480   :  { %v3502_v63 = vpop.xlane.xlu0 %3501 }
 0x481   :  { %v3503_v17 = vsub.f32 %v3494_v13, %v3502_v63 }
 0x483   :  { %v3504_v18 = vmul.f32 1.442695, %v3503_v17 }
 0x485   :  { %4842 = vpow2.f32 %v3504_v18 }
 0x48f   :  { %v4843_v0 = vpop.eup %4842 }
 0x490   :  { %v3506_v45 = vsel %vm3499_vm1, %v4843_v0, 0.0 }
 0x491   :  { %3507 = vadd.xlane.f32.xlu0 %v3506_v45 }
 0x51e   :  { %v3508_v41 = vpop.xlane.xlu0 %3507 }
 0x51f   :  { %4844 = vrcp.f32 %v3508_v41 }
 0x529   :  { %v4845_v1 = vpop.eup %4844 }
 0x52a   :  { %v3510_v46 = vmul.f32 %v4845_v1, %v4843_v0 }
 0x52c   :  { %3511 = vst.msk [vmem:[%s6137_s7] sm:$0xff] %vm3499_vm1, %v3510_v46 }

</bundles_post_ra>
